<compile_context>
chip_gen: v7x
topology: tpu7x:2x2x1
jax: 0.10.0
libtpu: 0.0.40
codegen_flags: <defaults>
</compile_context>

<pallas_src>
import functools

import jax
import jax.numpy as jnp
from jax.experimental import pallas as pl
from jax.experimental.pallas import tpu as pltpu

_LANES = 128          # vreg lane width / output slab width
_EDGE_TILE = 256      # edge rows per tile in the edge-head phase


def _pad_to(v, m):
    return ((v + m - 1) // m) * m


# ----------------------------------------------------------------------------
# Fused kernel: conv1(+ELU) -> conv2 -> edge gather -> edge MLP -> sigmoid
# ----------------------------------------------------------------------------
def fused_augmenter_kernel(
        x_ref, a_ref, s_ref,
        w1_ref, bl1_ref, bc1_ref,
        w2_ref, bl2_ref, bc2_ref,
        wm1_ref, bm1_ref, wm2_ref, bm2_ref,
        out_ref,
        xl_ref, xlb_ref, prop_ref,
        *, amp, tk, kt):
    """1-D grid of 2*kt + et steps (see module header for the step layout).

    x_ref  : (NP, DP)  bf16  node features (resident, fetched once)
    a_ref  : (NP, TK)  bf16  current column tile of dense GCN-normalized adj
    s_ref  : (TE, NP)  bf16  current row tile of the one-hot edge-gather matrix
    w*_ref : bf16 weights, b*_ref: (1, D) f32 biases (resident)
    out_ref: (TE, 128) f32   lane-dense logit slab (col 0 is the real logit)
    xl_ref : (NP, HP)  f32   xW + b of the current conv (for the amp*xl term)
    xlb_ref: (NP, HP)  bf16  bf16 copy of xl / x2 (MXU operand, cast once)
    prop_ref:(NP, HP)  f32   accumulator for A_norm @ xl
    """
    g = pl.program_id(0)
    is_conv = g < 2 * kt
    k = g % kt

    # conv1 prologue (once): xl = x @ W1 + b_lin1, plus a bf16 copy for the MXU.
    @pl.when(g == 0)
    def _():
        xl = (jnp.dot(x_ref[...], w1_ref[...],
                      preferred_element_type=jnp.float32) + bl1_ref[...])
        xl_ref[...] = xl
        xlb_ref[...] = xl.astype(jnp.bfloat16)

    # Zero the propagation accumulator at the start of each conv phase.
    @pl.when((g == 0) | (g == kt))
    def _():
        prop_ref[...] = jnp.zeros_like(prop_ref)

    # Reduction step: prop += A[:, k-tile] @ xl[k-tile rows, :]   (bf16 MXU)
    @pl.when(is_conv)
    def _():
        koff = pl.multiple_of(k * tk, tk)
        prop_ref[...] += jnp.dot(a_ref[...], xlb_ref[pl.ds(koff, tk), :],
                                 preferred_element_type=jnp.float32)

    # conv1 epilogue: finish conv1 (+ELU), stage conv2's linear term.
    @pl.when(g == kt - 1)
    def _():
        x1 = amp * xl_ref[...] - prop_ref[...] + bc1_ref[...]
        # ELU; clamp the dead branch so exp() never sees large positives.
        x1 = jnp.where(x1 > 0, x1, jnp.exp(jnp.minimum(x1, 0.0)) - 1.0)
        xl = (jnp.dot(x1.astype(jnp.bfloat16), w2_ref[...],
                      preferred_element_type=jnp.float32) + bl2_ref[...])
        xl_ref[...] = xl
        xlb_ref[...] = xl.astype(jnp.bfloat16)

    # conv2 epilogue: x2 kept resident (bf16) for the edge-head phase.
    @pl.when(g == 2 * kt - 1)
    def _():
        x2 = amp * xl_ref[...] - prop_ref[...] + bc2_ref[...]
        xlb_ref[...] = x2.astype(jnp.bfloat16)

    # Edge head: edge_emb = S_tile @ x2 (gather), 2-layer MLP, sigmoid.
    @pl.when(g >= 2 * kt)
    def _():
        edge_emb = jnp.dot(s_ref[...], xlb_ref[...],
                           preferred_element_type=jnp.float32)
        h = jnp.maximum(
            jnp.dot(edge_emb.astype(jnp.bfloat16), wm1_ref[...],
                    preferred_element_type=jnp.float32) + bm1_ref[...],
            0.0)
        # Lane-dense head: W2 padded to 128 output columns (col 0 is real).
        logit = (jnp.dot(h.astype(jnp.bfloat16), wm2_ref[...],
                         preferred_element_type=jnp.float32) + bm2_ref[...])
        out_ref[...] = jax.nn.sigmoid(logit)


# ----------------------------------------------------------------------------
# Glue: gcn_norm (dense, built padded), params, per-chip tiling, forward
# ----------------------------------------------------------------------------
def gcn_norm_dense_padded(edge_index, num_nodes, n_pad):
    """D^{-1/2}(A+I)D^{-1/2}, built directly in an (n_pad, n_pad) f32 buffer.

    A[i, j] = 1 for edge j -> i; padded rows/columns stay exactly zero."""
    src, dst = edge_index[0], edge_index[1]
    a_hat = jnp.zeros((n_pad, n_pad), jnp.float32)
    a_hat = a_hat.at[dst, src].add(1.0)
    diag = jnp.arange(num_nodes)
    a_hat = a_hat.at[diag, diag].add(1.0)
    deg = a_hat.sum(axis=1)
    dis = jnp.where(deg > 0.0, jax.lax.rsqrt(jnp.maximum(deg, 1e-12)), 0.0)
    return dis[:, None] * a_hat * dis[None, :]


def xavier_uniform(key, fan_in, fan_out):
    a = (6.0 / (fan_in + fan_out)) ** 0.5
    return jax.random.uniform(key, (fan_in, fan_out), jnp.float32, -a, a)


def init_params(key, input_dim, hidden_dim):
    k1, k2, k3, k4 = jax.random.split(key, 4)
    return {
        # conv1
        "w_lin1": xavier_uniform(k1, input_dim, hidden_dim),
        "b_lin1": jnp.ones((1, hidden_dim), jnp.float32),       # init_emb: bias=1
        "b_conv1": jnp.zeros((1, hidden_dim), jnp.float32),      # zeros(self.bias)
        # conv2
        "w_lin2": xavier_uniform(k2, hidden_dim, hidden_dim),
        "b_lin2": jnp.ones((1, hidden_dim), jnp.float32),
        "b_conv2": jnp.zeros((1, hidden_dim), jnp.float32),
        # edge MLP
        "w_mlp1": xavier_uniform(k3, hidden_dim, 2 * hidden_dim),
        "b_mlp1": jnp.ones((1, 2 * hidden_dim), jnp.float32),
        "w_mlp2": xavier_uniform(k4, 2 * hidden_dim, 1),
        "b_mlp2": jnp.ones((1, 1), jnp.float32),
    }


def _pad_w_bf16(w, rows, cols):
    out = jnp.zeros((rows, cols), jnp.float32)
    out = out.at[:w.shape[0], :w.shape[1]].set(w)
    return out.astype(jnp.bfloat16)


def _pad_b_f32(b, cols):
    b = b.reshape(1, -1)
    return jnp.zeros((1, cols), jnp.float32).at[:, :b.shape[1]].set(b)


def _select_budget():
    """(max K tile, vmem_limit_bytes) per TPU generation; conservative default."""
    kind = ""
    try:
        kind = jax.devices()[0].device_kind.lower()
    except Exception:
        pass
    if "v7" in kind or "7x" in kind:       # 64 MiB VMEM per TensorCore
        return 512, 52 * 1024 * 1024
    if "v5" in kind or "v6" in kind:       # 128 MiB VMEM
        return 1024, 100 * 1024 * 1024
    return 512, 48 * 1024 * 1024


def _vmem_bytes(np_, dp, hp, h2p, tk, te, kt, et):
    """Rough VMEM budget: invariant blocks single-buffered, streamed ones x2."""
    byt = np_ * dp * 2                                         # x (resident)
    byt += np_ * tk * 2 * (1 if kt == 1 else 2)                # A column tile
    byt += te * np_ * 2 * (1 if et == 1 else 2)                # S row tile
    byt += (dp * hp + hp * hp + hp * h2p + h2p * _LANES) * 2   # weights
    byt += (4 * hp + h2p + _LANES) * 4                         # biases
    byt += te * _LANES * 4 * 2                                 # out tile
    byt += np_ * hp * (4 + 2 + 4)                              # xl f32+bf16, prop
    return byt


def augmenter_forward(x, edge_index, params, *, amp=0.5):
    n, din = x.shape
    e = edge_index.shape[1]
    h = params["w_lin1"].shape[1]

    # Padded feature dims (128-lane padding keeps every block (8,128)-friendly).
    dp = _pad_to(din, _LANES)
    hp = _pad_to(h, _LANES)
    h2p = _pad_to(2 * h, _LANES)

    te = _EDGE_TILE
    ep = _pad_to(e, te)
    et = ep // te

    # K tile / node padding chosen per chip under an explicit VMEM budget.
    max_tk, vmem_limit = _select_budget()
    budget = int(vmem_limit * 0.9)
    np0 = _pad_to(n, _LANES)
    np_, tk, kt = np0, min(128, np0), None
    for cand in (max_tk, 512, 256, 128):
        cand = min(cand, np0)
        npc = _pad_to(np0, cand)           # pad np_ to a multiple of tk (safe)
        ktc = npc // cand
        if _vmem_bytes(npc, dp, hp, h2p, cand, te, ktc, et) <= budget:
            np_, tk, kt = npc, cand, ktc
            break
    if kt is None:                          # smallest tiling; let compiler cope
        tk = min(128, np0)
        np_ = _pad_to(np0, tk)
        kt = np_ // tk
    nsteps = 2 * kt + et

    # Dense GCN-normalized adjacency built directly into its padded buffer.
    a_pad = gcn_norm_dense_padded(edge_index, n, np_).astype(jnp.bfloat16)

    # One-hot edge-gather matrix: S[e, src[e]] += 1, S[e, dst[e]] += 1,
    # so S @ x2 == x2[src] + x2[dst]  (streamed as (TE, NP) row tiles).
    src, dst = edge_index[0], edge_index[1]
    s = jnp.zeros((ep, np_), jnp.float32)
    s = s.at[jnp.arange(e), src].add(1.0)
    s = s.at[jnp.arange(e), dst].add(1.0)
    s = s.astype(jnp.bfloat16)

    x_pad = (jnp.zeros((np_, dp), jnp.float32)
             .at[:n, :din].set(x).astype(jnp.bfloat16))

    w1 = _pad_w_bf16(params["w_lin1"], dp, hp)
    bl1 = _pad_b_f32(params["b_lin1"], hp)
    bc1 = _pad_b_f32(params["b_conv1"], hp)
    w2 = _pad_w_bf16(params["w_lin2"], hp, hp)
    bl2 = _pad_b_f32(params["b_lin2"], hp)
    bc2 = _pad_b_f32(params["b_conv2"], hp)
    wm1 = _pad_w_bf16(params["w_mlp1"], hp, h2p)
    bm1 = _pad_b_f32(params["b_mlp1"], h2p)
    wm2 = _pad_w_bf16(params["w_mlp2"], h2p, _LANES)   # lane-dense head
    bm2 = _pad_b_f32(params["b_mlp2"], _LANES)

    cost = pl.CostEstimate(
        flops=int(2 * (n * din * h + 2 * n * n * h + n * h * h
                       + e * n * h + 2 * e * h * h + 2 * e * h)),
        transcendentals=int(n * h + e),
        bytes_accessed=int((x_pad.size + a_pad.size + s.size + w1.size
                            + w2.size + wm1.size + wm2.size) * 2
                           + ep * _LANES * 4),
    )

    def run(single_buffer):
        inv = dict(pipeline_mode=pl.Buffered(1)) if single_buffer else {}
        a_pm = dict(pipeline_mode=pl.Buffered(1)) if (single_buffer and kt == 1) else {}
        s_pm = dict(pipeline_mode=pl.Buffered(1)) if (single_buffer and et == 1) else {}

        const = lambda g: (0, 0)
        # A column tile: k during the conv phases, pinned afterwards (no re-DMA).
        a_idx = lambda g: (0, jnp.where(g < 2 * kt, g % kt, kt - 1))
        # S row tile / out tile: edge tile index during the edge phase.
        e_idx = lambda g: (jnp.where(g >= 2 * kt, g - 2 * kt, 0), 0)

        return pl.pallas_call(
            functools.partial(fused_augmenter_kernel, amp=amp, tk=tk, kt=kt),
            out_shape=jax.ShapeDtypeStruct((ep, _LANES), jnp.float32),
            grid_spec=pltpu.PrefetchScalarGridSpec(
                num_scalar_prefetch=0,
                grid=(nsteps,),
                in_specs=[
                    pl.BlockSpec((np_, dp), const, **inv),          # x
                    pl.BlockSpec((np_, tk), a_idx, **a_pm),         # A column tile
                    pl.BlockSpec((te, np_), e_idx, **s_pm),         # S row tile
                    pl.BlockSpec((dp, hp), const, **inv),           # W1
                    pl.BlockSpec((1, hp), const, **inv),            # b_lin1
                    pl.BlockSpec((1, hp), const, **inv),            # b_conv1
                    pl.BlockSpec((hp, hp), const, **inv),           # W2
                    pl.BlockSpec((1, hp), const, **inv),            # b_lin2
                    pl.BlockSpec((1, hp), const, **inv),            # b_conv2
                    pl.BlockSpec((hp, h2p), const, **inv),          # W_mlp1
                    pl.BlockSpec((1, h2p), const, **inv),           # b_mlp1
                    pl.BlockSpec((h2p, _LANES), const, **inv),      # W_mlp2 (padded)
                    pl.BlockSpec((1, _LANES), const, **inv),        # b_mlp2 (padded)
                ],
                out_specs=pl.BlockSpec((te, _LANES), e_idx),
                scratch_shapes=[
                    pltpu.VMEM((np_, hp), jnp.float32),    # xl  (f32, epilogue)
                    pltpu.VMEM((np_, hp), jnp.bfloat16),   # xl/x2 bf16 MXU operand
                    pltpu.VMEM((np_, hp), jnp.float32),    # prop accumulator
                ],
            ),
            compiler_params=pltpu.CompilerParams(
                dimension_semantics=("arbitrary",),
                vmem_limit_bytes=vmem_limit,
            ),
            cost_estimate=cost,
        )(x_pad, a_pad, s, w1, bl1, bc1, w2, bl2, bc2, wm1, bm1, wm2, bm2)

    try:
        out = run(True)
    except Exception:
        # Fallback if pl.Buffered(1) is rejected by this jax version; identical
        # math, just default double-buffering on the invariant blocks.
        out = run(False)

    # Slice the lane-dense slab back to the (E, 1) logits.
    return out[:e, 0:1]


# ----------------------------------------------------------------------------
# Pure-JAX reference (mirrors the kernel's bf16 operand / f32 accumulate math)
# ----------------------------------------------------------------------------
def reference_forward(x, edge_index, params, *, amp=0.5):
    bf = lambda v: v.astype(jnp.bfloat16)
    n = x.shape[0]
    a = bf(gcn_norm_dense_padded(edge_index, n, n))

    def conv(xin, w, b_lin, b_conv):
        xl = jnp.dot(bf(xin), bf(w), preferred_element_type=jnp.float32) + b_lin
        prop = jnp.dot(a, bf(xl), preferred_element_type=jnp.float32)
        return amp * xl - prop + b_conv

    x1 = conv(x, params["w_lin1"], params["b_lin1"], params["b_conv1"])
    x1 = jnp.where(x1 > 0, x1, jnp.exp(jnp.minimum(x1, 0.0)) - 1.0)
    x2 = conv(x1, params["w_lin2"], params["b_lin2"], params["b_conv2"])

    src, dst = edge_index[0], edge_index[1]
    x2b = bf(x2).astype(jnp.float32)
    emb = x2b[src] + x2b[dst]
    hdn = jnp.maximum(
        jnp.dot(bf(emb), bf(params["w_mlp1"]),
                preferred_element_type=jnp.float32) + params["b_mlp1"], 0.0)
    logit = (jnp.dot(bf(hdn), bf(params["w_mlp2"]),
                     preferred_element_type=jnp.float32) + params["b_mlp2"])
    return jax.nn.sigmoid(logit)


# ----------------------------------------------------------------------------
if __name__ == "__main__":
    INPUT_DIM, HIDDEN_DIM = 16, 32
    N_NODES = 8

    key = jax.random.PRNGKey(0)
    k_x, k_p = jax.random.split(key)

    # Node features (N, input_dim)
    x = jax.random.normal(k_x, (N_NODES, INPUT_DIM), jnp.float32)

    # Undirected ring graph, both directions -> E = 16 edges (no self loops)
    nxt = [(i + 1) % N_NODES for i in range(N_NODES)]
    src = jnp.array(list(range(N_NODES)) + nxt, dtype=jnp.int32)
    dst = jnp.array(nxt + list(range(N_NODES)), dtype=jnp.int32)
    edge_index = jnp.stack([src, dst], axis=0)          # (2, E)

    params = init_params(k_p, INPUT_DIM, HIDDEN_DIM)

    out = augmenter_forward(x, edge_index, params, amp=0.5)
    out = jax.block_until_ready(out)

    assert out.shape == (edge_index.shape[1], 1)
    assert out.dtype == jnp.float32
    assert bool(jnp.all((out > 0.0) & (out < 1.0)))

    ref = reference_forward(x, edge_index, params, amp=0.5)
    max_err = float(jnp.max(jnp.abs(out - ref)))
    assert max_err < 5e-3, f"max abs err vs reference: {max_err}"

    print("KERNEL_OK")
</pallas_src>

<mosaic_0001>
module attributes {stable_mosaic.version = 11 : i64} {
  func.func @fused_augmenter_kernel(%arg0: i32, %arg1: memref<128x128xbf16, #tpu.memory_space<vmem>>, %arg2: memref<128x128xbf16, #tpu.memory_space<vmem>>, %arg3: memref<256x128xbf16, #tpu.memory_space<vmem>>, %arg4: memref<128x128xbf16, #tpu.memory_space<vmem>>, %arg5: memref<1x128xf32, #tpu.memory_space<vmem>>, %arg6: memref<1x128xf32, #tpu.memory_space<vmem>>, %arg7: memref<128x128xbf16, #tpu.memory_space<vmem>>, %arg8: memref<1x128xf32, #tpu.memory_space<vmem>>, %arg9: memref<1x128xf32, #tpu.memory_space<vmem>>, %arg10: memref<128x128xbf16, #tpu.memory_space<vmem>>, %arg11: memref<1x128xf32, #tpu.memory_space<vmem>>, %arg12: memref<128x128xbf16, #tpu.memory_space<vmem>>, %arg13: memref<1x128xf32, #tpu.memory_space<vmem>>, %arg14: memref<256x128xf32, #tpu.memory_space<vmem>>, %arg15: memref<128x128xf32, #tpu.memory_space<vmem>>, %arg16: memref<128x128xbf16, #tpu.memory_space<vmem>>, %arg17: memref<128x128xf32, #tpu.memory_space<vmem>>) attributes {dimension_semantics = [#tpu.dimension_semantics<arbitrary>], iteration_bounds = array<i64: 3>, scalar_prefetch = 0 : i64, scratch_operands = 3 : i64, tpu.core_type = #tpu.core_type<tc>, window_params = [{pipeline_mode = #tpu.pipeline_mode<synchronous>, transform_indices = @transform_0, window_bounds = array<i64: 128, 128>}, {pipeline_mode = #tpu.pipeline_mode<synchronous>, transform_indices = @transform_1, window_bounds = array<i64: 128, 128>}, {pipeline_mode = #tpu.pipeline_mode<synchronous>, transform_indices = @transform_2, window_bounds = array<i64: 256, 128>}, {pipeline_mode = #tpu.pipeline_mode<synchronous>, transform_indices = @transform_3, window_bounds = array<i64: 128, 128>}, {pipeline_mode = #tpu.pipeline_mode<synchronous>, transform_indices = @transform_4, window_bounds = array<i64: 1, 128>}, {pipeline_mode = #tpu.pipeline_mode<synchronous>, transform_indices = @transform_5, window_bounds = array<i64: 1, 128>}, {pipeline_mode = #tpu.pipeline_mode<synchronous>, transform_indices = @transform_6, window_bounds = array<i64: 128, 128>}, {pipeline_mode = #tpu.pipeline_mode<synchronous>, transform_indices = @transform_7, window_bounds = array<i64: 1, 128>}, {pipeline_mode = #tpu.pipeline_mode<synchronous>, transform_indices = @transform_8, window_bounds = array<i64: 1, 128>}, {pipeline_mode = #tpu.pipeline_mode<synchronous>, transform_indices = @transform_9, window_bounds = array<i64: 128, 128>}, {pipeline_mode = #tpu.pipeline_mode<synchronous>, transform_indices = @transform_10, window_bounds = array<i64: 1, 128>}, {pipeline_mode = #tpu.pipeline_mode<synchronous>, transform_indices = @transform_11, window_bounds = array<i64: 128, 128>}, {pipeline_mode = #tpu.pipeline_mode<synchronous>, transform_indices = @transform_12, window_bounds = array<i64: 1, 128>}, {transform_indices = @transform_13, window_bounds = array<i64: 256, 128>}]} {
    %c2_i32 = arith.constant 2 : i32
    %0 = arith.cmpi slt, %arg0, %c2_i32 : i32
    %c1_i32 = arith.constant 1 : i32
    %c0_i32 = arith.constant 0 : i32
    %1 = arith.cmpi eq, %c1_i32, %c0_i32 : i32
    %c1_i32_0 = arith.constant 1 : i32
    %2 = arith.select %1, %c1_i32_0, %c1_i32 : i32
    %3 = arith.remsi %arg0, %2 : i32
    %c0_i32_1 = arith.constant 0 : i32
    %4 = arith.cmpi ne, %3, %c0_i32_1 : i32
    %c0_i32_2 = arith.constant 0 : i32
    %5 = arith.cmpi slt, %3, %c0_i32_2 : i32
    %c0_i32_3 = arith.constant 0 : i32
    %6 = arith.cmpi slt, %2, %c0_i32_3 : i32
    %7 = arith.xori %5, %6 : i1
    %8 = arith.andi %7, %4 : i1
    %9 = arith.addi %3, %2 : i32
    %10 = arith.select %8, %9, %3 : i32
    %c0_i32_4 = arith.constant 0 : i32
    %11 = arith.cmpi eq, %arg0, %c0_i32_4 : i32
    %12 = arith.extui %11 : i1 to i32
    %c0_i32_5 = arith.constant 0 : i32
    %13 = arith.cmpi ne, %12, %c0_i32_5 : i32
    scf.if %13 {
      %c0 = arith.constant 0 : index
      %c0_16 = arith.constant 0 : index
      %30 = vector.load %arg1[%c0, %c0_16] : memref<128x128xbf16, #tpu.memory_space<vmem>>, vector<128x128xbf16>
      %c0_17 = arith.constant 0 : index
      %c0_18 = arith.constant 0 : index
      %31 = vector.load %arg4[%c0_17, %c0_18] : memref<128x128xbf16, #tpu.memory_space<vmem>>, vector<128x128xbf16>
      %cst = arith.constant dense<0.000000e+00> : vector<128x128xf32>
      %32 = tpu.matmul %30, %31, %cst {dimension_numbers = #tpu.dot_dimension_numbers<[1], [0], [0], [1], [0, 0, 1, 1], [], []>} : vector<128x128xbf16>, vector<128x128xbf16>, vector<128x128xf32> -> vector<128x128xf32>
      %c0_19 = arith.constant 0 : index
      %c0_20 = arith.constant 0 : index
      %33 = vector.load %arg5[%c0_19, %c0_20] : memref<1x128xf32, #tpu.memory_space<vmem>>, vector<1x128xf32>
      %34 = vector.broadcast %33 : vector<1x128xf32> to vector<128x128xf32>
      %35 = arith.addf %32, %34 : vector<128x128xf32>
      %c0_21 = arith.constant 0 : index
      %c0_22 = arith.constant 0 : index
      %36 = vector.load %arg15[%c0_21, %c0_22] : memref<128x128xf32, #tpu.memory_space<vmem>>, vector<128x128xf32>
      tpu.vector_store %arg15[%c0_21, %c0_22], %35 {strides = array<i32>} : memref<128x128xf32, #tpu.memory_space<vmem>>, vector<128x128xf32>,
      %37 = arith.truncf %35 : vector<128x128xf32> to vector<128x128xbf16>
      %c0_23 = arith.constant 0 : index
      %c0_24 = arith.constant 0 : index
      %38 = vector.load %arg16[%c0_23, %c0_24] : memref<128x128xbf16, #tpu.memory_space<vmem>>, vector<128x128xbf16>
      tpu.vector_store %arg16[%c0_23, %c0_24], %37 {strides = array<i32>} : memref<128x128xbf16, #tpu.memory_space<vmem>>, vector<128x128xbf16>,
    } else {
    }
    %c0_i32_6 = arith.constant 0 : i32
    %14 = arith.cmpi eq, %arg0, %c0_i32_6 : i32
    %c1_i32_7 = arith.constant 1 : i32
    %15 = arith.cmpi eq, %arg0, %c1_i32_7 : i32
    %16 = arith.ori %14, %15 : i1
    %17 = arith.extui %16 : i1 to i32
    %c0_i32_8 = arith.constant 0 : i32
    %18 = arith.cmpi ne, %17, %c0_i32_8 : i32
    scf.if %18 {
      %cst = arith.constant 0.000000e+00 : f32
      %30 = vector.broadcast %cst : f32 to vector<128x128xf32>
      %c0 = arith.constant 0 : index
      %c0_16 = arith.constant 0 : index
      %31 = vector.load %arg17[%c0, %c0_16] : memref<128x128xf32, #tpu.memory_space<vmem>>, vector<128x128xf32>
      tpu.vector_store %arg17[%c0, %c0_16], %30 {strides = array<i32>} : memref<128x128xf32, #tpu.memory_space<vmem>>, vector<128x128xf32>,
    } else {
    }
    %19 = arith.extui %0 : i1 to i32
    %c0_i32_9 = arith.constant 0 : i32
    %20 = arith.cmpi ne, %19, %c0_i32_9 : i32
    scf.if %20 {
      %c128_i32 = arith.constant 128 : i32
      %30 = arith.muli %10, %c128_i32 : i32
      %31 = tpu.assume_multiple %30, 128 : i32
      %c0 = arith.constant 0 : index
      %c0_16 = arith.constant 0 : index
      %32 = vector.load %arg17[%c0, %c0_16] : memref<128x128xf32, #tpu.memory_space<vmem>>, vector<128x128xf32>
      %c0_17 = arith.constant 0 : index
      %c0_18 = arith.constant 0 : index
      %33 = vector.load %arg2[%c0_17, %c0_18] : memref<128x128xbf16, #tpu.memory_space<vmem>>, vector<128x128xbf16>
      %34 = arith.index_cast %31 : i32 to index
      %c0_19 = arith.constant 0 : index
      %35 = vector.load %arg16[%34, %c0_19] : memref<128x128xbf16, #tpu.memory_space<vmem>>, vector<128x128xbf16>
      %cst = arith.constant dense<0.000000e+00> : vector<128x128xf32>
      %36 = tpu.matmul %33, %35, %cst {dimension_numbers = #tpu.dot_dimension_numbers<[1], [0], [0], [1], [0, 0, 1, 1], [], []>} : vector<128x128xbf16>, vector<128x128xbf16>, vector<128x128xf32> -> vector<128x128xf32>
      %37 = arith.addf %32, %36 : vector<128x128xf32>
      %c0_20 = arith.constant 0 : index
      %c0_21 = arith.constant 0 : index
      %38 = vector.load %arg17[%c0_20, %c0_21] : memref<128x128xf32, #tpu.memory_space<vmem>>, vector<128x128xf32>
      tpu.vector_store %arg17[%c0_20, %c0_21], %37 {strides = array<i32>} : memref<128x128xf32, #tpu.memory_space<vmem>>, vector<128x128xf32>,
    } else {
    }
    %c0_i32_10 = arith.constant 0 : i32
    %21 = arith.cmpi eq, %arg0, %c0_i32_10 : i32
    %22 = arith.extui %21 : i1 to i32
    %c0_i32_11 = arith.constant 0 : i32
    %23 = arith.cmpi ne, %22, %c0_i32_11 : i32
    scf.if %23 {
      %c0 = arith.constant 0 : index
      %c0_16 = arith.constant 0 : index
      %30 = vector.load %arg15[%c0, %c0_16] : memref<128x128xf32, #tpu.memory_space<vmem>>, vector<128x128xf32>
      %cst = arith.constant 5.000000e-01 : f32
      %31 = vector.broadcast %cst : f32 to vector<128x128xf32>
      %32 = arith.mulf %31, %30 : vector<128x128xf32>
      %c0_17 = arith.constant 0 : index
      %c0_18 = arith.constant 0 : index
      %33 = vector.load %arg17[%c0_17, %c0_18] : memref<128x128xf32, #tpu.memory_space<vmem>>, vector<128x128xf32>
      %34 = arith.subf %32, %33 : vector<128x128xf32>
      %c0_19 = arith.constant 0 : index
      %c0_20 = arith.constant 0 : index
      %35 = vector.load %arg6[%c0_19, %c0_20] : memref<1x128xf32, #tpu.memory_space<vmem>>, vector<1x128xf32>
      %36 = vector.broadcast %35 : vector<1x128xf32> to vector<128x128xf32>
      %37 = arith.addf %34, %36 : vector<128x128xf32>
      %cst_21 = arith.constant 0.000000e+00 : f32
      %38 = vector.broadcast %cst_21 : f32 to vector<128x128xf32>
      %39 = arith.cmpf ogt, %37, %38 : vector<128x128xf32>
      %cst_22 = arith.constant 0.000000e+00 : f32
      %40 = vector.broadcast %cst_22 : f32 to vector<128x128xf32>
      %41 = arith.minimumf %37, %40 : vector<128x128xf32>
      %42 = math.exp %41 : vector<128x128xf32>
      %cst_23 = arith.constant 1.000000e+00 : f32
      %43 = vector.broadcast %cst_23 : f32 to vector<128x128xf32>
      %44 = arith.subf %42, %43 : vector<128x128xf32>
      %45 = arith.select %39, %37, %44 : vector<128x128xi1>, vector<128x128xf32>
      %46 = arith.truncf %45 : vector<128x128xf32> to vector<128x128xbf16>
      %c0_24 = arith.constant 0 : index
      %c0_25 = arith.constant 0 : index
      %47 = vector.load %arg7[%c0_24, %c0_25] : memref<128x128xbf16, #tpu.memory_space<vmem>>, vector<128x128xbf16>
      %cst_26 = arith.constant dense<0.000000e+00> : vector<128x128xf32>
      %48 = tpu.matmul %46, %47, %cst_26 {dimension_numbers = #tpu.dot_dimension_numbers<[1], [0], [0], [1], [0, 0, 1, 1], [], []>} : vector<128x128xbf16>, vector<128x128xbf16>, vector<128x128xf32> -> vector<128x128xf32>
      %c0_27 = arith.constant 0 : index
      %c0_28 = arith.constant 0 : index
      %49 = vector.load %arg8[%c0_27, %c0_28] : memref<1x128xf32, #tpu.memory_space<vmem>>, vector<1x128xf32>
      %50 = vector.broadcast %49 : vector<1x128xf32> to vector<128x128xf32>
      %51 = arith.addf %48, %50 : vector<128x128xf32>
      %c0_29 = arith.constant 0 : index
      %c0_30 = arith.constant 0 : index
      %52 = vector.load %arg15[%c0_29, %c0_30] : memref<128x128xf32, #tpu.memory_space<vmem>>, vector<128x128xf32>
      tpu.vector_store %arg15[%c0_29, %c0_30], %51 {strides = array<i32>} : memref<128x128xf32, #tpu.memory_space<vmem>>, vector<128x128xf32>,
      %53 = arith.truncf %51 : vector<128x128xf32> to vector<128x128xbf16>
      %c0_31 = arith.constant 0 : index
      %c0_32 = arith.constant 0 : index
      %54 = vector.load %arg16[%c0_31, %c0_32] : memref<128x128xbf16, #tpu.memory_space<vmem>>, vector<128x128xbf16>
      tpu.vector_store %arg16[%c0_31, %c0_32], %53 {strides = array<i32>} : memref<128x128xbf16, #tpu.memory_space<vmem>>, vector<128x128xbf16>,
    } else {
    }
    %c1_i32_12 = arith.constant 1 : i32
    %24 = arith.cmpi eq, %arg0, %c1_i32_12 : i32
    %25 = arith.extui %24 : i1 to i32
    %c0_i32_13 = arith.constant 0 : i32
    %26 = arith.cmpi ne, %25, %c0_i32_13 : i32
    scf.if %26 {
      %c0 = arith.constant 0 : index
      %c0_16 = arith.constant 0 : index
      %30 = vector.load %arg15[%c0, %c0_16] : memref<128x128xf32, #tpu.memory_space<vmem>>, vector<128x128xf32>
      %cst = arith.constant 5.000000e-01 : f32
      %31 = vector.broadcast %cst : f32 to vector<128x128xf32>
      %32 = arith.mulf %31, %30 : vector<128x128xf32>
      %c0_17 = arith.constant 0 : index
      %c0_18 = arith.constant 0 : index
      %33 = vector.load %arg17[%c0_17, %c0_18] : memref<128x128xf32, #tpu.memory_space<vmem>>, vector<128x128xf32>
      %34 = arith.subf %32, %33 : vector<128x128xf32>
      %c0_19 = arith.constant 0 : index
      %c0_20 = arith.constant 0 : index
      %35 = vector.load %arg9[%c0_19, %c0_20] : memref<1x128xf32, #tpu.memory_space<vmem>>, vector<1x128xf32>
      %36 = vector.broadcast %35 : vector<1x128xf32> to vector<128x128xf32>
      %37 = arith.addf %34, %36 : vector<128x128xf32>
      %38 = arith.truncf %37 : vector<128x128xf32> to vector<128x128xbf16>
      %c0_21 = arith.constant 0 : index
      %c0_22 = arith.constant 0 : index
      %39 = vector.load %arg16[%c0_21, %c0_22] : memref<128x128xbf16, #tpu.memory_space<vmem>>, vector<128x128xbf16>
      tpu.vector_store %arg16[%c0_21, %c0_22], %38 {strides = array<i32>} : memref<128x128xbf16, #tpu.memory_space<vmem>>, vector<128x128xbf16>,
    } else {
    }
    %c2_i32_14 = arith.constant 2 : i32
    %27 = arith.cmpi sge, %arg0, %c2_i32_14 : i32
    %28 = arith.extui %27 : i1 to i32
    %c0_i32_15 = arith.constant 0 : i32
    %29 = arith.cmpi ne, %28, %c0_i32_15 : i32
    scf.if %29 {
      %c0 = arith.constant 0 : index
      %c0_16 = arith.constant 0 : index
      %30 = vector.load %arg3[%c0, %c0_16] : memref<256x128xbf16, #tpu.memory_space<vmem>>, vector<256x128xbf16>
      %c0_17 = arith.constant 0 : index
      %c0_18 = arith.constant 0 : index
      %31 = vector.load %arg16[%c0_17, %c0_18] : memref<128x128xbf16, #tpu.memory_space<vmem>>, vector<128x128xbf16>
      %cst = arith.constant dense<0.000000e+00> : vector<256x128xf32>
      %32 = tpu.matmul %30, %31, %cst {dimension_numbers = #tpu.dot_dimension_numbers<[1], [0], [0], [1], [0, 0, 1, 1], [], []>} : vector<256x128xbf16>, vector<128x128xbf16>, vector<256x128xf32> -> vector<256x128xf32>
      %33 = arith.truncf %32 : vector<256x128xf32> to vector<256x128xbf16>
      %c0_19 = arith.constant 0 : index
      %c0_20 = arith.constant 0 : index
      %34 = vector.load %arg10[%c0_19, %c0_20] : memref<128x128xbf16, #tpu.memory_space<vmem>>, vector<128x128xbf16>
      %cst_21 = arith.constant dense<0.000000e+00> : vector<256x128xf32>
      %35 = tpu.matmul %33, %34, %cst_21 {dimension_numbers = #tpu.dot_dimension_numbers<[1], [0], [0], [1], [0, 0, 1, 1], [], []>} : vector<256x128xbf16>, vector<128x128xbf16>, vector<256x128xf32> -> vector<256x128xf32>
      %c0_22 = arith.constant 0 : index
      %c0_23 = arith.constant 0 : index
      %36 = vector.load %arg11[%c0_22, %c0_23] : memref<1x128xf32, #tpu.memory_space<vmem>>, vector<1x128xf32>
      %37 = vector.broadcast %36 : vector<1x128xf32> to vector<256x128xf32>
      %38 = arith.addf %35, %37 : vector<256x128xf32>
      %cst_24 = arith.constant 0.000000e+00 : f32
      %39 = vector.broadcast %cst_24 : f32 to vector<256x128xf32>
      %40 = arith.maximumf %38, %39 : vector<256x128xf32>
      %41 = arith.truncf %40 : vector<256x128xf32> to vector<256x128xbf16>
      %c0_25 = arith.constant 0 : index
      %c0_26 = arith.constant 0 : index
      %42 = vector.load %arg12[%c0_25, %c0_26] : memref<128x128xbf16, #tpu.memory_space<vmem>>, vector<128x128xbf16>
      %cst_27 = arith.constant dense<0.000000e+00> : vector<256x128xf32>
      %43 = tpu.matmul %41, %42, %cst_27 {dimension_numbers = #tpu.dot_dimension_numbers<[1], [0], [0], [1], [0, 0, 1, 1], [], []>} : vector<256x128xbf16>, vector<128x128xbf16>, vector<256x128xf32> -> vector<256x128xf32>
      %c0_28 = arith.constant 0 : index
      %c0_29 = arith.constant 0 : index
      %44 = vector.load %arg13[%c0_28, %c0_29] : memref<1x128xf32, #tpu.memory_space<vmem>>, vector<1x128xf32>
      %45 = vector.broadcast %44 : vector<1x128xf32> to vector<256x128xf32>
      %46 = arith.addf %43, %45 : vector<256x128xf32>
      %47 = arith.negf %46 : vector<256x128xf32>
      %48 = math.exp %47 : vector<256x128xf32>
      %cst_30 = arith.constant 1.000000e+00 : f32
      %49 = vector.broadcast %cst_30 : f32 to vector<256x128xf32>
      %50 = arith.addf %49, %48 : vector<256x128xf32>
      %51 = arith.divf %49, %50 : vector<256x128xf32>
      %c0_31 = arith.constant 0 : index
      %c0_32 = arith.constant 0 : index
      %52 = vector.load %arg14[%c0_31, %c0_32] : memref<256x128xf32, #tpu.memory_space<vmem>>, vector<256x128xf32>
      tpu.vector_store %arg14[%c0_31, %c0_32], %51 {strides = array<i32>} : memref<256x128xf32, #tpu.memory_space<vmem>>, vector<256x128xf32>,
    } else {
    }
    return
  }
  func.func @transform_0(%arg0: i32) -> (i32, i32) {
    %c0_i32 = arith.constant 0 : i32
    %c0_i32_0 = arith.constant 0 : i32
    %c0_i32_1 = arith.constant 0 : i32
    return %c0_i32, %c0_i32_0 : i32, i32
  }
  func.func @transform_1(%arg0: i32) -> (i32, i32) {
    %c2_i32 = arith.constant 2 : i32
    %0 = arith.cmpi slt, %arg0, %c2_i32 : i32
    %c1_i32 = arith.constant 1 : i32
    %c0_i32 = arith.constant 0 : i32
    %1 = arith.cmpi eq, %c1_i32, %c0_i32 : i32
    %c1_i32_0 = arith.constant 1 : i32
    %2 = arith.select %1, %c1_i32_0, %c1_i32 : i32
    %3 = arith.remsi %arg0, %2 : i32
    %c0_i32_1 = arith.constant 0 : i32
    %4 = arith.cmpi ne, %3, %c0_i32_1 : i32
    %c0_i32_2 = arith.constant 0 : i32
    %5 = arith.cmpi slt, %3, %c0_i32_2 : i32
    %c0_i32_3 = arith.constant 0 : i32
    %6 = arith.cmpi slt, %2, %c0_i32_3 : i32
    %7 = arith.xori %5, %6 : i1
    %8 = arith.andi %7, %4 : i1
    %9 = arith.addi %3, %2 : i32
    %10 = arith.select %8, %9, %3 : i32
    %c0_i32_4 = arith.constant 0 : i32
    %11 = arith.select %0, %10, %c0_i32_4 : i32
    %c0_i32_5 = arith.constant 0 : i32
    %c0_i32_6 = arith.constant 0 : i32
    return %c0_i32_5, %11 : i32, i32
  }
  func.func @transform_2(%arg0: i32) -> (i32, i32) {
    %c2_i32 = arith.constant 2 : i32
    %0 = arith.cmpi sge, %arg0, %c2_i32 : i32
    %c2_i32_0 = arith.constant 2 : i32
    %1 = arith.subi %arg0, %c2_i32_0 : i32
    %c0_i32 = arith.constant 0 : i32
    %2 = arith.select %0, %1, %c0_i32 : i32
    %c0_i32_1 = arith.constant 0 : i32
    %c0_i32_2 = arith.constant 0 : i32
    return %2, %c0_i32_1 : i32, i32
  }
  func.func @transform_3(%arg0: i32) -> (i32, i32) {
    %c0_i32 = arith.constant 0 : i32
    %c0_i32_0 = arith.constant 0 : i32
    %c0_i32_1 = arith.constant 0 : i32
    return %c0_i32, %c0_i32_0 : i32, i32
  }
  func.func @transform_4(%arg0: i32) -> (i32, i32) {
    %c0_i32 = arith.constant 0 : i32
    %c0_i32_0 = arith.constant 0 : i32
    %c0_i32_1 = arith.constant 0 : i32
    return %c0_i32, %c0_i32_0 : i32, i32
  }
  func.func @transform_5(%arg0: i32) -> (i32, i32) {
    %c0_i32 = arith.constant 0 : i32
    %c0_i32_0 = arith.constant 0 : i32
    %c0_i32_1 = arith.constant 0 : i32
    return %c0_i32, %c0_i32_0 : i32, i32
  }
  func.func @transform_6(%arg0: i32) -> (i32, i32) {
    %c0_i32 = arith.constant 0 : i32
    %c0_i32_0 = arith.constant 0 : i32
    %c0_i32_1 = arith.constant 0 : i32
    return %c0_i32, %c0_i32_0 : i32, i32
  }
  func.func @transform_7(%arg0: i32) -> (i32, i32) {
    %c0_i32 = arith.constant 0 : i32
    %c0_i32_0 = arith.constant 0 : i32
    %c0_i32_1 = arith.constant 0 : i32
    return %c0_i32, %c0_i32_0 : i32, i32
  }
  func.func @transform_8(%arg0: i32) -> (i32, i32) {
    %c0_i32 = arith.constant 0 : i32
    %c0_i32_0 = arith.constant 0 : i32
    %c0_i32_1 = arith.constant 0 : i32
    return %c0_i32, %c0_i32_0 : i32, i32
  }
  func.func @transform_9(%arg0: i32) -> (i32, i32) {
    %c0_i32 = arith.constant 0 : i32
    %c0_i32_0 = arith.constant 0 : i32
    %c0_i32_1 = arith.constant 0 : i32
    return %c0_i32, %c0_i32_0 : i32, i32
  }
  func.func @transform_10(%arg0: i32) -> (i32, i32) {
    %c0_i32 = arith.constant 0 : i32
    %c0_i32_0 = arith.constant 0 : i32
    %c0_i32_1 = arith.constant 0 : i32
    return %c0_i32, %c0_i32_0 : i32, i32
  }
  func.func @transform_11(%arg0: i32) -> (i32, i32) {
    %c0_i32 = arith.constant 0 : i32
    %c0_i32_0 = arith.constant 0 : i32
    %c0_i32_1 = arith.constant 0 : i32
    return %c0_i32, %c0_i32_0 : i32, i32
  }
  func.func @transform_12(%arg0: i32) -> (i32, i32) {
    %c0_i32 = arith.constant 0 : i32
    %c0_i32_0 = arith.constant 0 : i32
    %c0_i32_1 = arith.constant 0 : i32
    return %c0_i32, %c0_i32_0 : i32, i32
  }
  func.func @transform_13(%arg0: i32) -> (i32, i32) {
    %c2_i32 = arith.constant 2 : i32
    %0 = arith.cmpi sge, %arg0, %c2_i32 : i32
    %c2_i32_0 = arith.constant 2 : i32
    %1 = arith.subi %arg0, %c2_i32_0 : i32
    %c0_i32 = arith.constant 0 : i32
    %2 = arith.select %0, %1, %c0_i32 : i32
    %c0_i32_1 = arith.constant 0 : i32
    %c0_i32_2 = arith.constant 0 : i32
    return %2, %c0_i32_1 : i32, i32
  }
}

module attributes {stable_mosaic.version = 11 : i64} {
  func.func @fused_augmenter_kernel(%arg0: i32, %arg1: memref<128x128xbf16, #tpu.memory_space<vmem>>, %arg2: memref<128x128xbf16, #tpu.memory_space<vmem>>, %arg3: memref<256x128xbf16, #tpu.memory_space<vmem>>, %arg4: memref<128x128xbf16, #tpu.memory_space<vmem>>, %arg5: memref<1x128xf32, #tpu.memory_space<vmem>>, %arg6: memref<1x128xf32, #tpu.memory_space<vmem>>, %arg7: memref<128x128xbf16, #tpu.memory_space<vmem>>, %arg8: memref<1x128xf32, #tpu.memory_space<vmem>>, %arg9: memref<1x128xf32, #tpu.memory_space<vmem>>, %arg10: memref<128x128xbf16, #tpu.memory_space<vmem>>, %arg11: memref<1x128xf32, #tpu.memory_space<vmem>>, %arg12: memref<128x128xbf16, #tpu.memory_space<vmem>>, %arg13: memref<1x128xf32, #tpu.memory_space<vmem>>, %arg14: memref<256x128xf32, #tpu.memory_space<vmem>>, %arg15: memref<128x128xf32, #tpu.memory_space<vmem>>, %arg16: memref<128x128xbf16, #tpu.memory_space<vmem>>, %arg17: memref<128x128xf32, #tpu.memory_space<vmem>>) attributes {dimension_semantics = [#tpu.dimension_semantics<arbitrary>], iteration_bounds = array<i64: 3>, scalar_prefetch = 0 : i64, scratch_operands = 3 : i64, tpu.core_type = #tpu.core_type<tc>, window_params = [{pipeline_mode = #tpu.pipeline_mode<synchronous>, transform_indices = @transform_0, window_bounds = array<i64: 128, 128>}, {transform_indices = @transform_1, window_bounds = array<i64: 128, 128>}, {transform_indices = @transform_2, window_bounds = array<i64: 256, 128>}, {pipeline_mode = #tpu.pipeline_mode<synchronous>, transform_indices = @transform_3, window_bounds = array<i64: 128, 128>}, {pipeline_mode = #tpu.pipeline_mode<synchronous>, transform_indices = @transform_4, window_bounds = array<i64: 1, 128>}, {pipeline_mode = #tpu.pipeline_mode<synchronous>, transform_indices = @transform_5, window_bounds = array<i64: 1, 128>}, {pipeline_mode = #tpu.pipeline_mode<synchronous>, transform_indices = @transform_6, window_bounds = array<i64: 128, 128>}, {pipeline_mode = #tpu.pipeline_mode<synchronous>, transform_indices = @transform_7, window_bounds = array<i64: 1, 128>}, {pipeline_mode = #tpu.pipeline_mode<synchronous>, transform_indices = @transform_8, window_bounds = array<i64: 1, 128>}, {pipeline_mode = #tpu.pipeline_mode<synchronous>, transform_indices = @transform_9, window_bounds = array<i64: 128, 128>}, {pipeline_mode = #tpu.pipeline_mode<synchronous>, transform_indices = @transform_10, window_bounds = array<i64: 1, 128>}, {pipeline_mode = #tpu.pipeline_mode<synchronous>, transform_indices = @transform_11, window_bounds = array<i64: 128, 128>}, {pipeline_mode = #tpu.pipeline_mode<synchronous>, transform_indices = @transform_12, window_bounds = array<i64: 1, 128>}, {transform_indices = @transform_13, window_bounds = array<i64: 256, 128>}]} {
    %c2_i32 = arith.constant 2 : i32
    %0 = arith.cmpi slt, %arg0, %c2_i32 : i32
    %c1_i32 = arith.constant 1 : i32
    %c0_i32 = arith.constant 0 : i32
    %1 = arith.cmpi eq, %c1_i32, %c0_i32 : i32
    %c1_i32_0 = arith.constant 1 : i32
    %2 = arith.select %1, %c1_i32_0, %c1_i32 : i32
    %3 = arith.remsi %arg0, %2 : i32
    %c0_i32_1 = arith.constant 0 : i32
    %4 = arith.cmpi ne, %3, %c0_i32_1 : i32
    %c0_i32_2 = arith.constant 0 : i32
    %5 = arith.cmpi slt, %3, %c0_i32_2 : i32
    %c0_i32_3 = arith.constant 0 : i32
    %6 = arith.cmpi slt, %2, %c0_i32_3 : i32
    %7 = arith.xori %5, %6 : i1
    %8 = arith.andi %7, %4 : i1
    %9 = arith.addi %3, %2 : i32
    %10 = arith.select %8, %9, %3 : i32
    %c0_i32_4 = arith.constant 0 : i32
    %11 = arith.cmpi eq, %arg0, %c0_i32_4 : i32
    %12 = arith.extui %11 : i1 to i32
    %c0_i32_5 = arith.constant 0 : i32
    %13 = arith.cmpi ne, %12, %c0_i32_5 : i32
    scf.if %13 {
      %c0 = arith.constant 0 : index
      %c0_16 = arith.constant 0 : index
      %30 = vector.load %arg1[%c0, %c0_16] : memref<128x128xbf16, #tpu.memory_space<vmem>>, vector<128x128xbf16>
      %c0_17 = arith.constant 0 : index
      %c0_18 = arith.constant 0 : index
      %31 = vector.load %arg4[%c0_17, %c0_18] : memref<128x128xbf16, #tpu.memory_space<vmem>>, vector<128x128xbf16>
      %cst = arith.constant dense<0.000000e+00> : vector<128x128xf32>
      %32 = tpu.matmul %30, %31, %cst {dimension_numbers = #tpu.dot_dimension_numbers<[1], [0], [0], [1], [0, 0, 1, 1], [], []>} : vector<128x128xbf16>, vector<128x128xbf16>, vector<128x128xf32> -> vector<128x128xf32>
      %c0_19 = arith.constant 0 : index
      %c0_20 = arith.constant 0 : index
      %33 = vector.load %arg5[%c0_19, %c0_20] : memref<1x128xf32, #tpu.memory_space<vmem>>, vector<1x128xf32>
      %34 = vector.broadcast %33 : vector<1x128xf32> to vector<128x128xf32>
      %35 = arith.addf %32, %34 : vector<128x128xf32>
      %c0_21 = arith.constant 0 : index
      %c0_22 = arith.constant 0 : index
      %36 = vector.load %arg15[%c0_21, %c0_22] : memref<128x128xf32, #tpu.memory_space<vmem>>, vector<128x128xf32>
      tpu.vector_store %arg15[%c0_21, %c0_22], %35 {strides = array<i32>} : memref<128x128xf32, #tpu.memory_space<vmem>>, vector<128x128xf32>,
      %37 = arith.truncf %35 : vector<128x128xf32> to vector<128x128xbf16>
      %c0_23 = arith.constant 0 : index
      %c0_24 = arith.constant 0 : index
      %38 = vector.load %arg16[%c0_23, %c0_24] : memref<128x128xbf16, #tpu.memory_space<vmem>>, vector<128x128xbf16>
      tpu.vector_store %arg16[%c0_23, %c0_24], %37 {strides = array<i32>} : memref<128x128xbf16, #tpu.memory_space<vmem>>, vector<128x128xbf16>,
    } else {
    }
    %c0_i32_6 = arith.constant 0 : i32
    %14 = arith.cmpi eq, %arg0, %c0_i32_6 : i32
    %c1_i32_7 = arith.constant 1 : i32
    %15 = arith.cmpi eq, %arg0, %c1_i32_7 : i32
    %16 = arith.ori %14, %15 : i1
    %17 = arith.extui %16 : i1 to i32
    %c0_i32_8 = arith.constant 0 : i32
    %18 = arith.cmpi ne, %17, %c0_i32_8 : i32
    scf.if %18 {
      %cst = arith.constant 0.000000e+00 : f32
      %30 = vector.broadcast %cst : f32 to vector<128x128xf32>
      %c0 = arith.constant 0 : index
      %c0_16 = arith.constant 0 : index
      %31 = vector.load %arg17[%c0, %c0_16] : memref<128x128xf32, #tpu.memory_space<vmem>>, vector<128x128xf32>
      tpu.vector_store %arg17[%c0, %c0_16], %30 {strides = array<i32>} : memref<128x128xf32, #tpu.memory_space<vmem>>, vector<128x128xf32>,
    } else {
    }
    %19 = arith.extui %0 : i1 to i32
    %c0_i32_9 = arith.constant 0 : i32
    %20 = arith.cmpi ne, %19, %c0_i32_9 : i32
    scf.if %20 {
      %c128_i32 = arith.constant 128 : i32
      %30 = arith.muli %10, %c128_i32 : i32
      %31 = tpu.assume_multiple %30, 128 : i32
      %c0 = arith.constant 0 : index
      %c0_16 = arith.constant 0 : index
      %32 = vector.load %arg17[%c0, %c0_16] : memref<128x128xf32, #tpu.memory_space<vmem>>, vector<128x128xf32>
      %c0_17 = arith.constant 0 : index
      %c0_18 = arith.constant 0 : index
      %33 = vector.load %arg2[%c0_17, %c0_18] : memref<128x128xbf16, #tpu.memory_space<vmem>>, vector<128x128xbf16>
      %34 = arith.index_cast %31 : i32 to index
      %c0_19 = arith.constant 0 : index
      %35 = vector.load %arg16[%34, %c0_19] : memref<128x128xbf16, #tpu.memory_space<vmem>>, vector<128x128xbf16>
      %cst = arith.constant dense<0.000000e+00> : vector<128x128xf32>
      %36 = tpu.matmul %33, %35, %cst {dimension_numbers = #tpu.dot_dimension_numbers<[1], [0], [0], [1], [0, 0, 1, 1], [], []>} : vector<128x128xbf16>, vector<128x128xbf16>, vector<128x128xf32> -> vector<128x128xf32>
      %37 = arith.addf %32, %36 : vector<128x128xf32>
      %c0_20 = arith.constant 0 : index
      %c0_21 = arith.constant 0 : index
      %38 = vector.load %arg17[%c0_20, %c0_21] : memref<128x128xf32, #tpu.memory_space<vmem>>, vector<128x128xf32>
      tpu.vector_store %arg17[%c0_20, %c0_21], %37 {strides = array<i32>} : memref<128x128xf32, #tpu.memory_space<vmem>>, vector<128x128xf32>,
    } else {
    }
    %c0_i32_10 = arith.constant 0 : i32
    %21 = arith.cmpi eq, %arg0, %c0_i32_10 : i32
    %22 = arith.extui %21 : i1 to i32
    %c0_i32_11 = arith.constant 0 : i32
    %23 = arith.cmpi ne, %22, %c0_i32_11 : i32
    scf.if %23 {
      %c0 = arith.constant 0 : index
      %c0_16 = arith.constant 0 : index
      %30 = vector.load %arg15[%c0, %c0_16] : memref<128x128xf32, #tpu.memory_space<vmem>>, vector<128x128xf32>
      %cst = arith.constant 5.000000e-01 : f32
      %31 = vector.broadcast %cst : f32 to vector<128x128xf32>
      %32 = arith.mulf %31, %30 : vector<128x128xf32>
      %c0_17 = arith.constant 0 : index
      %c0_18 = arith.constant 0 : index
      %33 = vector.load %arg17[%c0_17, %c0_18] : memref<128x128xf32, #tpu.memory_space<vmem>>, vector<128x128xf32>
      %34 = arith.subf %32, %33 : vector<128x128xf32>
      %c0_19 = arith.constant 0 : index
      %c0_20 = arith.constant 0 : index
      %35 = vector.load %arg6[%c0_19, %c0_20] : memref<1x128xf32, #tpu.memory_space<vmem>>, vector<1x128xf32>
      %36 = vector.broadcast %35 : vector<1x128xf32> to vector<128x128xf32>
      %37 = arith.addf %34, %36 : vector<128x128xf32>
      %cst_21 = arith.constant 0.000000e+00 : f32
      %38 = vector.broadcast %cst_21 : f32 to vector<128x128xf32>
      %39 = arith.cmpf ogt, %37, %38 : vector<128x128xf32>
      %cst_22 = arith.constant 0.000000e+00 : f32
      %40 = vector.broadcast %cst_22 : f32 to vector<128x128xf32>
      %41 = arith.minimumf %37, %40 : vector<128x128xf32>
      %42 = math.exp %41 : vector<128x128xf32>
      %cst_23 = arith.constant 1.000000e+00 : f32
      %43 = vector.broadcast %cst_23 : f32 to vector<128x128xf32>
      %44 = arith.subf %42, %43 : vector<128x128xf32>
      %45 = arith.select %39, %37, %44 : vector<128x128xi1>, vector<128x128xf32>
      %46 = arith.truncf %45 : vector<128x128xf32> to vector<128x128xbf16>
      %c0_24 = arith.constant 0 : index
      %c0_25 = arith.constant 0 : index
      %47 = vector.load %arg7[%c0_24, %c0_25] : memref<128x128xbf16, #tpu.memory_space<vmem>>, vector<128x128xbf16>
      %cst_26 = arith.constant dense<0.000000e+00> : vector<128x128xf32>
      %48 = tpu.matmul %46, %47, %cst_26 {dimension_numbers = #tpu.dot_dimension_numbers<[1], [0], [0], [1], [0, 0, 1, 1], [], []>} : vector<128x128xbf16>, vector<128x128xbf16>, vector<128x128xf32> -> vector<128x128xf32>
      %c0_27 = arith.constant 0 : index
      %c0_28 = arith.constant 0 : index
      %49 = vector.load %arg8[%c0_27, %c0_28] : memref<1x128xf32, #tpu.memory_space<vmem>>, vector<1x128xf32>
      %50 = vector.broadcast %49 : vector<1x128xf32> to vector<128x128xf32>
      %51 = arith.addf %48, %50 : vector<128x128xf32>
      %c0_29 = arith.constant 0 : index
      %c0_30 = arith.constant 0 : index
      %52 = vector.load %arg15[%c0_29, %c0_30] : memref<128x128xf32, #tpu.memory_space<vmem>>, vector<128x128xf32>
      tpu.vector_store %arg15[%c0_29, %c0_30], %51 {strides = array<i32>} : memref<128x128xf32, #tpu.memory_space<vmem>>, vector<128x128xf32>,
      %53 = arith.truncf %51 : vector<128x128xf32> to vector<128x128xbf16>
      %c0_31 = arith.constant 0 : index
      %c0_32 = arith.constant 0 : index
      %54 = vector.load %arg16[%c0_31, %c0_32] : memref<128x128xbf16, #tpu.memory_space<vmem>>, vector<128x128xbf16>
      tpu.vector_store %arg16[%c0_31, %c0_32], %53 {strides = array<i32>} : memref<128x128xbf16, #tpu.memory_space<vmem>>, vector<128x128xbf16>,
    } else {
    }
    %c1_i32_12 = arith.constant 1 : i32
    %24 = arith.cmpi eq, %arg0, %c1_i32_12 : i32
    %25 = arith.extui %24 : i1 to i32
    %c0_i32_13 = arith.constant 0 : i32
    %26 = arith.cmpi ne, %25, %c0_i32_13 : i32
    scf.if %26 {
      %c0 = arith.constant 0 : index
      %c0_16 = arith.constant 0 : index
      %30 = vector.load %arg15[%c0, %c0_16] : memref<128x128xf32, #tpu.memory_space<vmem>>, vector<128x128xf32>
      %cst = arith.constant 5.000000e-01 : f32
      %31 = vector.broadcast %cst : f32 to vector<128x128xf32>
      %32 = arith.mulf %31, %30 : vector<128x128xf32>
      %c0_17 = arith.constant 0 : index
      %c0_18 = arith.constant 0 : index
      %33 = vector.load %arg17[%c0_17, %c0_18] : memref<128x128xf32, #tpu.memory_space<vmem>>, vector<128x128xf32>
      %34 = arith.subf %32, %33 : vector<128x128xf32>
      %c0_19 = arith.constant 0 : index
      %c0_20 = arith.constant 0 : index
      %35 = vector.load %arg9[%c0_19, %c0_20] : memref<1x128xf32, #tpu.memory_space<vmem>>, vector<1x128xf32>
      %36 = vector.broadcast %35 : vector<1x128xf32> to vector<128x128xf32>
      %37 = arith.addf %34, %36 : vector<128x128xf32>
      %38 = arith.truncf %37 : vector<128x128xf32> to vector<128x128xbf16>
      %c0_21 = arith.constant 0 : index
      %c0_22 = arith.constant 0 : index
      %39 = vector.load %arg16[%c0_21, %c0_22] : memref<128x128xbf16, #tpu.memory_space<vmem>>, vector<128x128xbf16>
      tpu.vector_store %arg16[%c0_21, %c0_22], %38 {strides = array<i32>} : memref<128x128xbf16, #tpu.memory_space<vmem>>, vector<128x128xbf16>,
    } else {
    }
    %c2_i32_14 = arith.constant 2 : i32
    %27 = arith.cmpi sge, %arg0, %c2_i32_14 : i32
    %28 = arith.extui %27 : i1 to i32
    %c0_i32_15 = arith.constant 0 : i32
    %29 = arith.cmpi ne, %28, %c0_i32_15 : i32
    scf.if %29 {
      %c0 = arith.constant 0 : index
      %c0_16 = arith.constant 0 : index
      %30 = vector.load %arg3[%c0, %c0_16] : memref<256x128xbf16, #tpu.memory_space<vmem>>, vector<256x128xbf16>
      %c0_17 = arith.constant 0 : index
      %c0_18 = arith.constant 0 : index
      %31 = vector.load %arg16[%c0_17, %c0_18] : memref<128x128xbf16, #tpu.memory_space<vmem>>, vector<128x128xbf16>
      %cst = arith.constant dense<0.000000e+00> : vector<256x128xf32>
      %32 = tpu.matmul %30, %31, %cst {dimension_numbers = #tpu.dot_dimension_numbers<[1], [0], [0], [1], [0, 0, 1, 1], [], []>} : vector<256x128xbf16>, vector<128x128xbf16>, vector<256x128xf32> -> vector<256x128xf32>
      %33 = arith.truncf %32 : vector<256x128xf32> to vector<256x128xbf16>
      %c0_19 = arith.constant 0 : index
      %c0_20 = arith.constant 0 : index
      %34 = vector.load %arg10[%c0_19, %c0_20] : memref<128x128xbf16, #tpu.memory_space<vmem>>, vector<128x128xbf16>
      %cst_21 = arith.constant dense<0.000000e+00> : vector<256x128xf32>
      %35 = tpu.matmul %33, %34, %cst_21 {dimension_numbers = #tpu.dot_dimension_numbers<[1], [0], [0], [1], [0, 0, 1, 1], [], []>} : vector<256x128xbf16>, vector<128x128xbf16>, vector<256x128xf32> -> vector<256x128xf32>
      %c0_22 = arith.constant 0 : index
      %c0_23 = arith.constant 0 : index
      %36 = vector.load %arg11[%c0_22, %c0_23] : memref<1x128xf32, #tpu.memory_space<vmem>>, vector<1x128xf32>
      %37 = vector.broadcast %36 : vector<1x128xf32> to vector<256x128xf32>
      %38 = arith.addf %35, %37 : vector<256x128xf32>
      %cst_24 = arith.constant 0.000000e+00 : f32
      %39 = vector.broadcast %cst_24 : f32 to vector<256x128xf32>
      %40 = arith.maximumf %38, %39 : vector<256x128xf32>
      %41 = arith.truncf %40 : vector<256x128xf32> to vector<256x128xbf16>
      %c0_25 = arith.constant 0 : index
      %c0_26 = arith.constant 0 : index
      %42 = vector.load %arg12[%c0_25, %c0_26] : memref<128x128xbf16, #tpu.memory_space<vmem>>, vector<128x128xbf16>
      %cst_27 = arith.constant dense<0.000000e+00> : vector<256x128xf32>
      %43 = tpu.matmul %41, %42, %cst_27 {dimension_numbers = #tpu.dot_dimension_numbers<[1], [0], [0], [1], [0, 0, 1, 1], [], []>} : vector<256x128xbf16>, vector<128x128xbf16>, vector<256x128xf32> -> vector<256x128xf32>
      %c0_28 = arith.constant 0 : index
      %c0_29 = arith.constant 0 : index
      %44 = vector.load %arg13[%c0_28, %c0_29] : memref<1x128xf32, #tpu.memory_space<vmem>>, vector<1x128xf32>
      %45 = vector.broadcast %44 : vector<1x128xf32> to vector<256x128xf32>
      %46 = arith.addf %43, %45 : vector<256x128xf32>
      %47 = arith.negf %46 : vector<256x128xf32>
      %48 = math.exp %47 : vector<256x128xf32>
      %cst_30 = arith.constant 1.000000e+00 : f32
      %49 = vector.broadcast %cst_30 : f32 to vector<256x128xf32>
      %50 = arith.addf %49, %48 : vector<256x128xf32>
      %51 = arith.divf %49, %50 : vector<256x128xf32>
      %c0_31 = arith.constant 0 : index
      %c0_32 = arith.constant 0 : index
      %52 = vector.load %arg14[%c0_31, %c0_32] : memref<256x128xf32, #tpu.memory_space<vmem>>, vector<256x128xf32>
      tpu.vector_store %arg14[%c0_31, %c0_32], %51 {strides = array<i32>} : memref<256x128xf32, #tpu.memory_space<vmem>>, vector<256x128xf32>,
    } else {
    }
    return
  }
  func.func @transform_0(%arg0: i32) -> (i32, i32) {
    %c0_i32 = arith.constant 0 : i32
    %c0_i32_0 = arith.constant 0 : i32
    %c0_i32_1 = arith.constant 0 : i32
    return %c0_i32, %c0_i32_0 : i32, i32
  }
  func.func @transform_1(%arg0: i32) -> (i32, i32) {
    %c2_i32 = arith.constant 2 : i32
    %0 = arith.cmpi slt, %arg0, %c2_i32 : i32
    %c1_i32 = arith.constant 1 : i32
    %c0_i32 = arith.constant 0 : i32
    %1 = arith.cmpi eq, %c1_i32, %c0_i32 : i32
    %c1_i32_0 = arith.constant 1 : i32
    %2 = arith.select %1, %c1_i32_0, %c1_i32 : i32
    %3 = arith.remsi %arg0, %2 : i32
    %c0_i32_1 = arith.constant 0 : i32
    %4 = arith.cmpi ne, %3, %c0_i32_1 : i32
    %c0_i32_2 = arith.constant 0 : i32
    %5 = arith.cmpi slt, %3, %c0_i32_2 : i32
    %c0_i32_3 = arith.constant 0 : i32
    %6 = arith.cmpi slt, %2, %c0_i32_3 : i32
    %7 = arith.xori %5, %6 : i1
    %8 = arith.andi %7, %4 : i1
    %9 = arith.addi %3, %2 : i32
    %10 = arith.select %8, %9, %3 : i32
    %c0_i32_4 = arith.constant 0 : i32
    %11 = arith.select %0, %10, %c0_i32_4 : i32
    %c0_i32_5 = arith.constant 0 : i32
    %c0_i32_6 = arith.constant 0 : i32
    return %c0_i32_5, %11 : i32, i32
  }
  func.func @transform_2(%arg0: i32) -> (i32, i32) {
    %c2_i32 = arith.constant 2 : i32
    %0 = arith.cmpi sge, %arg0, %c2_i32 : i32
    %c2_i32_0 = arith.constant 2 : i32
    %1 = arith.subi %arg0, %c2_i32_0 : i32
    %c0_i32 = arith.constant 0 : i32
    %2 = arith.select %0, %1, %c0_i32 : i32
    %c0_i32_1 = arith.constant 0 : i32
    %c0_i32_2 = arith.constant 0 : i32
    return %2, %c0_i32_1 : i32, i32
  }
  func.func @transform_3(%arg0: i32) -> (i32, i32) {
    %c0_i32 = arith.constant 0 : i32
    %c0_i32_0 = arith.constant 0 : i32
    %c0_i32_1 = arith.constant 0 : i32
    return %c0_i32, %c0_i32_0 : i32, i32
  }
  func.func @transform_4(%arg0: i32) -> (i32, i32) {
    %c0_i32 = arith.constant 0 : i32
    %c0_i32_0 = arith.constant 0 : i32
    %c0_i32_1 = arith.constant 0 : i32
    return %c0_i32, %c0_i32_0 : i32, i32
  }
  func.func @transform_5(%arg0: i32) -> (i32, i32) {
    %c0_i32 = arith.constant 0 : i32
    %c0_i32_0 = arith.constant 0 : i32
    %c0_i32_1 = arith.constant 0 : i32
    return %c0_i32, %c0_i32_0 : i32, i32
  }
  func.func @transform_6(%arg0: i32) -> (i32, i32) {
    %c0_i32 = arith.constant 0 : i32
    %c0_i32_0 = arith.constant 0 : i32
    %c0_i32_1 = arith.constant 0 : i32
    return %c0_i32, %c0_i32_0 : i32, i32
  }
  func.func @transform_7(%arg0: i32) -> (i32, i32) {
    %c0_i32 = arith.constant 0 : i32
    %c0_i32_0 = arith.constant 0 : i32
    %c0_i32_1 = arith.constant 0 : i32
    return %c0_i32, %c0_i32_0 : i32, i32
  }
  func.func @transform_8(%arg0: i32) -> (i32, i32) {
    %c0_i32 = arith.constant 0 : i32
    %c0_i32_0 = arith.constant 0 : i32
    %c0_i32_1 = arith.constant 0 : i32
    return %c0_i32, %c0_i32_0 : i32, i32
  }
  func.func @transform_9(%arg0: i32) -> (i32, i32) {
    %c0_i32 = arith.constant 0 : i32
    %c0_i32_0 = arith.constant 0 : i32
    %c0_i32_1 = arith.constant 0 : i32
    return %c0_i32, %c0_i32_0 : i32, i32
  }
  func.func @transform_10(%arg0: i32) -> (i32, i32) {
    %c0_i32 = arith.constant 0 : i32
    %c0_i32_0 = arith.constant 0 : i32
    %c0_i32_1 = arith.constant 0 : i32
    return %c0_i32, %c0_i32_0 : i32, i32
  }
  func.func @transform_11(%arg0: i32) -> (i32, i32) {
    %c0_i32 = arith.constant 0 : i32
    %c0_i32_0 = arith.constant 0 : i32
    %c0_i32_1 = arith.constant 0 : i32
    return %c0_i32, %c0_i32_0 : i32, i32
  }
  func.func @transform_12(%arg0: i32) -> (i32, i32) {
    %c0_i32 = arith.constant 0 : i32
    %c0_i32_0 = arith.constant 0 : i32
    %c0_i32_1 = arith.constant 0 : i32
    return %c0_i32, %c0_i32_0 : i32, i32
  }
  func.func @transform_13(%arg0: i32) -> (i32, i32) {
    %c2_i32 = arith.constant 2 : i32
    %0 = arith.cmpi sge, %arg0, %c2_i32 : i32
    %c2_i32_0 = arith.constant 2 : i32
    %1 = arith.subi %arg0, %c2_i32_0 : i32
    %c0_i32 = arith.constant 0 : i32
    %2 = arith.select %0, %1, %c0_i32 : i32
    %c0_i32_1 = arith.constant 0 : i32
    %c0_i32_2 = arith.constant 0 : i32
    return %2, %c0_i32_1 : i32, i32
  }
}

</mosaic_0001>

<bundles_post_ra>
// kernel: tpu_custom_call.1
= control target key start
LH: loop header
LB: loop body
LE: loop exit
PB: predicated region body
PF: predicated region fallthrough
CT: control target
= control target key end

     0   :  { %s4631_s0 = inlined_call_operand.hbm [shape: bf16[128,128], index: 0, kind: input, shape index: {}]   ;;  %s4632_s1 = inlined_call_operand.hbm [shape: bf16[128,128], index: 1, kind: input, shape index: {}]   ;;  %s4633_s2 = inlined_call_operand.hbm [shape: bf16[256,128], index: 2, kind: input, shape index: {}]   ;;  %s4634_s3 = inlined_call_operand.hbm [shape: bf16[128,128], index: 3, kind: input, shape index: {}]   ;;  %s4635_s4 = inlined_call_operand.vmem [shape: f32[1,128], index: 4, kind: input, shape index: {}]   ;;  %s4636_s5 = inlined_call_operand.vmem [shape: f32[1,128], index: 5, kind: input, shape index: {}]   ;;  %s4637_s6 = inlined_call_operand.hbm [shape: bf16[128,128], index: 6, kind: input, shape index: {}]   ;;  %s4638_s7 = inlined_call_operand.vmem [shape: f32[1,128], index: 7, kind: input, shape index: {}]   ;;  %s4639_s8 = inlined_call_operand.vmem [shape: f32[1,128], index: 8, kind: input, shape index: {}]   ;;  %s4640_s9 = inlined_call_operand.hbm [shape: bf16[128,128], index: 9, kind: input, shape index: {}]   ;;  %s4641_s10 = inlined_call_operand.vmem [shape: f32[1,128], index: 10, kind: input, shape index: {}]   ;;  %s4642_s11 = inlined_call_operand.hbm [shape: bf16[128,128], index: 11, kind: input, shape index: {}]   ;;  %s4643_s12 = inlined_call_operand.vmem [shape: f32[1,128], index: 12, kind: input, shape index: {}]   ;;  %s4644_s13 = inlined_call_operand.hbm [shape: f32[256,128], index: 13, kind: output, shape index: {}]  }
   0x1   :  { %4663 = sst [smem:[#allocation25_spill]] %s4631_s0 }
   0x2   :  { %4664 = sst [smem:[#allocation26_spill]] %s4632_s1 }
   0x3   :  { %4665 = sst [smem:[#allocation27_spill]] %s4633_s2 }
   0x4   :  { %4666 = sst [smem:[#allocation28_spill]] %s4634_s3 }
   0x5   :  { %4667 = sst [smem:[#allocation29_spill]] %s4636_s5 }
   0x6   :  { %4668 = sst [smem:[#allocation30_spill]] %s4638_s7 }
   0x7   :  { %4669 = sst [smem:[#allocation31_spill]] %s4639_s8 }
   0x8   :  { %4670 = sst [smem:[#allocation32_spill]] %s4640_s9 }
   0x9   :  { %4671 = sst [smem:[#allocation33_spill]] %s4641_s10 }
   0xa   :  { %4672 = sst [smem:[#allocation34_spill]] %s4643_s12 }
   0xb   :  { %4673 = sst [smem:[#allocation35_spill]] %s4644_s13 }
   0xc   :  { %18 = vsyncpa [#allocation6], 0 }
   0xd   :  { %19 = vsyncpa [#allocation9], 0 }
   0xe   :  { %20 = vsyncpa [#allocation12], 0 }
   0xf   :  { %21 = vsyncpa [#allocation15], 0 }
  0x10   :  { %22 = vsyncpa [#allocation7], 0 }
  0x11   :  { %24 = vsyncpa [#allocation7 + $0x1], 0  ;;  %s4032_s25 = smov 0   ;;  %s4034_s26 = smov 0  }
  0x12   :  { %s4036_s27 = smov 0   ;;  %s4038_s28 = smov 0  }
  0x13 LB: > { %s4053_s29 = sadd.s32 4294967295, %s3947_s28   ;;  %p2759_p0 = scmp.ge.s32.totalorder %s3947_s28, 1  ;;  %s3947_s28 = sphi %s4038_s28, %s4721_s28   ;;  %s3943_s27 = sphi %s4036_s27, %s4720_s27   ;;  %s3939_s26 = sphi %s4034_s26, %s4719_s26   ;;  %s3935_s25 = sphi %s4032_s25, %s4718_s25  }
  0x14   : > { %p4647_p1 = scmp.eq.s32.totalorder %s4053_s29, 0  ;;  %p351_p2 = scmp.lt.s32.totalorder %s3947_s28, 4 }
  0x15   : > { %s3949_s14 = smov [#allocation8]   ;;  %s3950_s16 = smov [#allocation11]  }
  0x16   : > { %p4059_p4 = pnand %p2759_p0, %p351_p2  ;;  %s376_s15 = sshll.u32 %s3949_s14, 4  ;;  %s4063_s15 = int_to_ptr.vmem [resolvable:$true] %s376_s15 }
  0x17   : > { %s408_s17 = sshll.u32 %s3950_s16, 4  ;;  %s3951_s19 = smov [#allocation14]   ;;  %s4067_s17 = int_to_ptr.vmem [resolvable:$true] %s408_s17 }
  0x18   : > { %s4674_s30 = scalar_select %p4059_p4, 1, 0 }
  0x19   : > { %p4646_p5 = pneg %p4059_p4  ;;  %s446_s20 = sshll.u32 %s3951_s19, 4  ;;  %s4078_s20 = int_to_ptr.vmem [resolvable:$true] %s446_s20 }
  0x1a   : > { %s3952_s21 = smov [#allocation5]   ;;  %s4676_s1 = sld [smem:[#allocation26_spill]] }
  0x1b   : > { %p4074_p6 = pnand %p4646_p5, %p4647_p1  ;;  %s4080_s22 = sshll.u32 %s3952_s21, 4  ;;  %s364_s22 = int_to_ptr.vmem [resolvable:$true] %s4080_s22 }
  0x1d   : > { %s4675_s18 = scalar_select %p4074_p6, 1, 0 }
  0x1e   : > { %p4090_p8 = pneg %p4074_p6 }
  0x20   : > { %s3667_s14 = scalar_lea.hbm %s4676_s1, 1024 }
  0x21   : > { %p3668_p7 = scmp.ne.s32.totalorder %s4676_s1, %s3667_s14  ;;  %p3674_p11 = scmp.lt.u32.totalorder %s3667_s14, %s4676_s1 }
  0x22   : > { %s4677_s12 = scalar_select %p4090_p8, 1, 0 }
  0x23   : > { %p3670_p9 = pnand %p4090_p8, %p3668_p7 }
  0x25   : > { %p3671_p10 = pneg %p3670_p9 }
  0x27   : > { %p3676_p12 = pnand %p3674_p11, %p3671_p10 }
  0x29   : > { %3679 = shalt.err (!%p3676_p12)
}
  0x2a   : > { %s3680_s13 = scalar_lea.vmem %s4063_s15, 1024  ;;  %p3688_p3 = scmp.lt.s32.totalorder %s4063_s15, %s4063_s15 }
  0x2b   : > { %p3681_p13 = scmp.ne.s32.totalorder %s4063_s15, %s3680_s13  ;;  %p3689_p5 = scmp.lt.s32.totalorder %s3680_s13, %s3680_s13 }
  0x2d   : > { %p3683_p0 = pnand %p3681_p13, %p4090_p8  ;;  %p3690_p7 = por %p3689_p5, %p3688_p3 }
  0x2f   : > { %p3684_p2 = pneg %p3683_p0 }
  0x31   : > { %p3691_p9 = pnand %p3690_p7, %p3684_p2 }
  0x33   : > { %3694 = shalt.err (!%p3691_p9)
}
  0x34   : > { %s4651_s23 = smov 64   ;;  %s4653_s24 = smov 4  }
  0x35   : > { %3366 = dma.hbm_to_vmem [thread:$0]  (!%p4074_p6), %s4676_s1, 1024, %s4063_s15, [#allocation9], %s4651_s23, %s4651_s23, %s4653_s24  }
  0x36   : > { %s4678_s3 = sld [smem:[#allocation28_spill]] }
  0x3c   : > { %s3695_s13 = scalar_lea.hbm %s4678_s3, 1024 }
  0x3d   : > { %p3696_p3 = scmp.ne.s32.totalorder %s4678_s3, %s3695_s13  ;;  %p3702_p11 = scmp.lt.u32.totalorder %s3695_s13, %s4678_s3 }
  0x3f   : > { %p3698_p5 = pnand %p3696_p3, %p4090_p8 }
  0x41   : > { %p3699_p10 = pneg %p3698_p5 }
  0x43   : > { %p3704_p12 = pnand %p3702_p11, %p3699_p10 }
  0x45   : > { %3707 = shalt.err (!%p3704_p12)
}
  0x46   : > { %s3708_s15 = scalar_lea.vmem %s4067_s17, 1024  ;;  %p3716_p7 = scmp.lt.s32.totalorder %s4067_s17, %s4067_s17 }
  0x47   : > { %p3709_p13 = scmp.ne.s32.totalorder %s4067_s17, %s3708_s15  ;;  %p3717_p9 = scmp.lt.s32.totalorder %s3708_s15, %s3708_s15 }
  0x49   : > { %p3711_p0 = pnand %p3709_p13, %p4090_p8  ;;  %p3718_p3 = por %p3717_p9, %p3716_p7 }
  0x4b   : > { %p3712_p2 = pneg %p3711_p0 }
  0x4d   : > { %p3719_p5 = pnand %p3718_p3, %p3712_p2 }
  0x4f   : > { %3722 = shalt.err (!%p3719_p5)
}
  0x50   : > { %3372 = dma.hbm_to_vmem [thread:$0]  (!%p4074_p6), %s4678_s3, 1024, %s4067_s17, [#allocation12], %s4651_s23, %s4651_s23, %s4653_s24  }
  0x51   : > { %s4679_s9 = sld [smem:[#allocation32_spill]] }
  0x57   : > { %s3723_s14 = scalar_lea.hbm %s4679_s9, 1024 }
  0x58   : > { %p3724_p10 = scmp.ne.s32.totalorder %s4679_s9, %s3723_s14  ;;  %p3730_p13 = scmp.lt.u32.totalorder %s3723_s14, %s4679_s9 }
  0x5a   : > { %p3726_p11 = pnand %p3724_p10, %p4090_p8 }
  0x5c   : > { %p3727_p12 = pneg %p3726_p11 }
  0x5e   : > { %p3732_p0 = pnand %p3730_p13, %p3727_p12 }
  0x60   : > { %3735 = shalt.err (!%p3732_p0)
}
  0x61   : > { %s3736_s17 = scalar_lea.vmem %s4078_s20, 1024  ;;  %p3744_p3 = scmp.lt.s32.totalorder %s4078_s20, %s4078_s20 }
  0x62   : > { %p3737_p2 = scmp.ne.s32.totalorder %s4078_s20, %s3736_s17  ;;  %p3745_p5 = scmp.lt.s32.totalorder %s3736_s17, %s3736_s17 }
  0x64   : > { %p3739_p7 = pnand %p3737_p2, %p4090_p8  ;;  %p3746_p10 = por %p3745_p5, %p3744_p3 }
  0x66   : > { %p3740_p9 = pneg %p3739_p7 }
  0x68   : > { %p3747_p11 = pnand %p3746_p10, %p3740_p9 }
  0x6a   : > { %3750 = shalt.err (!%p3747_p11)
}
  0x6b   : > { %3378 = dma.hbm_to_vmem [thread:$0]  (!%p4074_p6), %s4679_s9, 1024, %s4078_s20, [#allocation15], %s4651_s23, %s4651_s23, %s4653_s24  }
  0x6c   : > { %s4680_s0 = sld [smem:[#allocation25_spill]] }
  0x72   : > { %s3751_s10 = scalar_lea.hbm %s4680_s0, 1024 }
  0x73   : > { %p3752_p12 = scmp.ne.s32.totalorder %s4680_s0, %s3751_s10  ;;  %p3758_p2 = scmp.lt.u32.totalorder %s3751_s10, %s4680_s0 }
  0x75   : > { %p3754_p13 = pnand %p3752_p12, %p4090_p8 }
  0x77   : > { %p3755_p0 = pneg %p3754_p13 }
  0x79   : > { %p3760_p7 = pnand %p3758_p2, %p3755_p0 }
  0x7b   : > { %3763 = shalt.err (!%p3760_p7)
}
  0x7c   : > { %s3764_s13 = scalar_lea.vmem %s364_s22, 1024  ;;  %p3772_p10 = scmp.lt.s32.totalorder %s364_s22, %s364_s22 }
  0x7d   : > { %p3765_p9 = scmp.ne.s32.totalorder %s364_s22, %s3764_s13  ;;  %p3773_p11 = scmp.lt.s32.totalorder %s3764_s13, %s3764_s13 }
  0x7f   : > { %p3767_p3 = pnand %p3765_p9, %p4090_p8  ;;  %p3774_p1 = por %p3773_p11, %p3772_p10 }
  0x81   : > { %p3768_p5 = pneg %p3767_p3 }
  0x83   : > { %p3775_p4 = pnand %p3774_p1, %p3768_p5 }
  0x85   : > { %3778 = shalt.err (!%p3775_p4)
}
  0x86   : > { %3363 = dma.hbm_to_vmem [thread:$0]  (!%p4074_p6), %s4680_s0, 1024, %s364_s22, [#allocation6], %s4651_s23, %s4651_s23, %s4653_s24  }
  0x87   : > { %s2754_s15 = sadd.s32 4294967294, %s3947_s28   ;;  %s4190_s5 = sadd.s32 1, %s3947_s28  }
  0x88   : > { %p4650_p1 = scmp.ge.s32.totalorder %s3947_s28, 2  ;;  %p79_p4 = scmp.ge.s32.totalorder %s4190_s5, 2 }
  0x89   : > { %s2756_s7 = sadd.s32 4294967294, %s4190_s5  ;;  %s85_s10 = sadd.s32 1, %s3943_s27 }
  0x8a   : > { %s78_s8 = scalar_select %p4650_p1, %s2754_s15, 0 }
  0x8b   : > { %s4723_s7 = smov (!%p79_p4, %s2756_s7), 0  ;;  %p98_p12 = scmp.ne.s32.totalorder %s3939_s26, %s3935_s25 }
  0x8c   : > { %s82_s14 = ssub.s32 %s78_s8, %s4723_s7  ;;  %p337_p13 = scmp.ne.s32.totalorder %s3943_s27, %s3939_s26 }
  0x8d   : > { %p83_p0 = scmp.eq.s32.totalorder %s82_s14, 0  ;;  %p4681_p2 = scmp.eq.s32.totalorder %s4053_s29, 0 }
  0x8e   : > { %p338_p9 = scmp.eq.s32.totalorder %s4053_s29, 2  ;;  %p344_p3 = scmp.eq.s32.totalorder %s2754_s15, 2 }
  0x8f   : > { %p4204_p7 = por %p4681_p2, %p98_p12  ;;  %p4655_p11 = scmp.ge.s32.totalorder %s4053_s29, 2 }
  0x90   : > { %s4210_s16 = scalar_select %p83_p0, %s3943_s27, %s85_s10  }
  0x91   : > { %s4682_s22 = scalar_select %p4204_p7, 1, 0 }
  0x92   : > { %4683 = sst [smem:[#allocation24_spill]] %s4210_s16  ;;  %p4212_p5 = por %p338_p9, %p337_p13 }
  0x93   : > { %p4216_p10 = por %p344_p3, %p98_p12  ;;  %s2762_s13 = sadd.s32 4294967294, %s4053_s29 }
  0x94   : > { %s4684_s19 = scalar_select %p4212_p5, 1, 0 }
  0x95   : > { %s4685_s21 = scalar_select %p4216_p10, 1, 0 }
  0x96   : > { %p4686_p4 = scmp.ne.s32.totalorder %s4674_s30, 0  ;;  %s4725_s13 = smov (!%p4655_p11, %s2762_s13), 0 }
  0x97   : > { %s3955_s17 = smov [#allocation10]   ;;  %s2906_s7 = sshll.u32 %s4725_s13, 11 }
  0x98   : > { %p4687_p2 = pneg %p4686_p4  ;;  %s395_s15 = sshll.u32 %s3955_s17, 4  ;;  %s396_s15 = int_to_ptr.vmem [resolvable:$true] %s395_s15 }
  0x99   : > { %s4689_s2 = sld [smem:[#allocation27_spill]] }
  0x9a   : > { %p4227_p1 = pnand %p4687_p2, %p4204_p7 }
  0x9c   : > { %p3781_p13 = pneg %p4227_p1 }
  0x9f   : > { %s394_s14 = scalar_lea.hbm %s4689_s2, %s2906_s7  ;;  %s3784_s1 = scalar_lea.hbm %s4689_s2, 2048 }
  0xa0   : > { %s3779_s23 = scalar_lea.hbm %s394_s14, 2048  ;;  %p3785_p3 = scmp.lt.u32.totalorder %s394_s14, %s4689_s2 }
  0xa1   : > { %p3780_p12 = scmp.ne.s32.totalorder %s394_s14, %s3779_s23  ;;  %p3786_p2 = scmp.lt.u32.totalorder %s3784_s1, %s3779_s23 }
  0xa2   : > { %p3788_p10 = scmp.lt.u32.totalorder %s3779_s23, %s394_s14 }
  0xa3   : > { %p3782_p0 = pnand %p3781_p13, %p3780_p12  ;;  %p3787_p11 = por %p3786_p2, %p3785_p3 }
  0xa5   : > { %p3783_p9 = pneg %p3782_p0  ;;  %p3789_p5 = por %p3788_p10, %p3787_p11 }
  0xa7   : > { %p3790_p7 = pnand %p3789_p5, %p3783_p9 }
  0xa9   : > { %3793 = shalt.err (!%p3790_p7)
}
  0xaa   : > { %s3794_s7 = scalar_lea.vmem %s396_s15, 2048  ;;  %p3802_p6 = scmp.lt.s32.totalorder %s396_s15, %s396_s15 }
  0xab   : > { %p3795_p4 = scmp.ne.s32.totalorder %s396_s15, %s3794_s7  ;;  %p3803_p8 = scmp.lt.s32.totalorder %s3794_s7, %s3794_s7 }
  0xad   : > { %p3797_p12 = pnand %p3795_p4, %p3781_p13  ;;  %p3804_p2 = por %p3803_p8, %p3802_p6 }
  0xaf   : > { %p3798_p0 = pneg %p3797_p12 }
  0xb1   : > { %p3805_p3 = pnand %p3804_p2, %p3798_p0 }
  0xb3   : > { %3808 = shalt.err (!%p3805_p3)
}
  0xb4   : > { %s4690_s0 = smov 4   ;;  %s4691_s1 = smov 64  }
  0xb5   : > { %3369 = dma.hbm_to_vmem [thread:$0]  (!%p4227_p1), %s394_s14, 2048, %s396_s15, [#allocation9], %s4691_s1, %s4691_s1, %s4690_s0  }
  0xb6   : > { %s3956_s3 = smov [#allocation13]   ;;  %s3957_s24 = smov [#allocation16]  }
  0xb7   : > { %s427_s23 = sshll.u32 %s3956_s3, 4  ;;  %s462_s8 = sshll.u32 %s3957_s24, 4  ;;  %s428_s23 = int_to_ptr.vmem [resolvable:$true] %s427_s23  ;;  %s463_s8 = int_to_ptr.vmem [resolvable:$true] %s462_s8 }
  0xb8   : > { %s3809_s2 = scalar_lea.hbm %s4637_s6, 1024  ;;  %p4692_p8 = scmp.ne.s32.totalorder %s4677_s12, 0 }
  0xb9   : > { %p3810_p6 = scmp.ne.s32.totalorder %s4637_s6, %s3809_s2  ;;  %p3816_p1 = scmp.lt.u32.totalorder %s3809_s2, %s4637_s6 }
  0xbb   : > { %p3812_p7 = pnand %p3810_p6, %p4692_p8 }
  0xbd   : > { %p3813_p5 = pneg %p3812_p7 }
  0xbf   : > { %p3818_p10 = pnand %p3816_p1, %p3813_p5 }
  0xc1   : > { %3821 = shalt.err (!%p3818_p10)
}
  0xc2   : > { %s3822_s15 = scalar_lea.vmem %s428_s23, 1024  ;;  %p3830_p9 = scmp.lt.s32.totalorder %s428_s23, %s428_s23 }
  0xc3   : > { %p3823_p11 = scmp.ne.s32.totalorder %s428_s23, %s3822_s15  ;;  %p3831_p12 = scmp.lt.s32.totalorder %s3822_s15, %s3822_s15 }
  0xc5   : > { %p3825_p4 = pnand %p3823_p11, %p4692_p8  ;;  %p3832_p0 = por %p3831_p12, %p3830_p9 }
  0xc7   : > { %p3826_p13 = pneg %p3825_p4 }
  0xc9   : > { %p3833_p2 = pnand %p3832_p0, %p3826_p13 }
  0xcb   : > { %3836 = shalt.err (!%p3833_p2)
}
  0xcc   : > { %p4693_p3 = scmp.ne.s32.totalorder %s4675_s18, 0  ;;  %s3837_s3 = scalar_lea.hbm %s4642_s11, 1024 }
  0xcd   : > { %p3838_p6 = scmp.ne.s32.totalorder %s4642_s11, %s3837_s3  ;;  %p3844_p1 = scmp.lt.u32.totalorder %s3837_s3, %s4642_s11 }
  0xce   : > { %3375 = dma.hbm_to_vmem [thread:$0]  (!%p4693_p3), %s4637_s6, 1024, %s428_s23, [#allocation12], %s4691_s1, %s4691_s1, %s4690_s0  }
  0xcf   : > { %p3840_p7 = pnand %p3838_p6, %p4692_p8 }
  0xd1   : > { %p3841_p5 = pneg %p3840_p7 }
  0xd3   : > { %p3846_p10 = pnand %p3844_p1, %p3841_p5 }
  0xd5   : > { %3849 = shalt.err (!%p3846_p10)
}
  0xd6   : > { %s3850_s20 = scalar_lea.vmem %s463_s8, 1024  ;;  %p3858_p9 = scmp.lt.s32.totalorder %s463_s8, %s463_s8 }
  0xd7   : > { %p3851_p11 = scmp.ne.s32.totalorder %s463_s8, %s3850_s20  ;;  %p3859_p12 = scmp.lt.s32.totalorder %s3850_s20, %s3850_s20 }
  0xd9   : > { %p3853_p4 = pnand %p3851_p11, %p4692_p8  ;;  %p3860_p0 = por %p3859_p12, %p3858_p9 }
  0xdb   : > { %p3854_p13 = pneg %p3853_p4 }
  0xdd   : > { %p3861_p2 = pnand %p3860_p0, %p3854_p13 }
  0xdf   : > { %3864 = shalt.err (!%p3861_p2)
}
  0xe0   : > { %3381 = dma.hbm_to_vmem [thread:$0]  (!%p4693_p3), %s4642_s11, 1024, %s463_s8, [#allocation15], %s4691_s1, %s4691_s1, %s4690_s0  }
  0xe1   : > { %p4694_p6 = scmp.ne.s32.totalorder %s4674_s30, 0 }
  0xe2   : > { %p4695_p8 = scmp.eq.s32.totalorder (!%p4694_p6), %s4053_s29, 0 }
  0xe3   : > { %481 = sbr.rel (%p4694_p6) target bundleno = 1887 (0x75f), region = 72 }
  0xea   : > { %3910 = dma.done.wait (%p4695_p8), [#allocation6], 1024   ;;  %p4696_p7 = pmov %p4695_p8 }
  0xec   : > { %3912 = vsyncadd (%p4696_p7), [#allocation6], 4294966272  ;;  %p4697_p5 = pmov %p4696_p7 }
  0xee   : > { %3914 = dma.done.wait (%p4697_p5), [#allocation9], 1024   ;;  %p4698_p1 = pmov %p4697_p5 }
  0xef   : > { %p4699_p10 = scmp.ne.s32.totalorder %s4682_s22, 0 }
  0xf0   : > { %3916 = vsyncadd (%p4698_p1), [#allocation9], 4294966272 }
  0xf1   : > { %3918 = dma.done.wait (%p4699_p10), [#allocation9], 2048  }
  0xf2   : > { %3920 = vsyncadd (%p4699_p10), [#allocation9], 4294965248  ;;  %p4700_p3 = pmov %p4698_p1 }
  0xf3   : > { %p4701_p11 = pmov %p4698_p1 }
  0xf4   : > { %3922 = dma.done.wait (%p4700_p3), [#allocation12], 2048  }
  0xf5   : > { %3924 = vsyncadd (%p4701_p11), [#allocation12], 4294965248  ;;  %p4702_p4 = pmov %p4698_p1 }
  0xf6   : > { %p4703_p13 = pmov %p4698_p1 }
  0xf7   : > { %3926 = dma.done.wait (%p4702_p4), [#allocation15], 2048  }
  0xf8   : > { %3928 = vsyncadd (%p4703_p13), [#allocation15], 4294965248  ;;  %s541_s12 = sand.u32 1, %s3939_s26   ;;  %p4704_p9 = scmp.ne.s32.totalorder %s4053_s29, 0 }
  0xf9   : > { %s2776_s30 = sshll.u32 %s541_s12, 8  ;;  %v3443_v0 = vld [vmem:[#allocation11] sm:$0xff] (!%p4704_p9)   ;;  %v3444_v1 = vld [vmem:[#allocation11 + $0x8] sm:$0xff] (!%p4704_p9)   ;;  %v3445_v2 = vld [vmem:[#allocation11 + $0x10] sm:$0xff] (!%p4704_p9)  }
  0xfa   : > { %s4325_s18 = scalar_lea.vmem [#allocation17], %s2776_s30  ;;  %557 = sbr.rel (%p4704_p9) target bundleno = 510 (0x1fe), region = 104  ;;  %3028 = vmatprep.subr.bf16.mxu0 (!%p4704_p9), %v3443_v0  ;;  %3268 = vmatprep.subr.bf16.mxu1 (!%p4704_p9), %v3443_v0  ;;  %v3446_v3 = vld [vmem:[#allocation11 + $0x18] sm:$0xff] (!%p4704_p9)   ;;  %v3451_v4 = vld [vmem:[#allocation5] sm:$0xff] (!%p4704_p9)   ;;  %v3448_v7 = vld [vmem:[#allocation11 + $0x28] sm:$0xff] (!%p4704_p9)  }
  0xfb   : > { %3029 = vmatpush3.bf16.msra.mxu0 (!%p4704_p9), %v3443_v0  ;;  %3276 = vmatpush3.bf16.msra.mxu1 (!%p4704_p9), %v3443_v0  ;;  %v3452_v5 = vld [vmem:[#allocation5 + $0x20] sm:$0xff] (!%p4704_p9)   ;;  %v3449_v8 = vld [vmem:[#allocation11 + $0x30] sm:$0xff] (!%p4704_p9)   ;;  %v3450_v9 = vld [vmem:[#allocation11 + $0x38] sm:$0xff] (!%p4704_p9)  }
  0xfc   : > { %3030 = vmatprep.subr.bf16.mxu0 (!%p4704_p9), %v3444_v1  ;;  %3269 = vmatprep.subr.bf16.mxu1 (!%p4704_p9), %v3444_v1  ;;  %v3447_v6 = vld [vmem:[#allocation11 + $0x20] sm:$0xff] (!%p4704_p9)   ;;  %v3453_v10 = vld [vmem:[#allocation5 + $0x8] sm:$0xff] (!%p4704_p9)   ;;  %v3455_v12 = vld [vmem:[#allocation5 + $0x10] sm:$0xff] (!%p4704_p9)  }
  0xfd   : > { %3044 = vmatprep.mubr.bf16.mxu0 (!%p4704_p9), %v3451_v4  ;;  %3052 = vmatprep.mubr.bf16.mxu1 (!%p4704_p9), %v3452_v5  ;;  %v3454_v11 = vld [vmem:[#allocation5 + $0x28] sm:$0xff] (!%p4704_p9)   ;;  %v3456_v13 = vld [vmem:[#allocation5 + $0x30] sm:$0xff] (!%p4704_p9)   ;;  %v3457_v14 = vld [vmem:[#allocation5 + $0x18] sm:$0xff] (!%p4704_p9)  }
  0xfe   : > { %v3458_v15 = vld [vmem:[#allocation5 + $0x38] sm:$0xff] (!%p4704_p9)   ;;  %v2778_v16 = vld [vmem:[%s4635_s4] ss:$0 sm:$0xff] (!%p4704_p9) }
  0xff   : > { %3031 = vmatpush3.bf16.msra.mxu0 (!%p4704_p9), %v3444_v1  ;;  %3277 = vmatpush3.bf16.msra.mxu1 (!%p4704_p9), %v3444_v1 }
 0x100   : > { %3032 = vmatprep.subr.bf16.mxu0 (!%p4704_p9), %v3445_v2  ;;  %3270 = vmatprep.subr.bf16.mxu1 (!%p4704_p9), %v3445_v2 }
 0x103   : > { %3033 = vmatpush3.bf16.msra.mxu0 %v3445_v2  ;;  %3278 = vmatpush3.bf16.msra.mxu1 %v3445_v2 }
 0x104   : > { %3034 = vmatprep.subr.bf16.mxu0 %v3446_v3  ;;  %3271 = vmatprep.subr.bf16.mxu1 %v3446_v3 }
 0x107   : > { %3035 = vmatpush3.bf16.msra.mxu0 %v3446_v3  ;;  %3279 = vmatpush3.bf16.msra.mxu1 %v3446_v3 }
 0x108   : > { %3036 = vmatprep.subr.bf16.mxu0 %v3447_v6  ;;  %3272 = vmatprep.subr.bf16.mxu1 %v3447_v6 }
 0x10b   : > { %3037 = vmatpush3.bf16.msra.mxu0 %v3447_v6  ;;  %3280 = vmatpush3.bf16.msra.mxu1 %v3447_v6 }
 0x10c   : > { %3038 = vmatprep.subr.bf16.mxu0 %v3448_v7  ;;  %3273 = vmatprep.subr.bf16.mxu1 %v3448_v7 }
 0x10f   : > { %3039 = vmatpush3.bf16.msra.mxu0 %v3448_v7  ;;  %3281 = vmatpush3.bf16.msra.mxu1 %v3448_v7 }
 0x110   : > { %3040 = vmatprep.subr.bf16.mxu0 %v3449_v8  ;;  %3274 = vmatprep.subr.bf16.mxu1 %v3449_v8 }
 0x113   : > { %3041 = vmatpush3.bf16.msra.mxu0 %v3449_v8  ;;  %3282 = vmatpush3.bf16.msra.mxu1 %v3449_v8 }
 0x114   : > { %3042 = vmatprep.subr.bf16.mxu0 %v3450_v9  ;;  %3275 = vmatprep.subr.bf16.mxu1 %v3450_v9 }
 0x117   : > { %3043 = vmatpush3.bf16.msra.mxu0 %v3450_v9  ;;  %3283 = vmatpush3.bf16.msra.mxu1 %v3450_v9 }
 0x11a   : > { %3045 = vmatmul.mubr.bf16.vlgmr.msra.gmra.mrb[0].mxu0 %v3453_v10  ;;  %3053 = vmatmul.mubr.bf16.vlgmr.msra.gmra.mrb[0].mxu1 %v3454_v11 }
 0x11b   : > { %3048 = vmatprep.mubr.bf16.mxu0 %v3455_v12  ;;  %3056 = vmatprep.mubr.bf16.mxu1 %v3456_v13 }
 0x122   : > { %3049 = vmatmul.mubr.bf16.gmra.mrb[4].mxu0 %v3457_v14  ;;  %3057 = vmatmul.mubr.bf16.gmra.mrb[4].mxu1 %v3458_v15 }
 0x1ed   : > { %v3046_v17 = vpop.f32.mrb[0].mxu0  ;;  %v3054_v18 = vpop.f32.mrb[0].mxu1 }
 0x1ee   : > { %v736_v19 = vadd.f32 %v3046_v17, %v2778_v16  ;;  %v768_v20 = vadd.f32 %v3054_v18, %v2778_v16  ;;  %v727_v21 = vpop.f32.mrb[1].mxu0  ;;  %v759_v22 = vpop.f32.mrb[1].mxu1 }
 0x1ef   : > { %v728_v23 = vadd.f32 %v2778_v16, %v727_v21  ;;  %v760_v24 = vadd.f32 %v2778_v16, %v759_v22  ;;  %v3047_v25 = vpop.f32.mrb[2].mxu0  ;;  %v3055_v26 = vpop.f32.mrb[2].mxu1 }
 0x1f0   : > { %792 = vst [vmem:[#allocation2 + $0x10] sm:$0xff] %v736_v19  ;;  %800 = vst [vmem:[#allocation2 + $0x50] sm:$0xff] %v768_v20  ;;  %v739_v27 = vadd.f32 %v3047_v25, %v2778_v16  ;;  %v771_v28 = vadd.f32 %v3055_v26, %v2778_v16  ;;  %v730_v29 = vpop.f32.mrb[3].mxu0  ;;  %v762_v30 = vpop.f32.mrb[3].mxu1 }
 0x1f1   : > { %790 = vst [vmem:[#allocation2] sm:$0xff] %v728_v23  ;;  %798 = vst [vmem:[#allocation2 + $0x40] sm:$0xff] %v760_v24  ;;  %v731_v31 = vadd.f32 %v2778_v16, %v730_v29  ;;  %v763_v32 = vadd.f32 %v2778_v16, %v762_v30 }
 0x1f2   : > { %793 = vst [vmem:[#allocation2 + $0x18] sm:$0xff] %v739_v27  ;;  %v807_v33 = vpack.c.bf16 %v739_v27, %v736_v19  ;;  %801 = vst [vmem:[#allocation2 + $0x58] sm:$0xff] %v771_v28  ;;  %v811_v34 = vpack.c.bf16 %v771_v28, %v768_v20 }
 0x1f3   : > { %791 = vst [vmem:[#allocation2 + $0x8] sm:$0xff] %v731_v31  ;;  %v806_v35 = vpack.c.bf16 %v731_v31, %v728_v23  ;;  %799 = vst [vmem:[#allocation2 + $0x48] sm:$0xff] %v763_v32  ;;  %v810_v36 = vpack.c.bf16 %v763_v32, %v760_v24 }
 0x1f4   : > { %815 = vst [vmem:[#allocation3 + $0x8] sm:$0xff] %v807_v33  ;;  %819 = vst [vmem:[#allocation3 + $0x28] sm:$0xff] %v811_v34 }
 0x1f5   : > { %814 = vst [vmem:[#allocation3] sm:$0xff] %v806_v35  ;;  %818 = vst [vmem:[#allocation3 + $0x20] sm:$0xff] %v810_v36  ;;  %v3050_v37 = vpop.f32.mrb[4].mxu0  ;;  %v3058_v38 = vpop.f32.mrb[4].mxu1 }
 0x1f6   : > { %v752_v39 = vadd.f32 %v3050_v37, %v2778_v16  ;;  %v784_v40 = vadd.f32 %v3058_v38, %v2778_v16  ;;  %v743_v41 = vpop.f32.mrb[5].mxu0  ;;  %v775_v42 = vpop.f32.mrb[5].mxu1 }
 0x1f7   : > { %v744_v43 = vadd.f32 %v2778_v16, %v743_v41  ;;  %v776_v44 = vadd.f32 %v2778_v16, %v775_v42  ;;  %v3051_v45 = vpop.f32.mrb[6].mxu0  ;;  %v3059_v46 = vpop.f32.mrb[6].mxu1 }
 0x1f8   : > { %796 = vst [vmem:[#allocation2 + $0x30] sm:$0xff] %v752_v39  ;;  %804 = vst [vmem:[#allocation2 + $0x70] sm:$0xff] %v784_v40  ;;  %v755_v47 = vadd.f32 %v3051_v45, %v2778_v16  ;;  %v787_v48 = vadd.f32 %v3059_v46, %v2778_v16  ;;  %v746_v49 = vpop.f32.mrb[7].mxu0  ;;  %v778_v50 = vpop.f32.mrb[7].mxu1 }
 0x1f9   : > { %794 = vst [vmem:[#allocation2 + $0x20] sm:$0xff] %v744_v43  ;;  %802 = vst [vmem:[#allocation2 + $0x60] sm:$0xff] %v776_v44  ;;  %v747_v51 = vadd.f32 %v2778_v16, %v746_v49  ;;  %v779_v52 = vadd.f32 %v2778_v16, %v778_v50 }
 0x1fa   : > { %797 = vst [vmem:[#allocation2 + $0x38] sm:$0xff] %v755_v47  ;;  %v809_v53 = vpack.c.bf16 %v755_v47, %v752_v39  ;;  %805 = vst [vmem:[#allocation2 + $0x78] sm:$0xff] %v787_v48  ;;  %v813_v54 = vpack.c.bf16 %v787_v48, %v784_v40 }
 0x1fb   : > { %795 = vst [vmem:[#allocation2 + $0x28] sm:$0xff] %v747_v51  ;;  %v808_v55 = vpack.c.bf16 %v747_v51, %v744_v43  ;;  %803 = vst [vmem:[#allocation2 + $0x68] sm:$0xff] %v779_v52  ;;  %v812_v56 = vpack.c.bf16 %v779_v52, %v776_v44 }
 0x1fc   : > { %817 = vst [vmem:[#allocation3 + $0x18] sm:$0xff] %v809_v53  ;;  %821 = vst [vmem:[#allocation3 + $0x38] sm:$0xff] %v813_v54 }
 0x1fd   : > { %816 = vst [vmem:[#allocation3 + $0x10] sm:$0xff] %v808_v55  ;;  %820 = vst [vmem:[#allocation3 + $0x30] sm:$0xff] %v812_v56 }
 0x1fe PF: > { %p822_p12 = scmp.eq.s32.totalorder %s4053_s29, 1  ;;  %p4705_p0 = scmp.eq.s32.totalorder %s4053_s29, 0 }
 0x200   : > { %p823_p2 = por %p822_p12, %p4705_p0 }
 0x201   : > { %v3958_v57 = vmov (%p823_p2), 0.0  }
 0x202   : > { %826 = sbr.rel (!%p823_p2) target bundleno = 522 (0x20a), region = 108  ;;  %827 = vst [vmem:[#allocation4] sm:$0xff] (%p823_p2), %v3958_v57  ;;  %828 = vst [vmem:[#allocation4 + $0x8] sm:$0xff] (%p823_p2), %v3958_v57 }
 0x203   : > { %829 = vst [vmem:[#allocation4 + $0x10] sm:$0xff] (%p823_p2), %v3958_v57  ;;  %830 = vst [vmem:[#allocation4 + $0x18] sm:$0xff] (%p823_p2), %v3958_v57 }
 0x204   : > { %831 = vst [vmem:[#allocation4 + $0x20] sm:$0xff] (%p823_p2), %v3958_v57  ;;  %832 = vst [vmem:[#allocation4 + $0x28] sm:$0xff] (%p823_p2), %v3958_v57 }
 0x205   : > { %833 = vst [vmem:[#allocation4 + $0x30] sm:$0xff] (%p823_p2), %v3958_v57  ;;  %834 = vst [vmem:[#allocation4 + $0x38] sm:$0xff] (%p823_p2), %v3958_v57 }
 0x206   : > { %835 = vst [vmem:[#allocation4 + $0x40] sm:$0xff] (%p823_p2), %v3958_v57  ;;  %836 = vst [vmem:[#allocation4 + $0x48] sm:$0xff] (%p823_p2), %v3958_v57 }
 0x207   : > { %837 = vst [vmem:[#allocation4 + $0x50] sm:$0xff] (%p823_p2), %v3958_v57  ;;  %838 = vst [vmem:[#allocation4 + $0x58] sm:$0xff] (%p823_p2), %v3958_v57 }
 0x208   : > { %839 = vst [vmem:[#allocation4 + $0x60] sm:$0xff] (%p823_p2), %v3958_v57  ;;  %840 = vst [vmem:[#allocation4 + $0x68] sm:$0xff] (%p823_p2), %v3958_v57 }
 0x209   : > { %841 = vst [vmem:[#allocation4 + $0x70] sm:$0xff] %v3958_v57  ;;  %842 = vst [vmem:[#allocation4 + $0x78] sm:$0xff] %v3958_v57 }
 0x20a PF: > { %p4706_p6 = scmp.ge.s32.totalorder %s4053_s29, 2 }
 0x20b   : > { %v878_v58 = vld [vmem:[#allocation3] sm:$0xff] (!%p4706_p6)  ;;  %v879_v59 = vld [vmem:[#allocation3 + $0x8] sm:$0xff] (!%p4706_p6)  ;;  %v880_v60 = vld [vmem:[#allocation3 + $0x10] sm:$0xff] (!%p4706_p6) }
 0x20c   : > { %845 = sbr.rel (%p4706_p6) target bundleno = 782 (0x30e), region = 112  ;;  %3060 = vmatprep.subr.bf16.mxu0 (!%p4706_p6), %v878_v58  ;;  %3284 = vmatprep.subr.bf16.mxu1 (!%p4706_p6), %v878_v58  ;;  %v3459_v61 = vld [vmem:[#allocation8] sm:$0xff] (!%p4706_p6)   ;;  %v881_v63 = vld [vmem:[#allocation3 + $0x18] sm:$0xff] (!%p4706_p6)  ;;  %v883_v1 = vld [vmem:[#allocation3 + $0x28] sm:$0xff] (!%p4706_p6) }
 0x20d   : > { %3061 = vmatpush3.bf16.msra.mxu0 (!%p4706_p6), %v878_v58  ;;  %3292 = vmatpush3.bf16.msra.mxu1 (!%p4706_p6), %v878_v58  ;;  %v3460_v62 = vld [vmem:[#allocation8 + $0x20] sm:$0xff] (!%p4706_p6)   ;;  %v884_v2 = vld [vmem:[#allocation3 + $0x30] sm:$0xff] (!%p4706_p6)  ;;  %v885_v3 = vld [vmem:[#allocation3 + $0x38] sm:$0xff] (!%p4706_p6) }
 0x20e   : > { %3062 = vmatprep.subr.bf16.mxu0 (!%p4706_p6), %v879_v59  ;;  %3285 = vmatprep.subr.bf16.mxu1 (!%p4706_p6), %v879_v59  ;;  %v882_v0 = vld [vmem:[#allocation3 + $0x20] sm:$0xff] (!%p4706_p6)  ;;  %v3461_v4 = vld [vmem:[#allocation8 + $0x8] sm:$0xff] (!%p4706_p6)   ;;  %v3463_v6 = vld [vmem:[#allocation8 + $0x10] sm:$0xff] (!%p4706_p6)  }
 0x20f   : > { %3076 = vmatprep.mubr.bf16.mxu0 (!%p4706_p6), %v3459_v61  ;;  %3084 = vmatprep.mubr.bf16.mxu1 (!%p4706_p6), %v3460_v62  ;;  %v3462_v5 = vld [vmem:[#allocation8 + $0x28] sm:$0xff] (!%p4706_p6)   ;;  %v3464_v7 = vld [vmem:[#allocation8 + $0x30] sm:$0xff] (!%p4706_p6)   ;;  %v3465_v8 = vld [vmem:[#allocation8 + $0x18] sm:$0xff] (!%p4706_p6)  }
 0x210   : > { %v3466_v9 = vld [vmem:[#allocation8 + $0x38] sm:$0xff] (!%p4706_p6)   ;;  %v848_v10 = vld [vmem:[#allocation4 + $0x10] sm:$0xff] (!%p4706_p6)  ;;  %v846_v12 = vld [vmem:[#allocation4] sm:$0xff] (!%p4706_p6) }
 0x211   : > { %3063 = vmatpush3.bf16.msra.mxu0 (!%p4706_p6), %v879_v59  ;;  %3293 = vmatpush3.bf16.msra.mxu1 (!%p4706_p6), %v879_v59  ;;  %v856_v11 = vld [vmem:[#allocation4 + $0x50] sm:$0xff] (!%p4706_p6)  ;;  %v854_v13 = vld [vmem:[#allocation4 + $0x40] sm:$0xff] (!%p4706_p6)  ;;  %v849_v16 = vld [vmem:[#allocation4 + $0x18] sm:$0xff] (!%p4706_p6) }
 0x212   : > { %3064 = vmatprep.subr.bf16.mxu0 (!%p4706_p6), %v880_v60  ;;  %3286 = vmatprep.subr.bf16.mxu1 (!%p4706_p6), %v880_v60  ;;  %v857_v17 = vld [vmem:[#allocation4 + $0x58] sm:$0xff] (!%p4706_p6)  ;;  %v847_v22 = vld [vmem:[#allocation4 + $0x8] sm:$0xff] (!%p4706_p6)  ;;  %v852_v34 = vld [vmem:[#allocation4 + $0x30] sm:$0xff] (!%p4706_p6) }
 0x213   : > { %v855_v23 = vld [vmem:[#allocation4 + $0x48] sm:$0xff]  ;;  %v860_v35 = vld [vmem:[#allocation4 + $0x70] sm:$0xff]  ;;  %v850_v36 = vld [vmem:[#allocation4 + $0x20] sm:$0xff] }
 0x214   : > { %v858_v37 = vld [vmem:[#allocation4 + $0x60] sm:$0xff]  ;;  %v853_v40 = vld [vmem:[#allocation4 + $0x38] sm:$0xff]  ;;  %v851_v46 = vld [vmem:[#allocation4 + $0x28] sm:$0xff] }
 0x215   : > { %3065 = vmatpush3.bf16.msra.mxu0 %v880_v60  ;;  %3294 = vmatpush3.bf16.msra.mxu1 %v880_v60  ;;  %v861_v41 = vld [vmem:[#allocation4 + $0x78] sm:$0xff]  ;;  %v859_v47 = vld [vmem:[#allocation4 + $0x68] sm:$0xff] }
 0x216   : > { %3066 = vmatprep.subr.bf16.mxu0 %v881_v63  ;;  %3287 = vmatprep.subr.bf16.mxu1 %v881_v63 }
 0x219   : > { %3067 = vmatpush3.bf16.msra.mxu0 %v881_v63  ;;  %3295 = vmatpush3.bf16.msra.mxu1 %v881_v63 }
 0x21a   : > { %3068 = vmatprep.subr.bf16.mxu0 %v882_v0  ;;  %3288 = vmatprep.subr.bf16.mxu1 %v882_v0 }
 0x21d   : > { %3069 = vmatpush3.bf16.msra.mxu0 %v882_v0  ;;  %3296 = vmatpush3.bf16.msra.mxu1 %v882_v0 }
 0x21e   : > { %3070 = vmatprep.subr.bf16.mxu0 %v883_v1  ;;  %3289 = vmatprep.subr.bf16.mxu1 %v883_v1 }
 0x221   : > { %3071 = vmatpush3.bf16.msra.mxu0 %v883_v1  ;;  %3297 = vmatpush3.bf16.msra.mxu1 %v883_v1 }
 0x222   : > { %3072 = vmatprep.subr.bf16.mxu0 %v884_v2  ;;  %3290 = vmatprep.subr.bf16.mxu1 %v884_v2 }
 0x225   : > { %3073 = vmatpush3.bf16.msra.mxu0 %v884_v2  ;;  %3298 = vmatpush3.bf16.msra.mxu1 %v884_v2 }
 0x226   : > { %3074 = vmatprep.subr.bf16.mxu0 %v885_v3  ;;  %3291 = vmatprep.subr.bf16.mxu1 %v885_v3 }
 0x229   : > { %3075 = vmatpush3.bf16.msra.mxu0 %v885_v3  ;;  %3299 = vmatpush3.bf16.msra.mxu1 %v885_v3 }
 0x22c   : > { %3077 = vmatmul.mubr.bf16.vlgmr.msra.gmra.mrb[0].mxu0 %v3461_v4  ;;  %3085 = vmatmul.mubr.bf16.vlgmr.msra.gmra.mrb[0].mxu1 %v3462_v5 }
 0x22d   : > { %3080 = vmatprep.mubr.bf16.mxu0 %v3463_v6  ;;  %3088 = vmatprep.mubr.bf16.mxu1 %v3464_v7 }
 0x234   : > { %3081 = vmatmul.mubr.bf16.gmra.mrb[4].mxu0 %v3465_v8  ;;  %3089 = vmatmul.mubr.bf16.gmra.mrb[4].mxu1 %v3466_v9 }
 0x2ff   : > { %v3078_v14 = vpop.f32.mrb[0].mxu0  ;;  %v3086_v15 = vpop.f32.mrb[0].mxu1 }
 0x300   : > { %v1033_v18 = vadd.f32 %v3078_v14, %v848_v10  ;;  %v1041_v19 = vadd.f32 %v3086_v15, %v856_v11  ;;  %v968_v20 = vpop.f32.mrb[1].mxu0  ;;  %v1000_v21 = vpop.f32.mrb[1].mxu1 }
 0x301   : > { %v1031_v24 = vadd.f32 %v968_v20, %v846_v12  ;;  %v1039_v25 = vadd.f32 %v1000_v21, %v854_v13  ;;  %v3079_v26 = vpop.f32.mrb[2].mxu0  ;;  %v3087_v27 = vpop.f32.mrb[2].mxu1 }
 0x302   : > { %1049 = vst [vmem:[#allocation4 + $0x10] sm:$0xff] %v1033_v18  ;;  %1057 = vst [vmem:[#allocation4 + $0x50] sm:$0xff] %v1041_v19  ;;  %v1034_v28 = vadd.f32 %v3079_v26, %v849_v16  ;;  %v1042_v29 = vadd.f32 %v3087_v27, %v857_v17  ;;  %v971_v30 = vpop.f32.mrb[3].mxu0  ;;  %v1003_v31 = vpop.f32.mrb[3].mxu1 }
 0x303   : > { %1047 = vst [vmem:[#allocation4] sm:$0xff] %v1031_v24  ;;  %1055 = vst [vmem:[#allocation4 + $0x40] sm:$0xff] %v1039_v25  ;;  %v1032_v32 = vadd.f32 %v971_v30, %v847_v22  ;;  %v1040_v33 = vadd.f32 %v1003_v31, %v855_v23 }
 0x304   : > { %1050 = vst [vmem:[#allocation4 + $0x18] sm:$0xff] %v1034_v28  ;;  %1058 = vst [vmem:[#allocation4 + $0x58] sm:$0xff] %v1042_v29 }
 0x305   : > { %1048 = vst [vmem:[#allocation4 + $0x8] sm:$0xff] %v1032_v32  ;;  %1056 = vst [vmem:[#allocation4 + $0x48] sm:$0xff] %v1040_v33 }
 0x307   : > { %v3082_v38 = vpop.f32.mrb[4].mxu0  ;;  %v3090_v39 = vpop.f32.mrb[4].mxu1 }
 0x308   : > { %v1037_v42 = vadd.f32 %v3082_v38, %v852_v34  ;;  %v1045_v43 = vadd.f32 %v3090_v39, %v860_v35  ;;  %v984_v44 = vpop.f32.mrb[5].mxu0  ;;  %v1016_v45 = vpop.f32.mrb[5].mxu1 }
 0x309   : > { %v1035_v48 = vadd.f32 %v984_v44, %v850_v36  ;;  %v1043_v49 = vadd.f32 %v1016_v45, %v858_v37  ;;  %v3083_v50 = vpop.f32.mrb[6].mxu0  ;;  %v3091_v51 = vpop.f32.mrb[6].mxu1 }
 0x30a   : > { %1053 = vst [vmem:[#allocation4 + $0x30] sm:$0xff] %v1037_v42  ;;  %1061 = vst [vmem:[#allocation4 + $0x70] sm:$0xff] %v1045_v43  ;;  %v1038_v52 = vadd.f32 %v3083_v50, %v853_v40  ;;  %v1046_v53 = vadd.f32 %v3091_v51, %v861_v41  ;;  %v987_v54 = vpop.f32.mrb[7].mxu0  ;;  %v1019_v55 = vpop.f32.mrb[7].mxu1 }
 0x30b   : > { %1051 = vst [vmem:[#allocation4 + $0x20] sm:$0xff] %v1035_v48  ;;  %1059 = vst [vmem:[#allocation4 + $0x60] sm:$0xff] %v1043_v49  ;;  %v1036_v56 = vadd.f32 %v987_v54, %v851_v46  ;;  %v1044_v57 = vadd.f32 %v1019_v55, %v859_v47 }
 0x30c   : > { %1054 = vst [vmem:[#allocation4 + $0x38] sm:$0xff] %v1038_v52  ;;  %1062 = vst [vmem:[#allocation4 + $0x78] sm:$0xff] %v1046_v53 }
 0x30d   : > { %1052 = vst [vmem:[#allocation4 + $0x28] sm:$0xff] %v1036_v56  ;;  %1060 = vst [vmem:[#allocation4 + $0x68] sm:$0xff] %v1044_v57 }
 0x30e PF: > { %p4707_p8 = scmp.ne.s32.totalorder %s4053_s29, 0 }
 0x30f   : > { %v3467_v58 = vld [vmem:[#allocation13] sm:$0xff] (!%p4707_p8)   ;;  %v3468_v59 = vld [vmem:[#allocation13 + $0x8] sm:$0xff] (!%p4707_p8)   ;;  %v3469_v60 = vld [vmem:[#allocation13 + $0x10] sm:$0xff] (!%p4707_p8)   ;;  %s4708_s9 = sld [smem:[#allocation29_spill]] (!%p4707_p8)  ;;  %s4709_s14 = sld [smem:[#allocation30_spill]] (!%p4707_p8) }
 0x310   : > { %1065 = sbr.rel (%p4707_p8) target bundleno = 1060 (0x424), region = 116  ;;  %3092 = vmatprep.subr.bf16.mxu0 (!%p4707_p8), %v3467_v58  ;;  %3300 = vmatprep.subr.bf16.mxu1 (!%p4707_p8), %v3467_v58  ;;  %v3470_v61 = vld [vmem:[#allocation13 + $0x18] sm:$0xff] (!%p4707_p8)   ;;  %v1066_v62 = vld [vmem:[#allocation2] sm:$0xff] (!%p4707_p8)  ;;  %v1067_v63 = vld [vmem:[#allocation2 + $0x8] sm:$0xff] (!%p4707_p8) }
 0x311   : > { %3093 = vmatpush3.bf16.msra.mxu0 (!%p4707_p8), %v3467_v58  ;;  %3308 = vmatpush3.bf16.msra.mxu1 (!%p4707_p8), %v3467_v58  ;;  %v1098_v0 = vld [vmem:[#allocation4] sm:$0xff] (!%p4707_p8)  ;;  %v1082_v1 = vmul.f32 (!%p4707_p8), 0.5, %v1066_v62  ;;  %v1083_v2 = vmul.f32 (!%p4707_p8), 0.5, %v1067_v63  ;;  %v1099_v3 = vld [vmem:[#allocation4 + $0x8] sm:$0xff] (!%p4707_p8)  ;;  %v1068_v13 = vld [vmem:[#allocation2 + $0x10] sm:$0xff] (!%p4707_p8) }
 0x312   : > { %3094 = vmatprep.subr.bf16.mxu0 (!%p4707_p8), %v3468_v59  ;;  %3301 = vmatprep.subr.bf16.mxu1 (!%p4707_p8), %v3468_v59  ;;  %v1074_v5 = vld [vmem:[#allocation2 + $0x40] sm:$0xff] (!%p4707_p8)  ;;  %v1075_v6 = vld [vmem:[#allocation2 + $0x48] sm:$0xff] (!%p4707_p8)  ;;  %v1069_v14 = vld [vmem:[#allocation2 + $0x18] sm:$0xff] (!%p4707_p8)  ;;  %v1084_v18 = vmul.f32 (!%p4707_p8), 0.5, %v1068_v13 }
 0x313   : > { %v1090_v7 = vmul.f32 (!%p4707_p8), 0.5, %v1074_v5  ;;  %v1106_v8 = vld [vmem:[#allocation4 + $0x40] sm:$0xff] (!%p4707_p8)  ;;  %v1107_v9 = vld [vmem:[#allocation4 + $0x48] sm:$0xff] (!%p4707_p8)  ;;  %v1114_v10 = vsub.f32 (!%p4707_p8), %v1082_v1, %v1098_v0  ;;  %v1115_v11 = vsub.f32 (!%p4707_p8), %v1083_v2, %v1099_v3  ;;  %v1091_v12 = vmul.f32 (!%p4707_p8), 0.5, %v1075_v6  ;;  %v1100_v15 = vld [vmem:[#allocation4 + $0x10] sm:$0xff] (!%p4707_p8) }
 0x314   : > { %v3471_v16 = vld [vmem:[#allocation13 + $0x20] sm:$0xff] (!%p4707_p8)   ;;  %v1085_v19 = vmul.f32 (!%p4707_p8), 0.5, %v1069_v14  ;;  %v1101_v20 = vld [vmem:[#allocation4 + $0x18] sm:$0xff] (!%p4707_p8)  ;;  %v1076_v21 = vld [vmem:[#allocation2 + $0x50] sm:$0xff] (!%p4707_p8)  ;;  %v1116_v28 = vsub.f32 (!%p4707_p8), %v1084_v18, %v1100_v15 }
 0x315   : > { %3095 = vmatpush3.bf16.msra.mxu0 (!%p4707_p8), %v3468_v59  ;;  %3309 = vmatpush3.bf16.msra.mxu1 (!%p4707_p8), %v3468_v59  ;;  %v4342_v4 = vld [vmem:[%s4708_s9] ss:$0 sm:$0xff] (!%p4707_p8)  ;;  %v1122_v17 = vsub.f32 (!%p4707_p8), %v1090_v7, %v1106_v8  ;;  %v1123_v24 = vsub.f32 (!%p4707_p8), %v1091_v12, %v1107_v9  ;;  %v1077_v25 = vld [vmem:[#allocation2 + $0x58] sm:$0xff] (!%p4707_p8)  ;;  %v1092_v26 = vmul.f32 (!%p4707_p8), 0.5, %v1076_v21  ;;  %v1108_v30 = vld [vmem:[#allocation4 + $0x50] sm:$0xff] (!%p4707_p8) }
 0x316   : > { %3096 = vmatprep.subr.bf16.mxu0 (!%p4707_p8), %v3469_v60  ;;  %3302 = vmatprep.subr.bf16.mxu1 (!%p4707_p8), %v3469_v60  ;;  %v4345_v22 = vadd.f32 (!%p4707_p8), %v4342_v4, %v1114_v10  ;;  %v4348_v23 = vadd.f32 (!%p4707_p8), %v4342_v4, %v1115_v11  ;;  %v1117_v29 = vsub.f32 (!%p4707_p8), %v1085_v19, %v1101_v20  ;;  %v3472_v33 = vld [vmem:[#allocation13 + $0x28] sm:$0xff] (!%p4707_p8)   ;;  %v1093_v37 = vmul.f32 (!%p4707_p8), 0.5, %v1077_v25  ;;  %v1109_v41 = vld [vmem:[#allocation4 + $0x58] sm:$0xff] (!%p4707_p8)  ;;  %v1070_v45 = vld [vmem:[#allocation2 + $0x20] sm:$0xff] (!%p4707_p8) }
 0x317   : > { %v4351_v27 = vadd.f32 %v4342_v4, %v1122_v17  ;;  %v4356_v34 = vadd.f32 %v4342_v4, %v1123_v24  ;;  %v4360_v36 = vadd.f32 %v4342_v4, %v1116_v28  ;;  %v1124_v42 = vsub.f32 %v1092_v26, %v1108_v30  ;;  %v3473_v46 = vld [vmem:[#allocation13 + $0x30] sm:$0xff]   ;;  %v1071_v52 = vld [vmem:[#allocation2 + $0x28] sm:$0xff]  ;;  %v1102_v53 = vld [vmem:[#allocation4 + $0x20] sm:$0xff] }
 0x318   : > { %v1169_v31 = vmin.f32 %v4345_v22, 0.0  ;;  %v1170_v32 = vmin.f32 %v4348_v23, 0.0  ;;  %v4363_v40 = vadd.f32 %v4342_v4, %v1117_v29  ;;  %v1125_v50 = vsub.f32 %v1093_v37, %v1109_v41  ;;  %v1078_v54 = vld [vmem:[#allocation2 + $0x60] sm:$0xff]  ;;  %v1072_v2 = vld [vmem:[#allocation2 + $0x30] sm:$0xff]  ;;  %v1073_v3 = vld [vmem:[#allocation2 + $0x38] sm:$0xff] }
 0x319   : > { %3097 = vmatpush3.bf16.msra.mxu0 %v3469_v60  ;;  %3310 = vmatpush3.bf16.msra.mxu1 %v3469_v60  ;;  %v1177_v35 = vmin.f32 %v4351_v27, 0.0  ;;  %v1178_v43 = vmin.f32 %v4356_v34, 0.0  ;;  %v1171_v47 = vmin.f32 %v4360_v36, 0.0  ;;  %v4369_v51 = vadd.f32 %v4342_v4, %v1124_v42  ;;  %v1103_v60 = vld [vmem:[#allocation4 + $0x28] sm:$0xff]  ;;  %v1110_v62 = vld [vmem:[#allocation4 + $0x60] sm:$0xff]  ;;  %v3474_v5 = vld [vmem:[#allocation13 + $0x38] sm:$0xff]  }
 0x31a   : > { %3098 = vmatprep.subr.bf16.mxu0 %v3470_v61  ;;  %3303 = vmatprep.subr.bf16.mxu1 %v3470_v61  ;;  %v1185_v38 = vmul.f32 1.442695, %v1169_v31  ;;  %v1187_v39 = vmul.f32 1.442695, %v1170_v32  ;;  %v1172_v48 = vmin.f32 %v4363_v40, 0.0  ;;  %v1086_v57 = vmul.f32 0.5, %v1070_v45 }
 0x31b   : > { %v1201_v44 = vmul.f32 1.442695, %v1177_v35  ;;  %v1203_v49 = vmul.f32 1.442695, %v1178_v43  ;;  %v1189_v55 = vmul.f32 1.442695, %v1171_v47  ;;  %v4373_v58 = vadd.f32 %v4342_v4, %v1125_v50 }
 0x31c   : > { %3475 = vpow2.f32 %v1185_v38  ;;  %v1191_v56 = vmul.f32 1.442695, %v1172_v48  ;;  %vm1153_vm0 = vcmp.gt.f32.partialorder %v4345_v22, 0.0  ;;  %v1179_v59 = vmin.f32 %v4369_v51, 0.0  ;;  %v1111_v8 = vld [vmem:[#allocation4 + $0x68] sm:$0xff]  ;;  %v1104_v13 = vld [vmem:[#allocation4 + $0x30] sm:$0xff] }
 0x31d   : > { %3099 = vmatpush3.bf16.msra.mxu0 %v3470_v61  ;;  %3311 = vmatpush3.bf16.msra.mxu1 %v3470_v61  ;;  %3477 = vpow2.f32 %v1187_v39  ;;  %v1079_v61 = vld [vmem:[#allocation2 + $0x68] sm:$0xff]  ;;  %v1087_v63 = vmul.f32 0.5, %v1071_v52  ;;  %v1118_v0 = vsub.f32 %v1086_v57, %v1102_v53  ;;  %v1094_v1 = vmul.f32 0.5, %v1078_v54  ;;  %v1105_v17 = vld [vmem:[#allocation4 + $0x38] sm:$0xff] }
 0x31e   : > { %3100 = vmatprep.subr.bf16.mxu0 %v3471_v16  ;;  %3304 = vmatprep.subr.bf16.mxu1 %v3471_v16  ;;  %3479 = vpow2.f32 %v1201_v44  ;;  %vm1154_vm1 = vcmp.gt.f32.partialorder %v4348_v23, 0.0  ;;  %v1180_v6 = vmin.f32 %v4373_v58, 0.0  ;;  %v1205_v7 = vmul.f32 1.442695, %v1179_v59  ;;  %v1081_v57 = vld [vmem:[#allocation2 + $0x78] sm:$0xff] }
 0x31f   : > { %3481 = vpow2.f32 %v1203_v49  ;;  %v1119_v9 = vsub.f32 %v1087_v63, %v1103_v60  ;;  %v4379_v10 = vadd.f32 %v4342_v4, %v1118_v0  ;;  %v1095_v11 = vmul.f32 0.5, %v1079_v61  ;;  %v1112_v0 = vld [vmem:[#allocation4 + $0x70] sm:$0xff] }
 0x320   : > { %3483 = vpow2.f32 %v1189_v55  ;;  %v1126_v12 = vsub.f32 %v1094_v1, %v1110_v62  ;;  %v1207_v14 = vmul.f32 1.442695, %v1180_v6  ;;  %v1088_v15 = vmul.f32 0.5, %v1072_v2  ;;  %v1113_v1 = vld [vmem:[#allocation4 + $0x78] sm:$0xff] }
 0x321   : > { %3101 = vmatpush3.bf16.msra.mxu0 %v3471_v16  ;;  %3312 = vmatpush3.bf16.msra.mxu1 %v3471_v16  ;;  %3485 = vpow2.f32 %v1191_v56  ;;  %v1089_v16 = vmul.f32 0.5, %v1073_v3  ;;  %vm1161_vm2 = vcmp.gt.f32.partialorder %v4351_v27, 0.0  ;;  %v4383_v18 = vadd.f32 %v4342_v4, %v1119_v9  ;;  %v1080_v56 = vld [vmem:[#allocation2 + $0x70] sm:$0xff] }
 0x322   : > { %3102 = vmatprep.subr.bf16.mxu0 %v3472_v33  ;;  %3305 = vmatprep.subr.bf16.mxu1 %v3472_v33  ;;  %3487 = vpow2.f32 %v1205_v7  ;;  %v1173_v19 = vmin.f32 %v4379_v10, 0.0  ;;  %v1127_v20 = vsub.f32 %v1095_v11, %v1111_v8  ;;  %vm1162_vm3 = vcmp.gt.f32.partialorder %v4356_v34, 0.0 }
 0x323   : > { %3489 = vpow2.f32 %v1207_v14  ;;  %v4388_v21 = vadd.f32 %v4342_v4, %v1126_v12  ;;  %v1120_v24 = vsub.f32 %v1088_v15, %v1104_v13  ;;  %v1174_v26 = vmin.f32 %v4383_v18, 0.0 }
 0x324   : > { %v1193_v28 = vmul.f32 1.442695, %v1173_v19  ;;  %v4392_v29 = vadd.f32 %v4342_v4, %v1127_v20  ;;  %v1121_v30 = vsub.f32 %v1089_v16, %v1105_v17  ;;  %vm1155_vm4 = vcmp.gt.f32.partialorder %v4360_v36, 0.0 }
 0x325   : > { %3103 = vmatpush3.bf16.msra.mxu0 %v3472_v33  ;;  %3313 = vmatpush3.bf16.msra.mxu1 %v3472_v33  ;;  %vm1156_vm5 = vcmp.gt.f32.partialorder %v4363_v40, 0.0  ;;  %v1181_v33 = vmin.f32 %v4388_v21, 0.0  ;;  %v1195_v38 = vmul.f32 1.442695, %v1174_v26  ;;  %v4398_v39 = vadd.f32 %v4342_v4, %v1120_v24 }
 0x326   : > { %3104 = vmatprep.subr.bf16.mxu0 %v3473_v46  ;;  %3306 = vmatprep.subr.bf16.mxu1 %v3473_v46  ;;  %v3476_v25 = vpop.eup %3475  ;;  %3491 = vpow2.f32 %v1193_v28  ;;  %v1182_v44 = vmin.f32 %v4392_v29, 0.0  ;;  %v4408_v49 = vadd.f32 %v4342_v4, %v1121_v30  ;;  %vm1163_vm6 = vcmp.gt.f32.partialorder %v4369_v51, 0.0 }
 0x327   : > { %v3478_v31 = vpop.eup %3477  ;;  %v2806_v32 = vadd.f32 -1.0, %v3476_v25  ;;  %v1209_v45 = vmul.f32 1.442695, %v1181_v33  ;;  %3493 = vpow2.f32 %v1195_v38  ;;  %vm1164_vm7 = vcmp.gt.f32.partialorder %v4373_v58, 0.0 }
 0x328   : > { %v3480_v35 = vpop.eup %3479  ;;  %v2807_v37 = vadd.f32 -1.0, %v3478_v31  ;;  %v1176_v63 = vmin.f32 %v4408_v49, 0.0  ;;  %v1096_v6 = vmul.f32 0.5, %v1080_v56  ;;  %vm1157_vm8 = vcmp.gt.f32.partialorder %v4379_v10, 0.0 }
 0x329   : > { %3105 = vmatpush3.bf16.msra.mxu0 %v3473_v46  ;;  %3314 = vmatpush3.bf16.msra.mxu1 %v3473_v46  ;;  %v3482_v41 = vpop.eup %3481  ;;  %v1233_v42 = vsel %vm1153_vm0, %v4345_v22, %v2806_v32  ;;  %v2814_v43 = vadd.f32 -1.0, %v3480_v35  ;;  %3495 = vpow2.f32 %v1209_v45  ;;  %vm1158_vm9 = vcmp.gt.f32.partialorder %v4383_v18, 0.0 }
 0x32a   : > { %3106 = vmatprep.subr.bf16.mxu0 %v3474_v5  ;;  %3307 = vmatprep.subr.bf16.mxu1 %v3474_v5  ;;  %v3484_v46 = vpop.eup %3483  ;;  %v1234_v47 = vsel %vm1154_vm1, %v4348_v23, %v2807_v37  ;;  %v2815_v48 = vadd.f32 -1.0, %v3482_v41  ;;  %v1211_v23 = vmul.f32 1.442695, %v1182_v44  ;;  %v1199_v9 = vmul.f32 1.442695, %v1176_v63 }
 0x32b   : > { %v3486_v50 = vpop.eup %3485  ;;  %v1249_v52 = vpack.c.bf16 %v1234_v47, %v1233_v42  ;;  %v1241_v22 = vsel %vm1161_vm2, %v4351_v27, %v2814_v43  ;;  %v2808_v53 = vadd.f32 -1.0, %v3484_v46  ;;  %v1175_v27 = vmin.f32 %v4398_v39, 0.0 }
 0x32c   : > { %v1242_v54 = vsel %vm1162_vm3, %v4356_v34, %v2815_v48  ;;  %v2809_v55 = vadd.f32 -1.0, %v3486_v50  ;;  %v3488_v59 = vpop.eup %3487  ;;  %3497 = vpow2.f32 %v1211_v23  ;;  %vm1165_vm10 = vcmp.gt.f32.partialorder %v4388_v21, 0.0 }
 0x32d   : > { %3107 = vmatpush3.bf16.msra.mxu0 %v3474_v5  ;;  %3315 = vmatpush3.bf16.msra.mxu1 %v3474_v5  ;;  %v1253_v60 = vpack.c.bf16 %v1242_v54, %v1241_v22  ;;  %v1235_v61 = vsel %vm1155_vm4, %v4360_v36, %v2808_v53  ;;  %v2816_v62 = vadd.f32 -1.0, %v3488_v59  ;;  %v3490_v2 = vpop.eup %3489  ;;  %v1197_v5 = vmul.f32 1.442695, %v1175_v27  ;;  %v2822_v22 = vld [vmem:[%s4709_s14] ss:$0 sm:$0xff] }
 0x32e   : > { %3108 = vmatprep.mubr.bf16.mxu0 %v1249_v52  ;;  %v1236_v34 = vsel %vm1156_vm5, %v4363_v40, %v2809_v55  ;;  %v1097_v36 = vmul.f32 0.5, %v1081_v57  ;;  %v2817_v7 = vadd.f32 -1.0, %v3490_v2  ;;  %v1128_v40 = vsub.f32 %v1096_v6, %v1112_v0 }
 0x32f   : > { %3116 = vmatprep.mubr.bf16.mxu1 %v1253_v60  ;;  %v1250_v3 = vpack.c.bf16 %v1236_v34, %v1235_v61  ;;  %v1243_v8 = vsel %vm1163_vm6, %v4369_v51, %v2816_v62  ;;  %3499 = vpow2.f32 %v1197_v5  ;;  %vm1166_vm11 = vcmp.gt.f32.partialorder %v4392_v29, 0.0 }
 0x330   : > { %v1129_v11 = vsub.f32 %v1097_v36, %v1113_v1  ;;  %v3492_v12 = vpop.eup %3491  ;;  %v1244_v13 = vsel %vm1164_vm7, %v4373_v58, %v2817_v7  ;;  %3501 = vpow2.f32 %v1199_v9  ;;  %v1151_v16 = vadd.f32 %v4342_v4, %v1128_v40 }
 0x331   : > { %3109 = vmatmul.mubr.bf16.vlgmr.msra.gmra.mrb[0].mxu0 %v1250_v3  ;;  %v1254_v14 = vpack.c.bf16 %v1244_v13, %v1243_v8  ;;  %v2810_v15 = vadd.f32 -1.0, %v3492_v12  ;;  %v3494_v51 = vpop.eup %3493  ;;  %vm1159_vm12 = vcmp.gt.f32.partialorder %v4398_v39, 0.0  ;;  %vm1160_vm13 = vcmp.gt.f32.partialorder %v4408_v49, 0.0 }
 0x332   : > { %v1152_v17 = vadd.f32 %v4342_v4, %v1129_v11  ;;  %v2811_v20 = vadd.f32 -1.0, %v3494_v51  ;;  %v1183_v25 = vmin.f32 %v1151_v16, 0.0  ;;  %vm1167_vm14 = vcmp.gt.f32.partialorder %v1151_v16, 0.0 }
 0x333   : > { %v3496_v19 = vpop.eup %3495  ;;  %3117 = vmatmul.mubr.bf16.vlgmr.msra.gmra.mrb[0].mxu1 %v1254_v14  ;;  %v1237_v24 = vsel %vm1157_vm8, %v4379_v10, %v2810_v15 }
 0x334   : > { %v2818_v58 = vadd.f32 -1.0, %v3496_v19  ;;  %v1184_v26 = vmin.f32 %v1152_v17, 0.0  ;;  %v1238_v28 = vsel %vm1158_vm9, %v4383_v18, %v2811_v20  ;;  %v1213_v4 = vmul.f32 1.442695, %v1183_v25 }
 0x335   : > { %v1251_v31 = vpack.c.bf16 %v1238_v28, %v1237_v24  ;;  %vm1168_vm15 = vcmp.gt.f32.partialorder %v1152_v17, 0.0 }
 0x336   : > { %v3498_v30 = vpop.eup %3497  ;;  %v1215_v32 = vmul.f32 1.442695, %v1184_v26  ;;  %v1245_v35 = vsel %vm1165_vm10, %v4388_v21, %v2818_v58  ;;  %3503 = vpow2.f32 %v1213_v4 }
 0x337   : > { %v2819_v33 = vadd.f32 -1.0, %v3498_v30  ;;  %3112 = vmatprep.mubr.bf16.mxu0 %v1251_v31 }
 0x338   : > { %3505 = vpow2.f32 %v1215_v32 }
 0x339   : > { %v3500_v37 = vpop.eup %3499  ;;  %v1246_v10 = vsel %vm1166_vm11, %v4392_v29, %v2819_v33 }
 0x33a   : > { %v3502_v38 = vpop.eup %3501  ;;  %v1255_v41 = vpack.c.bf16 %v1246_v10, %v1245_v35  ;;  %v2812_v18 = vadd.f32 -1.0, %v3500_v37 }
 0x33b   : > { %v2813_v42 = vadd.f32 -1.0, %v3502_v38 }
 0x33c   : > { %3120 = vmatprep.mubr.bf16.mxu1 %v1255_v41  ;;  %v1239_v43 = vsel %vm1159_vm12, %v4398_v39, %v2812_v18 }
 0x33d   : > { %v1240_v44 = vsel %vm1160_vm13, %v4408_v49, %v2813_v42 }
 0x33e   : > { %v1252_v21 = vpack.c.bf16 %v1240_v44, %v1239_v43 }
 0x340   : > { %3113 = vmatmul.mubr.bf16.gmra.mrb[4].mxu0 %v1252_v21  ;;  %v3504_v45 = vpop.eup %3503 }
 0x341   : > { %v2820_v29 = vadd.f32 -1.0, %v3504_v45 }
 0x342   : > { %v3506_v46 = vpop.eup %3505 }
 0x343   : > { %v2821_v47 = vadd.f32 -1.0, %v3506_v46  ;;  %v1247_v48 = vsel %vm1167_vm14, %v1151_v16, %v2820_v29 }
 0x345   : > { %v1248_v50 = vsel %vm1168_vm15, %v1152_v17, %v2821_v47 }
 0x346   : > { %v1256_v52 = vpack.c.bf16 %v1248_v50, %v1247_v48 }
 0x348   : > { %3121 = vmatmul.mubr.bf16.gmra.mrb[4].mxu1 %v1256_v52 }
 0x404   : > { %v3110_v53 = vpop.f32.mrb[0].mxu0 }
 0x405   : > { %v1371_v39 = vadd.f32 %v3110_v53, %v2822_v22  ;;  %v1362_v54 = vpop.f32.mrb[1].mxu0 }
 0x406   : > { %v1363_v49 = vadd.f32 %v2822_v22, %v1362_v54  ;;  %v3111_v55 = vpop.f32.mrb[2].mxu0  ;;  %v3118_v57 = vpop.f32.mrb[0].mxu1 }
 0x407   : > { %1427 = vst [vmem:[#allocation2 + $0x10] sm:$0xff] %v1371_v39  ;;  %v1374_v23 = vadd.f32 %v3111_v55, %v2822_v22  ;;  %v1365_v56 = vpop.f32.mrb[3].mxu0  ;;  %v1403_v60 = vadd.f32 %v3118_v57, %v2822_v22  ;;  %v1394_v61 = vpop.f32.mrb[1].mxu1 }
 0x408   : > { %1425 = vst [vmem:[#allocation2] sm:$0xff] %v1363_v49  ;;  %v1366_v59 = vadd.f32 %v2822_v22, %v1365_v56  ;;  %v1395_v34 = vadd.f32 %v2822_v22, %v1394_v61  ;;  %v3119_v62 = vpop.f32.mrb[2].mxu1 }
 0x409   : > { %1428 = vst [vmem:[#allocation2 + $0x18] sm:$0xff] %v1374_v23  ;;  %v1442_v27 = vpack.c.bf16 %v1374_v23, %v1371_v39  ;;  %1435 = vst [vmem:[#allocation2 + $0x50] sm:$0xff] %v1403_v60  ;;  %v1406_v0 = vadd.f32 %v3119_v62, %v2822_v22  ;;  %v1397_v1 = vpop.f32.mrb[3].mxu1 }
 0x40a   : > { %1426 = vst [vmem:[#allocation2 + $0x8] sm:$0xff] %v1366_v59  ;;  %v1441_v63 = vpack.c.bf16 %v1366_v59, %v1363_v49  ;;  %1433 = vst [vmem:[#allocation2 + $0x40] sm:$0xff] %v1395_v34  ;;  %v1398_v2 = vadd.f32 %v2822_v22, %v1397_v1 }
 0x40b   : > { %1450 = vst [vmem:[#allocation3 + $0x8] sm:$0xff] %v1442_v27  ;;  %1436 = vst [vmem:[#allocation2 + $0x58] sm:$0xff] %v1406_v0  ;;  %v1446_v3 = vpack.c.bf16 %v1406_v0, %v1403_v60 }
 0x40c   : > { %1449 = vst [vmem:[#allocation3] sm:$0xff] %v1441_v63  ;;  %1434 = vst [vmem:[#allocation2 + $0x48] sm:$0xff] %v1398_v2  ;;  %v1445_v5 = vpack.c.bf16 %v1398_v2, %v1395_v34 }
 0x40d   : > { %1454 = vst [vmem:[#allocation3 + $0x28] sm:$0xff] %v1446_v3 }
 0x40e   : > { %1453 = vst [vmem:[#allocation3 + $0x20] sm:$0xff] %v1445_v5 }
 0x413   : > { %v3114_v6 = vpop.f32.mrb[4].mxu0 }
 0x414   : > { %v1387_v36 = vadd.f32 %v3114_v6, %v2822_v22  ;;  %v1378_v7 = vpop.f32.mrb[5].mxu0 }
 0x415   : > { %v1379_v8 = vadd.f32 %v2822_v22, %v1378_v7  ;;  %v3115_v9 = vpop.f32.mrb[6].mxu0 }
 0x416   : > { %1431 = vst [vmem:[#allocation2 + $0x30] sm:$0xff] %v1387_v36  ;;  %v1390_v40 = vadd.f32 %v3115_v9, %v2822_v22  ;;  %v1381_v11 = vpop.f32.mrb[7].mxu0 }
 0x417   : > { %1429 = vst [vmem:[#allocation2 + $0x20] sm:$0xff] %v1379_v8  ;;  %v1382_v12 = vadd.f32 %v2822_v22, %v1381_v11 }
 0x418   : > { %1432 = vst [vmem:[#allocation2 + $0x38] sm:$0xff] %v1390_v40  ;;  %v1444_v13 = vpack.c.bf16 %v1390_v40, %v1387_v36 }
 0x419   : > { %1430 = vst [vmem:[#allocation2 + $0x28] sm:$0xff] %v1382_v12  ;;  %v1443_v14 = vpack.c.bf16 %v1382_v12, %v1379_v8 }
 0x41a   : > { %1452 = vst [vmem:[#allocation3 + $0x18] sm:$0xff] %v1444_v13 }
 0x41b   : > { %1451 = vst [vmem:[#allocation3 + $0x10] sm:$0xff] %v1443_v14  ;;  %v3122_v15 = vpop.f32.mrb[4].mxu1 }
 0x41c   : > { %v1419_v16 = vadd.f32 %v3122_v15, %v2822_v22  ;;  %v1410_v17 = vpop.f32.mrb[5].mxu1 }
 0x41d   : > { %v1411_v51 = vadd.f32 %v2822_v22, %v1410_v17  ;;  %v3123_v19 = vpop.f32.mrb[6].mxu1 }
 0x41e   : > { %1439 = vst [vmem:[#allocation2 + $0x70] sm:$0xff] %v1419_v16  ;;  %v1422_v20 = vadd.f32 %v3123_v19, %v2822_v22  ;;  %v1413_v24 = vpop.f32.mrb[7].mxu1 }
 0x41f   : > { %1437 = vst [vmem:[#allocation2 + $0x60] sm:$0xff] %v1411_v51  ;;  %v1414_v58 = vadd.f32 %v2822_v22, %v1413_v24 }
 0x420   : > { %1440 = vst [vmem:[#allocation2 + $0x78] sm:$0xff] %v1422_v20  ;;  %v1448_v25 = vpack.c.bf16 %v1422_v20, %v1419_v16 }
 0x421   : > { %1438 = vst [vmem:[#allocation2 + $0x68] sm:$0xff] %v1414_v58  ;;  %v1447_v26 = vpack.c.bf16 %v1414_v58, %v1411_v51 }
 0x422   : > { %1456 = vst [vmem:[#allocation3 + $0x38] sm:$0xff] %v1448_v25 }
 0x423   : > { %1455 = vst [vmem:[#allocation3 + $0x30] sm:$0xff] %v1447_v26 }
 0x424 PF: > { %p2831_p7 = scmp.ne.s32.totalorder %s4053_s29, 1 }
 0x425   : > { %v1460_v28 = vld [vmem:[#allocation2] sm:$0xff] (!%p2831_p7)  ;;  %v1461_v30 = vld [vmem:[#allocation2 + $0x8] sm:$0xff] (!%p2831_p7)  ;;  %s4710_s10 = sld [smem:[#allocation31_spill]] (!%p2831_p7)  ;;  %v1462_v37 = vld [vmem:[#allocation2 + $0x10] sm:$0xff] (!%p2831_p7) }
 0x426   : > { %1459 = sbr.rel (%p2831_p7) target bundleno = 1083 (0x43b), region = 120  ;;  %v1492_v31 = vld [vmem:[#allocation4] sm:$0xff] (!%p2831_p7)  ;;  %v1476_v4 = vmul.f32 (!%p2831_p7), 0.5, %v1460_v28  ;;  %v1477_v32 = vmul.f32 (!%p2831_p7), 0.5, %v1461_v30  ;;  %v1493_v33 = vld [vmem:[#allocation4 + $0x8] sm:$0xff] (!%p2831_p7)  ;;  %v1463_v10 = vld [vmem:[#allocation2 + $0x18] sm:$0xff] (!%p2831_p7) }
 0x427   : > { %v1478_v38 = vmul.f32 (!%p2831_p7), 0.5, %v1462_v37  ;;  %v1494_v41 = vld [vmem:[#allocation4 + $0x10] sm:$0xff] (!%p2831_p7)  ;;  %v1495_v18 = vld [vmem:[#allocation4 + $0x18] sm:$0xff] (!%p2831_p7)  ;;  %v1479_v44 = vmul.f32 (!%p2831_p7), 0.5, %v1463_v10  ;;  %v1464_v21 = vld [vmem:[#allocation2 + $0x20] sm:$0xff] (!%p2831_p7) }
 0x428   : > { %v1508_v42 = vsub.f32 (!%p2831_p7), %v1476_v4, %v1492_v31  ;;  %v1509_v43 = vsub.f32 (!%p2831_p7), %v1477_v32, %v1493_v33  ;;  %v1465_v45 = vld [vmem:[#allocation2 + $0x28] sm:$0xff] (!%p2831_p7)  ;;  %v1496_v46 = vld [vmem:[#allocation4 + $0x20] sm:$0xff] (!%p2831_p7)  ;;  %v1480_v47 = vmul.f32 (!%p2831_p7), 0.5, %v1464_v21  ;;  %v1466_v52 = vld [vmem:[#allocation2 + $0x30] sm:$0xff] (!%p2831_p7) }
 0x429   : > { %v1510_v29 = vsub.f32 (!%p2831_p7), %v1478_v38, %v1494_v41  ;;  %v1481_v48 = vmul.f32 (!%p2831_p7), 0.5, %v1465_v45  ;;  %v1497_v50 = vld [vmem:[#allocation4 + $0x28] sm:$0xff] (!%p2831_p7)  ;;  %v1467_v22 = vld [vmem:[#allocation2 + $0x38] sm:$0xff] (!%p2831_p7)  ;;  %v1511_v54 = vsub.f32 (!%p2831_p7), %v1479_v44, %v1495_v18  ;;  %v1482_v49 = vmul.f32 (!%p2831_p7), 0.5, %v1466_v52  ;;  %v1498_v55 = vld [vmem:[#allocation4 + $0x30] sm:$0xff] (!%p2831_p7) }
 0x42a   : > { %v1499_v23 = vld [vmem:[#allocation4 + $0x38] sm:$0xff] (!%p2831_p7)  ;;  %v1468_v56 = vld [vmem:[#allocation2 + $0x40] sm:$0xff] (!%p2831_p7)  ;;  %v1512_v59 = vsub.f32 (!%p2831_p7), %v1480_v47, %v1496_v46  ;;  %v1483_v61 = vmul.f32 (!%p2831_p7), 0.5, %v1467_v22  ;;  %v1469_v27 = vld [vmem:[#allocation2 + $0x48] sm:$0xff] (!%p2831_p7) }
 0x42b   : > { %v4453_v35 = vld [vmem:[%s4710_s10] ss:$0 sm:$0xff] (!%p2831_p7)  ;;  %v1513_v60 = vsub.f32 (!%p2831_p7), %v1481_v48, %v1497_v50  ;;  %v1514_v0 = vsub.f32 (!%p2831_p7), %v1482_v49, %v1498_v55  ;;  %v1484_v1 = vmul.f32 (!%p2831_p7), 0.5, %v1468_v56  ;;  %v1501_v2 = vld [vmem:[#allocation4 + $0x48] sm:$0xff] (!%p2831_p7)  ;;  %v1470_v3 = vld [vmem:[#allocation2 + $0x50] sm:$0xff] (!%p2831_p7)  ;;  %v1485_v8 = vmul.f32 (!%p2831_p7), 0.5, %v1469_v27 }
 0x42c   : > { %v1531_v53 = vadd.f32 (!%p2831_p7), %v4453_v35, %v1508_v42  ;;  %v1532_v39 = vadd.f32 (!%p2831_p7), %v4453_v35, %v1509_v43  ;;  %v1533_v57 = vadd.f32 (!%p2831_p7), %v4453_v35, %v1510_v29  ;;  %v1500_v34 = vld [vmem:[#allocation4 + $0x40] sm:$0xff] (!%p2831_p7)  ;;  %v1534_v63 = vadd.f32 (!%p2831_p7), %v4453_v35, %v1511_v54  ;;  %v1471_v5 = vld [vmem:[#allocation2 + $0x58] sm:$0xff] (!%p2831_p7)  ;;  %v1502_v9 = vld [vmem:[#allocation4 + $0x50] sm:$0xff] (!%p2831_p7) }
 0x42d   : > { %v1535_v6 = vadd.f32 %v4453_v35, %v1512_v59  ;;  %v1536_v36 = vadd.f32 %v4453_v35, %v1513_v60  ;;  %v1515_v7 = vsub.f32 %v1483_v61, %v1499_v23  ;;  %v1472_v40 = vld [vmem:[#allocation2 + $0x60] sm:$0xff]  ;;  %v1473_v11 = vld [vmem:[#allocation2 + $0x68] sm:$0xff]  ;;  %v1537_v13 = vadd.f32 %v4453_v35, %v1514_v0  ;;  %v1503_v16 = vld [vmem:[#allocation4 + $0x58] sm:$0xff] }
 0x42e   : > { %v1547_v62 = vpack.c.bf16 %v1532_v39, %v1531_v53  ;;  %v1548_v12 = vpack.c.bf16 %v1534_v63, %v1533_v57  ;;  %v1516_v14 = vsub.f32 %v1484_v1, %v1500_v34  ;;  %v1486_v15 = vmul.f32 0.5, %v1470_v3  ;;  %v1474_v17 = vld [vmem:[#allocation2 + $0x70] sm:$0xff]  ;;  %v1504_v58 = vld [vmem:[#allocation4 + $0x60] sm:$0xff]  ;;  %v1505_v25 = vld [vmem:[#allocation4 + $0x68] sm:$0xff] }
 0x42f   : > { %v1549_v51 = vpack.c.bf16 %v1536_v36, %v1535_v6  ;;  %v1538_v19 = vadd.f32 %v4453_v35, %v1515_v7  ;;  %v1517_v20 = vsub.f32 %v1485_v8, %v1501_v2  ;;  %v1487_v24 = vmul.f32 0.5, %v1471_v5  ;;  %v1475_v26 = vld [vmem:[#allocation2 + $0x78] sm:$0xff]  ;;  %v1506_v32 = vld [vmem:[#allocation4 + $0x70] sm:$0xff] }
 0x430   : > { %1555 = vst [vmem:[#allocation3] sm:$0xff] %v1547_v62  ;;  %1556 = vst [vmem:[#allocation3 + $0x8] sm:$0xff] %v1548_v12  ;;  %v1539_v28 = vadd.f32 %v4453_v35, %v1516_v14  ;;  %v1518_v30 = vsub.f32 %v1486_v15, %v1502_v9  ;;  %v1488_v31 = vmul.f32 0.5, %v1472_v40  ;;  %v1489_v4 = vmul.f32 0.5, %v1473_v11  ;;  %v1507_v41 = vld [vmem:[#allocation4 + $0x78] sm:$0xff] }
 0x431   : > { %1557 = vst [vmem:[#allocation3 + $0x10] sm:$0xff] %v1549_v51  ;;  %v1550_v33 = vpack.c.bf16 %v1538_v19, %v1537_v13  ;;  %v1540_v37 = vadd.f32 %v4453_v35, %v1517_v20  ;;  %v1519_v10 = vsub.f32 %v1487_v24, %v1503_v16  ;;  %v1490_v38 = vmul.f32 0.5, %v1474_v17 }
 0x432   : > { %v1541_v18 = vadd.f32 %v4453_v35, %v1518_v30  ;;  %v1520_v42 = vsub.f32 %v1488_v31, %v1504_v58  ;;  %v1521_v43 = vsub.f32 %v1489_v4, %v1505_v25  ;;  %v1491_v44 = vmul.f32 0.5, %v1475_v26 }
 0x433   : > { %1558 = vst [vmem:[#allocation3 + $0x18] sm:$0xff] %v1550_v33  ;;  %v1551_v21 = vpack.c.bf16 %v1540_v37, %v1539_v28  ;;  %v1542_v45 = vadd.f32 %v4453_v35, %v1519_v10  ;;  %v1522_v46 = vsub.f32 %v1490_v38, %v1506_v32 }
 0x434   : > { %v1543_v29 = vadd.f32 %v4453_v35, %v1520_v42  ;;  %v1544_v47 = vadd.f32 %v4453_v35, %v1521_v43  ;;  %v1523_v48 = vsub.f32 %v1491_v44, %v1507_v41 }
 0x435   : > { %1559 = vst [vmem:[#allocation3 + $0x20] sm:$0xff] %v1551_v21  ;;  %v1552_v50 = vpack.c.bf16 %v1542_v45, %v1541_v18  ;;  %v1545_v52 = vadd.f32 %v4453_v35, %v1522_v46 }
 0x436   : > { %v1553_v22 = vpack.c.bf16 %v1544_v47, %v1543_v29  ;;  %v1546_v53 = vadd.f32 %v4453_v35, %v1523_v48 }
 0x437   : > { %1560 = vst [vmem:[#allocation3 + $0x28] sm:$0xff] %v1552_v50 }
 0x438   : > { %1561 = vst [vmem:[#allocation3 + $0x30] sm:$0xff] %v1553_v22  ;;  %v1554_v39 = vpack.c.bf16 %v1546_v53, %v1545_v52 }
 0x43a   : > { %1562 = vst [vmem:[#allocation3 + $0x38] sm:$0xff] %v1554_v39 }
 0x43b PF: > { %p2833_p5 = scmp.lt.s32.totalorder %s4053_s29, 2 }
 0x43c   : > { %v1599_v54 = vld [vmem:[#allocation3] sm:$0xff] (!%p2833_p5)  ;;  %v1600_v49 = vld [vmem:[#allocation3 + $0x8] sm:$0xff] (!%p2833_p5)  ;;  %v1601_v23 = vld [vmem:[#allocation3 + $0x10] sm:$0xff] (!%p2833_p5)  ;;  %s4711_s7 = sld [smem:[#allocation33_spill]] (!%p2833_p5)  ;;  %s4712_s15 = sld [smem:[#allocation34_spill]] (!%p2833_p5) }
 0x43d   : > { %1566 = sbr.rel (%p2833_p5) target bundleno = 1860 (0x744), region = 124  ;;  %3124 = vmatprep.subr.bf16.mxu0 (!%p2833_p5), %v1599_v54  ;;  %3316 = vmatprep.subr.bf16.mxu1 (!%p2833_p5), %v1599_v54  ;;  %v3507_v55 = vld [vmem:[#allocation10] sm:$0xff] (!%p2833_p5)   ;;  %v1602_v35 = vld [vmem:[#allocation3 + $0x18] sm:$0xff] (!%p2833_p5)  ;;  %v3508_v34 = vld [vmem:[#allocation10 + $0x8] sm:$0xff] (!%p2833_p5)  }
 0x43e   : > { %3125 = vmatpush3.bf16.msra.mxu0 (!%p2833_p5), %v1599_v54  ;;  %3324 = vmatpush3.bf16.msra.mxu1 (!%p2833_p5), %v1599_v54  ;;  %v3515_v56 = vld [vmem:[#allocation10 + $0x40] sm:$0xff] (!%p2833_p5)   ;;  %v1604_v59 = vld [vmem:[#allocation3 + $0x28] sm:$0xff] (!%p2833_p5)  ;;  %v3509_v63 = vld [vmem:[#allocation10 + $0x10] sm:$0xff] (!%p2833_p5)  }
 0x43f   : > { %3126 = vmatprep.subr.bf16.mxu0 (!%p2833_p5), %v1600_v49  ;;  %3317 = vmatprep.subr.bf16.mxu1 (!%p2833_p5), %v1600_v49  ;;  %v1603_v57 = vld [vmem:[#allocation3 + $0x20] sm:$0xff] (!%p2833_p5)  ;;  %v1605_v60 = vld [vmem:[#allocation3 + $0x30] sm:$0xff] (!%p2833_p5)  ;;  %v3516_v62 = vld [vmem:[#allocation10 + $0x48] sm:$0xff] (!%p2833_p5)  }
 0x440   : > { %3140 = vmatprep.mubr.bf16.mxu0 (!%p2833_p5), %v3507_v55  ;;  %3156 = vmatprep.mubr.bf16.mxu1 (!%p2833_p5), %v3515_v56  ;;  %v3523_v27 = vld [vmem:[#allocation14] sm:$0xff] (!%p2833_p5)   ;;  %v3517_v0 = vld [vmem:[#allocation10 + $0x50] sm:$0xff] (!%p2833_p5)   ;;  %v3524_v1 = vld [vmem:[#allocation14 + $0x8] sm:$0xff] (!%p2833_p5)  }
 0x441   : > { %v1606_v61 = vld [vmem:[#allocation3 + $0x38] sm:$0xff] (!%p2833_p5)  ;;  %v3525_v2 = vld [vmem:[#allocation14 + $0x10] sm:$0xff] (!%p2833_p5)   ;;  %v3511_v6 = vld [vmem:[#allocation10 + $0x20] sm:$0xff] (!%p2833_p5)  }
 0x442   : > { %3127 = vmatpush3.bf16.msra.mxu0 (!%p2833_p5), %v1600_v49  ;;  %3325 = vmatpush3.bf16.msra.mxu1 (!%p2833_p5), %v1600_v49  ;;  %v3510_v3 = vld [vmem:[#allocation10 + $0x18] sm:$0xff] (!%p2833_p5)   ;;  %v3519_v36 = vld [vmem:[#allocation10 + $0x60] sm:$0xff] (!%p2833_p5)   ;;  %v3512_v9 = vld [vmem:[#allocation10 + $0x28] sm:$0xff] (!%p2833_p5)  }
 0x443   : > { %3128 = vmatprep.subr.bf16.mxu0 (!%p2833_p5), %v1601_v23  ;;  %3318 = vmatprep.subr.bf16.mxu1 (!%p2833_p5), %v1601_v23  ;;  %v3518_v5 = vld [vmem:[#allocation10 + $0x58] sm:$0xff] (!%p2833_p5)   ;;  %v3527_v8 = vld [vmem:[#allocation14 + $0x20] sm:$0xff] (!%p2833_p5)   ;;  %v3520_v40 = vld [vmem:[#allocation10 + $0x68] sm:$0xff] (!%p2833_p5)  }
 0x444   : > { %v3526_v7 = vld [vmem:[#allocation14 + $0x18] sm:$0xff]   ;;  %v3513_v11 = vld [vmem:[#allocation10 + $0x30] sm:$0xff]   ;;  %v3528_v13 = vld [vmem:[#allocation14 + $0x28] sm:$0xff]  }
 0x445   : > { %v3521_v12 = vld [vmem:[#allocation10 + $0x70] sm:$0xff]   ;;  %v3514_v15 = vld [vmem:[#allocation10 + $0x38] sm:$0xff]   ;;  %v3531_v51 = vld [vmem:[#allocation16] sm:$0xff]  }
 0x446   : > { %3129 = vmatpush3.bf16.msra.mxu0 %v1601_v23  ;;  %3326 = vmatpush3.bf16.msra.mxu1 %v1601_v23  ;;  %v3529_v14 = vld [vmem:[#allocation14 + $0x30] sm:$0xff]   ;;  %v3522_v16 = vld [vmem:[#allocation10 + $0x78] sm:$0xff]   ;;  %v3532_v19 = vld [vmem:[#allocation16 + $0x8] sm:$0xff]  }
 0x447   : > { %3130 = vmatprep.subr.bf16.mxu0 %v1602_v35  ;;  %3319 = vmatprep.subr.bf16.mxu1 %v1602_v35  ;;  %v3530_v17 = vld [vmem:[#allocation14 + $0x38] sm:$0xff]   ;;  %v3533_v20 = vld [vmem:[#allocation16 + $0x10] sm:$0xff]   ;;  %v3535_v58 = vld [vmem:[#allocation16 + $0x20] sm:$0xff]  }
 0x448   : > { %v3534_v24 = vld [vmem:[#allocation16 + $0x18] sm:$0xff]   ;;  %v3536_v25 = vld [vmem:[#allocation16 + $0x28] sm:$0xff]  }
 0x44a   : > { %3131 = vmatpush3.bf16.msra.mxu0 %v1602_v35  ;;  %3327 = vmatpush3.bf16.msra.mxu1 %v1602_v35 }
 0x44b   : > { %3132 = vmatprep.subr.bf16.mxu0 %v1603_v57  ;;  %3320 = vmatprep.subr.bf16.mxu1 %v1603_v57 }
 0x44e   : > { %3133 = vmatpush3.bf16.msra.mxu0 %v1603_v57  ;;  %3328 = vmatpush3.bf16.msra.mxu1 %v1603_v57 }
 0x44f   : > { %3134 = vmatprep.subr.bf16.mxu0 %v1604_v59  ;;  %3321 = vmatprep.subr.bf16.mxu1 %v1604_v59 }
 0x452   : > { %3135 = vmatpush3.bf16.msra.mxu0 %v1604_v59  ;;  %3329 = vmatpush3.bf16.msra.mxu1 %v1604_v59 }
 0x453   : > { %3136 = vmatprep.subr.bf16.mxu0 %v1605_v60  ;;  %3322 = vmatprep.subr.bf16.mxu1 %v1605_v60 }
 0x456   : > { %3137 = vmatpush3.bf16.msra.mxu0 %v1605_v60  ;;  %3330 = vmatpush3.bf16.msra.mxu1 %v1605_v60 }
 0x457   : > { %3138 = vmatprep.subr.bf16.mxu0 %v1606_v61  ;;  %3323 = vmatprep.subr.bf16.mxu1 %v1606_v61 }
 0x45a   : > { %3139 = vmatpush3.bf16.msra.mxu0 %v1606_v61  ;;  %3331 = vmatpush3.bf16.msra.mxu1 %v1606_v61 }
 0x45b   : > { %3172 = vmatprep.subr.bf16.mxu1 %v3523_v27  ;;  %3220 = vmatprep.subr.bf16.mxu0 %v3531_v51 }
 0x45d   : > { %3141 = vmatmul.mubr.bf16.vlgmr.msra.gmra.mrb[0].mxu0 %v3508_v34  ;;  %3157 = vmatmul.mubr.bf16.vlgmr.msra.gmra.mrb[0].mxu1 %v3516_v62 }
 0x45e   : > { %3144 = vmatprep.mubr.bf16.mxu0 %v3509_v63  ;;  %3160 = vmatprep.mubr.bf16.mxu1 %v3517_v0 }
 0x45f   : > { %3173 = vmatpush3.bf16.msra.mxu1 %v3523_v27  ;;  %3221 = vmatpush3.bf16.msra.mxu0 %v3531_v51 }
 0x460   : > { %3174 = vmatprep.subr.bf16.mxu1 %v3524_v1  ;;  %3222 = vmatprep.subr.bf16.mxu0 %v3532_v19 }
 0x463   : > { %3175 = vmatpush3.bf16.msra.mxu1 %v3524_v1  ;;  %3223 = vmatpush3.bf16.msra.mxu0 %v3532_v19 }
 0x464   : > { %3176 = vmatprep.subr.bf16.mxu1 %v3525_v2  ;;  %3224 = vmatprep.subr.bf16.mxu0 %v3533_v20 }
 0x465   : > { %3145 = vmatmul.mubr.bf16.gmra.mrb[4].mxu0 %v3510_v3  ;;  %3161 = vmatmul.mubr.bf16.gmra.mrb[4].mxu1 %v3518_v5 }
 0x466   : > { %3148 = vmatprep.mubr.bf16.mxu0 %v3511_v6  ;;  %3164 = vmatprep.mubr.bf16.mxu1 %v3519_v36 }
 0x467   : > { %3177 = vmatpush3.bf16.msra.mxu1 %v3525_v2  ;;  %3225 = vmatpush3.bf16.msra.mxu0 %v3533_v20 }
 0x468   : > { %3178 = vmatprep.subr.bf16.mxu1 %v3526_v7  ;;  %3226 = vmatprep.subr.bf16.mxu0 %v3534_v24 }
 0x46b   : > { %3179 = vmatpush3.bf16.msra.mxu1 %v3526_v7  ;;  %3227 = vmatpush3.bf16.msra.mxu0 %v3534_v24 }
 0x46c   : > { %3180 = vmatprep.subr.bf16.mxu1 %v3527_v8  ;;  %3228 = vmatprep.subr.bf16.mxu0 %v3535_v58 }
 0x46d   : > { %3149 = vmatmul.mubr.bf16.gmra.mrb[8].mxu0 %v3512_v9  ;;  %3165 = vmatmul.mubr.bf16.gmra.mrb[8].mxu1 %v3520_v40  ;;  %v3538_v9 = vld [vmem:[#allocation16 + $0x38] sm:$0xff]   ;;  %v4475_v40 = vld [vmem:[%s4711_s7] ss:$0 sm:$0xff] }
 0x46e   : > { %3152 = vmatprep.mubr.bf16.mxu0 %v3513_v11  ;;  %3168 = vmatprep.mubr.bf16.mxu1 %v3521_v12 }
 0x46f   : > { %3181 = vmatpush3.bf16.msra.mxu1 %v3527_v8  ;;  %3229 = vmatpush3.bf16.msra.mxu0 %v3535_v58  ;;  %v3537_v8 = vld [vmem:[#allocation16 + $0x30] sm:$0xff]  }
 0x470   : > { %3182 = vmatprep.subr.bf16.mxu1 %v3528_v13  ;;  %3230 = vmatprep.subr.bf16.mxu0 %v3536_v25 }
 0x473   : > { %3183 = vmatpush3.bf16.msra.mxu1 %v3528_v13  ;;  %3231 = vmatpush3.bf16.msra.mxu0 %v3536_v25 }
 0x474   : > { %3184 = vmatprep.subr.bf16.mxu1 %v3529_v14  ;;  %3232 = vmatprep.subr.bf16.mxu0 %v3537_v8 }
 0x475   : > { %3153 = vmatmul.mubr.bf16.gmra.mrb[12].mxu0 %v3514_v15  ;;  %3169 = vmatmul.mubr.bf16.gmra.mrb[12].mxu1 %v3522_v16 }
 0x477   : > { %3185 = vmatpush3.bf16.msra.mxu1 %v3529_v14  ;;  %3233 = vmatpush3.bf16.msra.mxu0 %v3537_v8 }
 0x478   : > { %3186 = vmatprep.subr.bf16.mxu1 %v3530_v17  ;;  %3234 = vmatprep.subr.bf16.mxu0 %v3538_v9 }
 0x47b   : > { %3187 = vmatpush3.bf16.msra.mxu1 %v3530_v17  ;;  %3235 = vmatpush3.bf16.msra.mxu0 %v3538_v9 }
 0x530   : > { %v3142_v26 = vpop.f32.mrb[0].mxu0  ;;  %v3158_v28 = vpop.f32.mrb[0].mxu1 }
 0x531   : > { %v1737_v30 = vpop.f32.mrb[1].mxu0  ;;  %v1801_v31 = vpop.f32.mrb[1].mxu1 }
 0x532   : > { %v3143_v4 = vpop.f32.mrb[2].mxu0  ;;  %v3159_v32 = vpop.f32.mrb[2].mxu1 }
 0x533   : > { %v1865_v33 = vpack.c.bf16 %v3143_v4, %v3142_v26  ;;  %v1740_v37 = vpop.f32.mrb[3].mxu0  ;;  %v1873_v10 = vpack.c.bf16 %v3159_v32, %v3158_v28  ;;  %v1804_v38 = vpop.f32.mrb[3].mxu1 }
 0x534   : > { %v1864_v41 = vpack.c.bf16 %v1740_v37, %v1737_v30  ;;  %v1872_v18 = vpack.c.bf16 %v1804_v38, %v1801_v31 }
 0x536   : > { %3188 = vmatprep.mubr.bf16.mxu1 %v1864_v41 }
 0x537   : > { %3189 = vmatmul.mubr.bf16.vlgmr.msra.gmra.mrb[16].mxu1 %v1865_v33 }
 0x538   : > { %v3146_v42 = vpop.f32.mrb[4].mxu0  ;;  %v3162_v43 = vpop.f32.mrb[4].mxu1 }
 0x539   : > { %v1753_v44 = vpop.f32.mrb[5].mxu0  ;;  %v1817_v21 = vpop.f32.mrb[5].mxu1 }
 0x53a   : > { %v3147_v45 = vpop.f32.mrb[6].mxu0  ;;  %v3163_v46 = vpop.f32.mrb[6].mxu1 }
 0x53b   : > { %v1867_v29 = vpack.c.bf16 %v3147_v45, %v3146_v42  ;;  %v1756_v47 = vpop.f32.mrb[7].mxu0  ;;  %v1875_v48 = vpack.c.bf16 %v3163_v46, %v3162_v43  ;;  %v1820_v50 = vpop.f32.mrb[7].mxu1 }
 0x53c   : > { %v1866_v52 = vpack.c.bf16 %v1756_v47, %v1753_v44  ;;  %v1874_v22 = vpack.c.bf16 %v1820_v50, %v1817_v21 }
 0x53e   : > { %3192 = vmatprep.mubr.bf16.mxu1 %v1866_v52 }
 0x53f   : > { %3193 = vmatmul.mubr.bf16.gmra.mrb[20].mxu1 %v1867_v29 }
 0x540   : > { %v3150_v53 = vpop.f32.mrb[8].mxu0  ;;  %v3166_v39 = vpop.f32.mrb[8].mxu1 }
 0x541   : > { %v1769_v54 = vpop.f32.mrb[9].mxu0  ;;  %v1833_v49 = vpop.f32.mrb[9].mxu1 }
 0x542   : > { %v3151_v55 = vpop.f32.mrb[10].mxu0  ;;  %v3167_v23 = vpop.f32.mrb[10].mxu1 }
 0x543   : > { %v1869_v35 = vpack.c.bf16 %v3151_v55, %v3150_v53  ;;  %v1772_v56 = vpop.f32.mrb[11].mxu0  ;;  %v1877_v57 = vpack.c.bf16 %v3167_v23, %v3166_v39  ;;  %v1836_v59 = vpop.f32.mrb[11].mxu1 }
 0x544   : > { %v1868_v60 = vpack.c.bf16 %v1772_v56, %v1769_v54  ;;  %v1876_v61 = vpack.c.bf16 %v1836_v59, %v1833_v49 }
 0x546   : > { %3196 = vmatprep.mubr.bf16.mxu1 %v1868_v60 }
 0x547   : > { %3197 = vmatmul.mubr.bf16.gmra.mrb[24].mxu1 %v1869_v35 }
 0x548   : > { %v3154_v27 = vpop.f32.mrb[12].mxu0  ;;  %v3170_v34 = vpop.f32.mrb[12].mxu1 }
 0x549   : > { %v1785_v62 = vpop.f32.mrb[13].mxu0  ;;  %v1849_v63 = vpop.f32.mrb[13].mxu1 }
 0x54a   : > { %v3155_v0 = vpop.f32.mrb[14].mxu0  ;;  %v3171_v1 = vpop.f32.mrb[14].mxu1 }
 0x54b   : > { %v1871_v2 = vpack.c.bf16 %v3155_v0, %v3154_v27  ;;  %v1788_v3 = vpop.f32.mrb[15].mxu0  ;;  %v1879_v5 = vpack.c.bf16 %v3171_v1, %v3170_v34  ;;  %v1852_v6 = vpop.f32.mrb[15].mxu1 }
 0x54c   : > { %v1870_v36 = vpack.c.bf16 %v1788_v3, %v1785_v62  ;;  %v1878_v7 = vpack.c.bf16 %v1852_v6, %v1849_v63 }
 0x54e   : > { %3200 = vmatprep.mubr.bf16.mxu1 %v1870_v36 }
 0x54f   : > { %3201 = vmatmul.mubr.bf16.gmra.mrb[28].mxu1 %v1871_v2 }
 0x550   : > { %3204 = vmatprep.mubr.bf16.mxu1 %v1872_v18 }
 0x557   : > { %3205 = vmatmul.mubr.bf16.gmra.mrb[32].mxu1 %v1873_v10 }
 0x558   : > { %3208 = vmatprep.mubr.bf16.mxu1 %v1874_v22 }
 0x55f   : > { %3209 = vmatmul.mubr.bf16.gmra.mrb[36].mxu1 %v1875_v48 }
 0x560   : > { %3212 = vmatprep.mubr.bf16.mxu1 %v1876_v61 }
 0x567   : > { %3213 = vmatmul.mubr.bf16.gmra.mrb[40].mxu1 %v1877_v57 }
 0x568   : > { %3216 = vmatprep.mubr.bf16.mxu1 %v1878_v7 }
 0x56f   : > { %3217 = vmatmul.mubr.bf16.gmra.mrb[44].mxu1 %v1879_v5 }
 0x60a   : > { %v3190_v11 = vpop.f32.mrb[16].mxu1 }
 0x60b   : > { %v1994_v12 = vadd.f32 %v3190_v11, %v4475_v40  ;;  %v1985_v13 = vpop.f32.mrb[17].mxu1 }
 0x60c   : > { %v1986_v14 = vadd.f32 %v4475_v40, %v1985_v13  ;;  %v3191_v15 = vpop.f32.mrb[18].mxu1 }
 0x60d   : > { %v1997_v16 = vadd.f32 %v3191_v15, %v4475_v40  ;;  %v1988_v17 = vpop.f32.mrb[19].mxu1  ;;  %v2114_v19 = vmax.f32 %v1994_v12, 0.0 }
 0x60e   : > { %v1989_v51 = vadd.f32 %v4475_v40, %v1988_v17  ;;  %v2112_v24 = vmax.f32 %v1986_v14, 0.0 }
 0x60f   : > { %v2115_v20 = vmax.f32 %v1997_v16, 0.0 }
 0x610   : > { %v2113_v58 = vmax.f32 %v1989_v51, 0.0 }
 0x611   : > { %v2145_v25 = vpack.c.bf16 %v2115_v20, %v2114_v19 }
 0x612   : > { %v2144_v26 = vpack.c.bf16 %v2113_v58, %v2112_v24  ;;  %v3194_v28 = vpop.f32.mrb[20].mxu1 }
 0x613   : > { %v2010_v30 = vadd.f32 %v3194_v28, %v4475_v40  ;;  %v2001_v31 = vpop.f32.mrb[21].mxu1 }
 0x614   : > { %v2002_v4 = vadd.f32 %v4475_v40, %v2001_v31  ;;  %v3195_v32 = vpop.f32.mrb[22].mxu1  ;;  %3236 = vmatprep.mubr.bf16.mxu0 %v2144_v26 }
 0x615   : > { %v2013_v33 = vadd.f32 %v3195_v32, %v4475_v40  ;;  %v2004_v37 = vpop.f32.mrb[23].mxu1  ;;  %3237 = vmatmul.mubr.bf16.vlgmr.msra.gmra.mrb[16].mxu0 %v2145_v25  ;;  %v2118_v38 = vmax.f32 %v2010_v30, 0.0 }
 0x616   : > { %v2005_v10 = vadd.f32 %v4475_v40, %v2004_v37  ;;  %v2116_v18 = vmax.f32 %v2002_v4, 0.0 }
 0x617   : > { %v2119_v41 = vmax.f32 %v2013_v33, 0.0 }
 0x618   : > { %v2117_v42 = vmax.f32 %v2005_v10, 0.0 }
 0x619   : > { %v2147_v43 = vpack.c.bf16 %v2119_v41, %v2118_v38 }
 0x61a   : > { %v2146_v44 = vpack.c.bf16 %v2117_v42, %v2116_v18  ;;  %v3198_v21 = vpop.f32.mrb[24].mxu1 }
 0x61b   : > { %v2026_v45 = vadd.f32 %v3198_v21, %v4475_v40  ;;  %v2017_v46 = vpop.f32.mrb[25].mxu1 }
 0x61c   : > { %v2018_v29 = vadd.f32 %v4475_v40, %v2017_v46  ;;  %v3199_v47 = vpop.f32.mrb[26].mxu1  ;;  %3240 = vmatprep.mubr.bf16.mxu0 %v2146_v44 }
 0x61d   : > { %v2029_v48 = vadd.f32 %v3199_v47, %v4475_v40  ;;  %v2020_v50 = vpop.f32.mrb[27].mxu1  ;;  %3241 = vmatmul.mubr.bf16.gmra.mrb[20].mxu0 %v2147_v43  ;;  %v2122_v22 = vmax.f32 %v2026_v45, 0.0 }
 0x61e   : > { %v2021_v52 = vadd.f32 %v4475_v40, %v2020_v50  ;;  %v2120_v39 = vmax.f32 %v2018_v29, 0.0 }
 0x61f   : > { %v2123_v53 = vmax.f32 %v2029_v48, 0.0 }
 0x620   : > { %v2121_v54 = vmax.f32 %v2021_v52, 0.0 }
 0x621   : > { %v2149_v49 = vpack.c.bf16 %v2123_v53, %v2122_v22 }
 0x622   : > { %v2148_v55 = vpack.c.bf16 %v2121_v54, %v2120_v39  ;;  %v3202_v23 = vpop.f32.mrb[28].mxu1 }
 0x623   : > { %v2042_v35 = vadd.f32 %v3202_v23, %v4475_v40  ;;  %v2033_v56 = vpop.f32.mrb[29].mxu1 }
 0x624   : > { %v2034_v57 = vadd.f32 %v4475_v40, %v2033_v56  ;;  %v3203_v59 = vpop.f32.mrb[30].mxu1  ;;  %3244 = vmatprep.mubr.bf16.mxu0 %v2148_v55 }
 0x625   : > { %v2045_v60 = vadd.f32 %v3203_v59, %v4475_v40  ;;  %v2036_v61 = vpop.f32.mrb[31].mxu1  ;;  %3245 = vmatmul.mubr.bf16.gmra.mrb[24].mxu0 %v2149_v49  ;;  %v2126_v34 = vmax.f32 %v2042_v35, 0.0 }
 0x626   : > { %v2037_v27 = vadd.f32 %v4475_v40, %v2036_v61  ;;  %v2124_v63 = vmax.f32 %v2034_v57, 0.0 }
 0x627   : > { %v2127_v62 = vmax.f32 %v2045_v60, 0.0 }
 0x628   : > { %v2125_v0 = vmax.f32 %v2037_v27, 0.0  ;;  %v4512_v27 = vld [vmem:[%s4712_s15] ss:$0 sm:$0xff] }
 0x629   : > { %v2151_v1 = vpack.c.bf16 %v2127_v62, %v2126_v34 }
 0x62a   : > { %v2150_v2 = vpack.c.bf16 %v2125_v0, %v2124_v63  ;;  %v3206_v3 = vpop.f32.mrb[32].mxu1 }
 0x62b   : > { %v2058_v5 = vadd.f32 %v3206_v3, %v4475_v40  ;;  %v2049_v6 = vpop.f32.mrb[33].mxu1 }
 0x62c   : > { %v2050_v36 = vadd.f32 %v4475_v40, %v2049_v6  ;;  %v3207_v7 = vpop.f32.mrb[34].mxu1  ;;  %3248 = vmatprep.mubr.bf16.mxu0 %v2150_v2 }
 0x62d   : > { %v2061_v8 = vadd.f32 %v3207_v7, %v4475_v40  ;;  %v2052_v9 = vpop.f32.mrb[35].mxu1  ;;  %3249 = vmatmul.mubr.bf16.gmra.mrb[28].mxu0 %v2151_v1  ;;  %v2130_v12 = vmax.f32 %v2058_v5, 0.0 }
 0x62e   : > { %v2053_v11 = vadd.f32 %v4475_v40, %v2052_v9  ;;  %v2128_v14 = vmax.f32 %v2050_v36, 0.0 }
 0x62f   : > { %v2131_v13 = vmax.f32 %v2061_v8, 0.0 }
 0x630   : > { %v2129_v15 = vmax.f32 %v2053_v11, 0.0 }
 0x631   : > { %v2153_v16 = vpack.c.bf16 %v2131_v13, %v2130_v12 }
 0x632   : > { %v2152_v17 = vpack.c.bf16 %v2129_v15, %v2128_v14  ;;  %v3210_v51 = vpop.f32.mrb[36].mxu1 }
 0x633   : > { %v2074_v19 = vadd.f32 %v3210_v51, %v4475_v40  ;;  %v2065_v20 = vpop.f32.mrb[37].mxu1 }
 0x634   : > { %v2066_v24 = vadd.f32 %v4475_v40, %v2065_v20  ;;  %v3211_v58 = vpop.f32.mrb[38].mxu1  ;;  %3252 = vmatprep.mubr.bf16.mxu0 %v2152_v17 }
 0x635   : > { %v2077_v25 = vadd.f32 %v3211_v58, %v4475_v40  ;;  %v2068_v26 = vpop.f32.mrb[39].mxu1  ;;  %3253 = vmatmul.mubr.bf16.gmra.mrb[32].mxu0 %v2153_v16  ;;  %v2134_v30 = vmax.f32 %v2074_v19, 0.0 }
 0x636   : > { %v2069_v28 = vadd.f32 %v4475_v40, %v2068_v26  ;;  %v2132_v4 = vmax.f32 %v2066_v24, 0.0 }
 0x637   : > { %v2135_v31 = vmax.f32 %v2077_v25, 0.0 }
 0x638   : > { %v2133_v32 = vmax.f32 %v2069_v28, 0.0 }
 0x639   : > { %v2155_v33 = vpack.c.bf16 %v2135_v31, %v2134_v30 }
 0x63a   : > { %v2154_v37 = vpack.c.bf16 %v2133_v32, %v2132_v4  ;;  %v3214_v10 = vpop.f32.mrb[40].mxu1 }
 0x63b   : > { %v2090_v38 = vadd.f32 %v3214_v10, %v4475_v40  ;;  %v2081_v41 = vpop.f32.mrb[41].mxu1 }
 0x63c   : > { %v2082_v18 = vadd.f32 %v4475_v40, %v2081_v41  ;;  %v3215_v42 = vpop.f32.mrb[42].mxu1  ;;  %3256 = vmatprep.mubr.bf16.mxu0 %v2154_v37 }
 0x63d   : > { %v2093_v43 = vadd.f32 %v3215_v42, %v4475_v40  ;;  %v2084_v44 = vpop.f32.mrb[43].mxu1  ;;  %3257 = vmatmul.mubr.bf16.gmra.mrb[36].mxu0 %v2155_v33  ;;  %v2138_v45 = vmax.f32 %v2090_v38, 0.0 }
 0x63e   : > { %v2085_v21 = vadd.f32 %v4475_v40, %v2084_v44  ;;  %v2136_v29 = vmax.f32 %v2082_v18, 0.0 }
 0x63f   : > { %v2139_v46 = vmax.f32 %v2093_v43, 0.0 }
 0x640   : > { %v2137_v47 = vmax.f32 %v2085_v21, 0.0 }
 0x641   : > { %v2157_v48 = vpack.c.bf16 %v2139_v46, %v2138_v45 }
 0x642   : > { %v2156_v50 = vpack.c.bf16 %v2137_v47, %v2136_v29  ;;  %v3218_v52 = vpop.f32.mrb[44].mxu1 }
 0x643   : > { %v2106_v22 = vadd.f32 %v3218_v52, %v4475_v40  ;;  %v2097_v53 = vpop.f32.mrb[45].mxu1 }
 0x644   : > { %v2098_v39 = vadd.f32 %v4475_v40, %v2097_v53  ;;  %v3219_v54 = vpop.f32.mrb[46].mxu1  ;;  %3260 = vmatprep.mubr.bf16.mxu0 %v2156_v50 }
 0x645   : > { %v2109_v49 = vadd.f32 %v3219_v54, %v4475_v40  ;;  %v2100_v55 = vpop.f32.mrb[47].mxu1  ;;  %3261 = vmatmul.mubr.bf16.gmra.mrb[40].mxu0 %v2157_v48  ;;  %v2142_v35 = vmax.f32 %v2106_v22, 0.0 }
 0x646   : > { %v2101_v23 = vadd.f32 %v4475_v40, %v2100_v55  ;;  %v2140_v57 = vmax.f32 %v2098_v39, 0.0 }
 0x647   : > { %v2143_v56 = vmax.f32 %v2109_v49, 0.0 }
 0x648   : > { %v2141_v59 = vmax.f32 %v2101_v23, 0.0 }
 0x649   : > { %v2159_v60 = vpack.c.bf16 %v2143_v56, %v2142_v35 }
 0x64a   : > { %v2158_v61 = vpack.c.bf16 %v2141_v59, %v2140_v57 }
 0x64c   : > { %3264 = vmatprep.mubr.bf16.mxu0 %v2158_v61 }
 0x64d   : > { %3265 = vmatmul.mubr.bf16.gmra.mrb[44].mxu0 %v2159_v60 }
 0x6e8   : > { %v3238_v34 = vpop.f32.mrb[16].mxu0 }
 0x6e9   : > { %v2274_v62 = vadd.f32 %v3238_v34, %v4512_v27  ;;  %v2265_v63 = vpop.f32.mrb[17].mxu0 }
 0x6ea   : > { %v2266_v0 = vadd.f32 %v4512_v27, %v2265_v63  ;;  %v3239_v40 = vpop.f32.mrb[18].mxu0 }
 0x6eb   : > { %v2870_v1 = vmul.f32 -1.442695, %v2274_v62  ;;  %v2277_v2 = vadd.f32 %v3239_v40, %v4512_v27  ;;  %v2268_v3 = vpop.f32.mrb[19].mxu0 }
 0x6ec   : > { %v2868_v5 = vmul.f32 -1.442695, %v2266_v0  ;;  %v2269_v6 = vadd.f32 %v4512_v27, %v2268_v3 }
 0x6ed   : > { %3539 = vpow2.f32 %v2870_v1  ;;  %v2871_v36 = vmul.f32 -1.442695, %v2277_v2 }
 0x6ee   : > { %3541 = vpow2.f32 %v2868_v5  ;;  %v2869_v7 = vmul.f32 -1.442695, %v2269_v6 }
 0x6ef   : > { %3543 = vpow2.f32 %v2871_v36 }
 0x6f0   : > { %3545 = vpow2.f32 %v2869_v7  ;;  %v3242_v8 = vpop.f32.mrb[20].mxu0 }
 0x6f1   : > { %v2290_v9 = vadd.f32 %v3242_v8, %v4512_v27  ;;  %v2281_v11 = vpop.f32.mrb[21].mxu0 }
 0x6f2   : > { %v2282_v12 = vadd.f32 %v4512_v27, %v2281_v11  ;;  %v3243_v13 = vpop.f32.mrb[22].mxu0 }
 0x6f3   : > { %v2874_v14 = vmul.f32 -1.442695, %v2290_v9  ;;  %v2293_v15 = vadd.f32 %v3243_v13, %v4512_v27  ;;  %v2284_v16 = vpop.f32.mrb[23].mxu0 }
 0x6f4   : > { %v2872_v17 = vmul.f32 -1.442695, %v2282_v12  ;;  %v2285_v51 = vadd.f32 %v4512_v27, %v2284_v16 }
 0x6f5   : > { %3547 = vpow2.f32 %v2874_v14  ;;  %v2875_v19 = vmul.f32 -1.442695, %v2293_v15 }
 0x6f6   : > { %3549 = vpow2.f32 %v2872_v17  ;;  %v2873_v20 = vmul.f32 -1.442695, %v2285_v51 }
 0x6f7   : > { %v3540_v24 = vpop.eup %3539  ;;  %3551 = vpow2.f32 %v2875_v19 }
 0x6f8   : > { %v3542_v58 = vpop.eup %3541  ;;  %v2490_v25 = vadd.f32 1.0, %v3540_v24  ;;  %3553 = vpow2.f32 %v2873_v20  ;;  %v3246_v26 = vpop.f32.mrb[24].mxu0 }
 0x6f9   : > { %v3544_v28 = vpop.eup %3543  ;;  %v2488_v30 = vadd.f32 1.0, %v3542_v58  ;;  %v2306_v31 = vadd.f32 %v3246_v26, %v4512_v27  ;;  %v2297_v4 = vpop.f32.mrb[25].mxu0 }
 0x6fa   : > { %v3546_v32 = vpop.eup %3545  ;;  %3555 = vrcp.f32 %v2490_v25  ;;  %v2491_v33 = vadd.f32 1.0, %v3544_v28  ;;  %v2298_v37 = vadd.f32 %v4512_v27, %v2297_v4  ;;  %v3247_v10 = vpop.f32.mrb[26].mxu0 }
 0x6fb   : > { %3557 = vrcp.f32 %v2488_v30  ;;  %v2489_v38 = vadd.f32 1.0, %v3546_v32  ;;  %v2878_v41 = vmul.f32 -1.442695, %v2306_v31  ;;  %v2309_v18 = vadd.f32 %v3247_v10, %v4512_v27  ;;  %v2300_v42 = vpop.f32.mrb[27].mxu0 }
 0x6fc   : > { %3559 = vrcp.f32 %v2491_v33  ;;  %v2876_v43 = vmul.f32 -1.442695, %v2298_v37  ;;  %v2301_v44 = vadd.f32 %v4512_v27, %v2300_v42 }
 0x6fd   : > { %3561 = vrcp.f32 %v2489_v38  ;;  %v2879_v21 = vmul.f32 -1.442695, %v2309_v18 }
 0x6fe   : > { %3563 = vpow2.f32 %v2878_v41  ;;  %v2877_v45 = vmul.f32 -1.442695, %v2301_v44 }
 0x6ff   : > { %v3548_v46 = vpop.eup %3547  ;;  %3565 = vpow2.f32 %v2876_v43 }
 0x700   : > { %v3550_v29 = vpop.eup %3549  ;;  %v2494_v47 = vadd.f32 1.0, %v3548_v46  ;;  %3567 = vpow2.f32 %v2879_v21  ;;  %v3250_v48 = vpop.f32.mrb[28].mxu0 }
 0x701   : > { %v3552_v50 = vpop.eup %3551  ;;  %v2492_v52 = vadd.f32 1.0, %v3550_v29  ;;  %3569 = vpow2.f32 %v2877_v45  ;;  %v2322_v22 = vadd.f32 %v3250_v48, %v4512_v27  ;;  %v2313_v53 = vpop.f32.mrb[29].mxu0 }
 0x702   : > { %v3554_v39 = vpop.eup %3553  ;;  %3571 = vrcp.f32 %v2494_v47  ;;  %v2495_v54 = vadd.f32 1.0, %v3552_v50  ;;  %v2314_v49 = vadd.f32 %v4512_v27, %v2313_v53  ;;  %v3251_v55 = vpop.f32.mrb[30].mxu0 }
 0x703   : > { %3573 = vrcp.f32 %v2492_v52  ;;  %v2493_v23 = vadd.f32 1.0, %v3554_v39  ;;  %v2882_v35 = vmul.f32 -1.442695, %v2322_v22  ;;  %v2325_v56 = vadd.f32 %v3251_v55, %v4512_v27  ;;  %v2316_v57 = vpop.f32.mrb[31].mxu0 }
 0x704   : > { %v3556_v59 = vpop.eup %3555  ;;  %3575 = vrcp.f32 %v2495_v54  ;;  %v2880_v60 = vmul.f32 -1.442695, %v2314_v49  ;;  %v2317_v61 = vadd.f32 %v4512_v27, %v2316_v57 }
 0x705   : > { %v3558_v34 = vpop.eup %3557  ;;  %2586 = vst [vmem:[%s4325_s18 + $0x10] sm:$0xff] %v3556_v59  ;;  %3577 = vrcp.f32 %v2493_v23  ;;  %v2883_v62 = vmul.f32 -1.442695, %v2325_v56 }
 0x706   : > { %v3560_v63 = vpop.eup %3559  ;;  %2584 = vst [vmem:[%s4325_s18] sm:$0xff] %v3558_v34  ;;  %3579 = vpow2.f32 %v2882_v35  ;;  %v2881_v0 = vmul.f32 -1.442695, %v2317_v61 }
 0x707   : > { %v3562_v40 = vpop.eup %3561  ;;  %2587 = vst [vmem:[%s4325_s18 + $0x18] sm:$0xff] %v3560_v63  ;;  %3581 = vpow2.f32 %v2880_v60 }
 0x708   : > { %v3564_v1 = vpop.eup %3563  ;;  %2585 = vst [vmem:[%s4325_s18 + $0x8] sm:$0xff] %v3562_v40  ;;  %3583 = vpow2.f32 %v2883_v62  ;;  %v3254_v2 = vpop.f32.mrb[32].mxu0 }
 0x709   : > { %v3566_v3 = vpop.eup %3565  ;;  %v2498_v5 = vadd.f32 1.0, %v3564_v1  ;;  %3585 = vpow2.f32 %v2881_v0  ;;  %v2338_v6 = vadd.f32 %v3254_v2, %v4512_v27  ;;  %v2329_v36 = vpop.f32.mrb[33].mxu0 }
 0x70a   : > { %v3568_v7 = vpop.eup %3567  ;;  %v2496_v8 = vadd.f32 1.0, %v3566_v3  ;;  %v2330_v9 = vadd.f32 %v4512_v27, %v2329_v36  ;;  %v3255_v11 = vpop.f32.mrb[34].mxu0 }
 0x70b   : > { %v3570_v12 = vpop.eup %3569  ;;  %3587 = vrcp.f32 %v2498_v5  ;;  %v2499_v13 = vadd.f32 1.0, %v3568_v7  ;;  %v2886_v14 = vmul.f32 -1.442695, %v2338_v6  ;;  %v2341_v15 = vadd.f32 %v3255_v11, %v4512_v27  ;;  %v2332_v16 = vpop.f32.mrb[35].mxu0 }
 0x70c   : > { %v3572_v17 = vpop.eup %3571  ;;  %3589 = vrcp.f32 %v2496_v8  ;;  %v2497_v51 = vadd.f32 1.0, %v3570_v12  ;;  %v2884_v19 = vmul.f32 -1.442695, %v2330_v9  ;;  %v2333_v20 = vadd.f32 %v4512_v27, %v2332_v16 }
 0x70d   : > { %v3574_v24 = vpop.eup %3573  ;;  %2590 = vst [vmem:[%s4325_s18 + $0x30] sm:$0xff] %v3572_v17  ;;  %3591 = vrcp.f32 %v2499_v13  ;;  %v2887_v58 = vmul.f32 -1.442695, %v2341_v15 }
 0x70e   : > { %v3576_v25 = vpop.eup %3575  ;;  %2588 = vst [vmem:[%s4325_s18 + $0x20] sm:$0xff] %v3574_v24  ;;  %3593 = vrcp.f32 %v2497_v51  ;;  %v2885_v26 = vmul.f32 -1.442695, %v2333_v20 }
 0x70f   : > { %v3578_v28 = vpop.eup %3577  ;;  %2591 = vst [vmem:[%s4325_s18 + $0x38] sm:$0xff] %v3576_v25  ;;  %3595 = vpow2.f32 %v2886_v14 }
 0x710   : > { %v3580_v30 = vpop.eup %3579  ;;  %2589 = vst [vmem:[%s4325_s18 + $0x28] sm:$0xff] %v3578_v28  ;;  %3597 = vpow2.f32 %v2884_v19  ;;  %v3258_v31 = vpop.f32.mrb[36].mxu0 }
 0x711   : > { %v3582_v4 = vpop.eup %3581  ;;  %v2502_v32 = vadd.f32 1.0, %v3580_v30  ;;  %3599 = vpow2.f32 %v2887_v58  ;;  %v2354_v33 = vadd.f32 %v3258_v31, %v4512_v27  ;;  %v2345_v37 = vpop.f32.mrb[37].mxu0 }
 0x712   : > { %v3584_v10 = vpop.eup %3583  ;;  %v2500_v38 = vadd.f32 1.0, %v3582_v4  ;;  %3601 = vpow2.f32 %v2885_v26  ;;  %v2346_v41 = vadd.f32 %v4512_v27, %v2345_v37  ;;  %v3259_v18 = vpop.f32.mrb[38].mxu0 }
 0x713   : > { %v3586_v42 = vpop.eup %3585  ;;  %3603 = vrcp.f32 %v2502_v32  ;;  %v2503_v43 = vadd.f32 1.0, %v3584_v10  ;;  %v2890_v44 = vmul.f32 -1.442695, %v2354_v33  ;;  %v2357_v21 = vadd.f32 %v3259_v18, %v4512_v27  ;;  %v2348_v45 = vpop.f32.mrb[39].mxu0 }
 0x714   : > { %3605 = vrcp.f32 %v2500_v38  ;;  %v2501_v46 = vadd.f32 1.0, %v3586_v42  ;;  %v2888_v29 = vmul.f32 -1.442695, %v2346_v41  ;;  %v2349_v47 = vadd.f32 %v4512_v27, %v2348_v45 }
 0x715   : > { %v3588_v48 = vpop.eup %3587  ;;  %3607 = vrcp.f32 %v2503_v43  ;;  %v2891_v50 = vmul.f32 -1.442695, %v2357_v21 }
 0x716   : > { %v3590_v52 = vpop.eup %3589  ;;  %2594 = vst [vmem:[%s4325_s18 + $0x50] sm:$0xff] %v3588_v48  ;;  %3609 = vrcp.f32 %v2501_v46  ;;  %v2889_v22 = vmul.f32 -1.442695, %v2349_v47 }
 0x717   : > { %v3592_v53 = vpop.eup %3591  ;;  %2592 = vst [vmem:[%s4325_s18 + $0x40] sm:$0xff] %v3590_v52  ;;  %3611 = vpow2.f32 %v2890_v44 }
 0x718   : > { %v3594_v39 = vpop.eup %3593  ;;  %2595 = vst [vmem:[%s4325_s18 + $0x58] sm:$0xff] %v3592_v53  ;;  %3613 = vpow2.f32 %v2888_v29  ;;  %v3262_v54 = vpop.f32.mrb[40].mxu0 }
 0x719   : > { %v3596_v49 = vpop.eup %3595  ;;  %2593 = vst [vmem:[%s4325_s18 + $0x48] sm:$0xff] %v3594_v39  ;;  %3615 = vpow2.f32 %v2891_v50  ;;  %v2370_v55 = vadd.f32 %v3262_v54, %v4512_v27  ;;  %v2361_v23 = vpop.f32.mrb[41].mxu0 }
 0x71a   : > { %v3598_v35 = vpop.eup %3597  ;;  %v2506_v56 = vadd.f32 1.0, %v3596_v49  ;;  %3617 = vpow2.f32 %v2889_v22  ;;  %v2362_v57 = vadd.f32 %v4512_v27, %v2361_v23  ;;  %v3263_v59 = vpop.f32.mrb[42].mxu0 }
 0x71b   : > { %v3600_v60 = vpop.eup %3599  ;;  %v2504_v61 = vadd.f32 1.0, %v3598_v35  ;;  %v2373_v34 = vadd.f32 %v3263_v59, %v4512_v27  ;;  %v2364_v62 = vpop.f32.mrb[43].mxu0  ;;  %v2894_v40 = vmul.f32 -1.442695, %v2370_v55 }
 0x71c   : > { %v3602_v63 = vpop.eup %3601  ;;  %3619 = vrcp.f32 %v2506_v56  ;;  %v2507_v0 = vadd.f32 1.0, %v3600_v60  ;;  %v2365_v1 = vadd.f32 %v4512_v27, %v2364_v62  ;;  %v2892_v5 = vmul.f32 -1.442695, %v2362_v57 }
 0x71d   : > { %v3604_v2 = vpop.eup %3603  ;;  %3621 = vrcp.f32 %v2504_v61  ;;  %v2505_v3 = vadd.f32 1.0, %v3602_v63  ;;  %v2895_v36 = vmul.f32 -1.442695, %v2373_v34 }
 0x71e   : > { %v3606_v6 = vpop.eup %3605  ;;  %2598 = vst [vmem:[%s4325_s18 + $0x70] sm:$0xff] %v3604_v2  ;;  %3623 = vrcp.f32 %v2507_v0  ;;  %v2893_v8 = vmul.f32 -1.442695, %v2365_v1 }
 0x71f   : > { %v3608_v7 = vpop.eup %3607  ;;  %2596 = vst [vmem:[%s4325_s18 + $0x60] sm:$0xff] %v3606_v6  ;;  %3625 = vrcp.f32 %v2505_v3 }
 0x720   : > { %v3610_v9 = vpop.eup %3609  ;;  %2599 = vst [vmem:[%s4325_s18 + $0x78] sm:$0xff] %v3608_v7  ;;  %3627 = vpow2.f32 %v2894_v40  ;;  %v3266_v11 = vpop.f32.mrb[44].mxu0 }
 0x721   : > { %v3612_v12 = vpop.eup %3611  ;;  %2597 = vst [vmem:[%s4325_s18 + $0x68] sm:$0xff] %v3610_v9  ;;  %3629 = vpow2.f32 %v2892_v5  ;;  %v2386_v13 = vadd.f32 %v3266_v11, %v4512_v27  ;;  %v2377_v14 = vpop.f32.mrb[45].mxu0 }
 0x722   : > { %v3614_v15 = vpop.eup %3613  ;;  %v2510_v16 = vadd.f32 1.0, %v3612_v12  ;;  %3631 = vpow2.f32 %v2895_v36  ;;  %v2378_v17 = vadd.f32 %v4512_v27, %v2377_v14  ;;  %v3267_v51 = vpop.f32.mrb[46].mxu0 }
 0x723   : > { %v3616_v19 = vpop.eup %3615  ;;  %v2508_v20 = vadd.f32 1.0, %v3614_v15  ;;  %3633 = vpow2.f32 %v2893_v8  ;;  %v2389_v24 = vadd.f32 %v3267_v51, %v4512_v27  ;;  %v2380_v58 = vpop.f32.mrb[47].mxu0  ;;  %v2898_v28 = vmul.f32 -1.442695, %v2386_v13 }
 0x724   : > { %v3618_v25 = vpop.eup %3617  ;;  %3635 = vrcp.f32 %v2510_v16  ;;  %v2511_v26 = vadd.f32 1.0, %v3616_v19  ;;  %v2381_v30 = vadd.f32 %v4512_v27, %v2380_v58  ;;  %v2896_v4 = vmul.f32 -1.442695, %v2378_v17 }
 0x725   : > { %3637 = vrcp.f32 %v2508_v20  ;;  %v2509_v31 = vadd.f32 1.0, %v3618_v25  ;;  %v2899_v33 = vmul.f32 -1.442695, %v2389_v24 }
 0x726   : > { %v3620_v32 = vpop.eup %3619  ;;  %3639 = vrcp.f32 %v2511_v26  ;;  %v2897_v10 = vmul.f32 -1.442695, %v2381_v30 }
 0x727   : > { %v3622_v37 = vpop.eup %3621  ;;  %2602 = vst [vmem:[%s4325_s18 + $0x90] sm:$0xff] %v3620_v32  ;;  %3641 = vrcp.f32 %v2509_v31 }
 0x728   : > { %v3624_v38 = vpop.eup %3623  ;;  %2600 = vst [vmem:[%s4325_s18 + $0x80] sm:$0xff] %v3622_v37  ;;  %3643 = vpow2.f32 %v2898_v28 }
 0x729   : > { %v3626_v41 = vpop.eup %3625  ;;  %2603 = vst [vmem:[%s4325_s18 + $0x98] sm:$0xff] %v3624_v38  ;;  %3645 = vpow2.f32 %v2896_v4 }
 0x72a   : > { %v3628_v18 = vpop.eup %3627  ;;  %2601 = vst [vmem:[%s4325_s18 + $0x88] sm:$0xff] %v3626_v41  ;;  %3647 = vpow2.f32 %v2899_v33 }
 0x72b   : > { %v3630_v27 = vpop.eup %3629  ;;  %v2514_v42 = vadd.f32 1.0, %v3628_v18  ;;  %3649 = vpow2.f32 %v2897_v10 }
 0x72c   : > { %v3632_v43 = vpop.eup %3631  ;;  %v2512_v44 = vadd.f32 1.0, %v3630_v27 }
 0x72d   : > { %v3634_v21 = vpop.eup %3633  ;;  %3651 = vrcp.f32 %v2514_v42  ;;  %v2515_v45 = vadd.f32 1.0, %v3632_v43 }
 0x72e   : > { %v3636_v46 = vpop.eup %3635  ;;  %3653 = vrcp.f32 %v2512_v44  ;;  %v2513_v29 = vadd.f32 1.0, %v3634_v21 }
 0x72f   : > { %v3638_v47 = vpop.eup %3637  ;;  %2606 = vst [vmem:[%s4325_s18 + $0xb0] sm:$0xff] %v3636_v46  ;;  %3655 = vrcp.f32 %v2515_v45 }
 0x730   : > { %v3640_v48 = vpop.eup %3639  ;;  %2604 = vst [vmem:[%s4325_s18 + $0xa0] sm:$0xff] %v3638_v47  ;;  %3657 = vrcp.f32 %v2513_v29 }
 0x731   : > { %v3642_v50 = vpop.eup %3641  ;;  %2607 = vst [vmem:[%s4325_s18 + $0xb8] sm:$0xff] %v3640_v48 }
 0x732   : > { %v3644_v52 = vpop.eup %3643  ;;  %2605 = vst [vmem:[%s4325_s18 + $0xa8] sm:$0xff] %v3642_v50 }
 0x733   : > { %v3646_v22 = vpop.eup %3645  ;;  %v2518_v53 = vadd.f32 1.0, %v3644_v52 }
 0x734   : > { %v3648_v39 = vpop.eup %3647  ;;  %v2516_v54 = vadd.f32 1.0, %v3646_v22 }
 0x735   : > { %v3650_v49 = vpop.eup %3649  ;;  %3659 = vrcp.f32 %v2518_v53  ;;  %v2519_v55 = vadd.f32 1.0, %v3648_v39 }
 0x736   : > { %3661 = vrcp.f32 %v2516_v54  ;;  %v2517_v23 = vadd.f32 1.0, %v3650_v49 }
 0x737   : > { %v3652_v35 = vpop.eup %3651  ;;  %3663 = vrcp.f32 %v2519_v55 }
 0x738   : > { %v3654_v56 = vpop.eup %3653  ;;  %2610 = vst [vmem:[%s4325_s18 + $0xd0] sm:$0xff] %v3652_v35  ;;  %3665 = vrcp.f32 %v2517_v23 }
 0x739   : > { %v3656_v57 = vpop.eup %3655  ;;  %2608 = vst [vmem:[%s4325_s18 + $0xc0] sm:$0xff] %v3654_v56 }
 0x73a   : > { %v3658_v59 = vpop.eup %3657  ;;  %2611 = vst [vmem:[%s4325_s18 + $0xd8] sm:$0xff] %v3656_v57 }
 0x73b   : > { %2609 = vst [vmem:[%s4325_s18 + $0xc8] sm:$0xff] %v3658_v59 }
 0x73f   : > { %v3660_v60 = vpop.eup %3659 }
 0x740   : > { %v3662_v61 = vpop.eup %3661  ;;  %2614 = vst [vmem:[%s4325_s18 + $0xf0] sm:$0xff] %v3660_v60 }
 0x741   : > { %v3664_v34 = vpop.eup %3663  ;;  %2612 = vst [vmem:[%s4325_s18 + $0xe0] sm:$0xff] %v3662_v61 }
 0x742   : > { %v3666_v62 = vpop.eup %3665  ;;  %2615 = vst [vmem:[%s4325_s18 + $0xf8] sm:$0xff] %v3664_v34 }
 0x743   : > { %2613 = vst [vmem:[%s4325_s18 + $0xe8] sm:$0xff] %v3666_v62 }
 0x744 PF: > { %s2907_s30 = sshll.u32 %s4725_s13, 12  ;;  %s4713_s1 = sld [smem:[#allocation35_spill]] }
 0x745   : > { %s2633_s9 = sshll.u32 %s4325_s18, 4  ;;  %s4589_s2 = scalar_lea.sflag [#allocation7], %s541_s12  ;;  %s4585_s9 = int_to_ptr.vmem [resolvable:$true] %s2633_s9 }
 0x746   : > { %s3865_s16 = scalar_lea.vmem %s4585_s9, 4096  ;;  %p4714_p10 = scmp.ne.s32.totalorder %s4684_s19, 0 }
 0x747   : > { %p3866_p1 = scmp.ne.s32.totalorder %s4585_s9, %s3865_s16  ;;  %s3959_s13 = smov [#allocation17]  }
 0x748   : > { %s3869_s14 = sshll.u32 %s3959_s13, 4  ;;  %s3870_s14 = int_to_ptr.vmem [resolvable:$false] %s3869_s14 }
 0x749   : > { %p3867_p3 = pnand %p3866_p1, %p4714_p10  ;;  %s3871_s3 = scalar_lea.vmem %s3870_s14, 8192 }
 0x74a   : > { %s4582_s8 = scalar_lea.hbm %s4713_s1, %s2907_s30  ;;  %p3872_p4 = scmp.lt.s32.totalorder %s4585_s9, %s3870_s14 }
 0x74b   : > { %p3868_p11 = pneg %p3867_p3  ;;  %p3873_p13 = scmp.lt.s32.totalorder %s3871_s3, %s3865_s16 }
 0x74d   : > { %p3874_p9 = por %p3873_p13, %p3872_p4 }
 0x74f   : > { %p3875_p12 = pnand %p3874_p9, %p3868_p11 }
 0x751   : > { %3878 = shalt.err (!%p3875_p12)
}
 0x752   : > { %s3879_s12 = scalar_lea.hbm %s4582_s8, 4096  ;;  %s3883_s10 = scalar_lea.hbm %s4713_s1, 4096 }
 0x753   : > { %p3880_p0 = scmp.ne.s32.totalorder %s4582_s8, %s3879_s12  ;;  %p3884_p8 = scmp.lt.u32.totalorder %s4582_s8, %s4713_s1 }
 0x754   : > { %p3885_p7 = scmp.lt.u32.totalorder %s3883_s10, %s3879_s12  ;;  %p3887_p1 = scmp.lt.u32.totalorder %s3879_s12, %s4582_s8 }
 0x755   : > { %p3881_p2 = pnand %p3880_p0, %p4714_p10 }
 0x756   : > { %p3886_p5 = por %p3885_p7, %p3884_p8 }
 0x757   : > { %p3882_p6 = pneg %p3881_p2 }
 0x758   : > { %p3888_p3 = por %p3887_p1, %p3886_p5 }
 0x75a   : > { %p3889_p11 = pnand %p3888_p3, %p3882_p6 }
 0x75c   : > { %3892 = shalt.err (!%p3889_p11)
}
 0x75d   : > { %s3960_s7 = smov 128   ;;  %s3961_s20 = smov 8  }
 0x75e   : > { %3358 = dma.vmem_to_hbm [thread:$0]  (%p4714_p10), %s4585_s9, 4096, %s4582_s8, %s4589_s2, %s3960_s7, %s3960_s7, %s3961_s20  }
 0x75f PF: > { %s2648_s23 = sand.u32 1, %s3935_s25   ;;  %p4715_p4 = scmp.ge.s32.totalorder %s3947_s28, 2 }
 0x760   : > { %p4716_p13 = scmp.ne.s32.totalorder %s4685_s21, 0  ;;  %s2649_s15 = scalar_lea.sflag [#allocation7], %s2648_s23 }
 0x762   : > { %p3383_p9 = pnand %p4716_p13, %p4715_p4 }
 0x764   : > { %3930 = dma.done.wait (!%p3383_p9), %s2649_s15, 4096  }
 0x765   : > { %3932 = vsyncadd (!%p3383_p9), %s2649_s15, 4294963200  ;;  %s4717_s30 = sld [smem:[#allocation24_spill]]  ;;  %p27_p12 = scmp.ge.s32.totalorder %s4190_s5, 5  }
 0x766   : > { %s4718_s25 = smov %s3939_s26  ;;  %s4719_s26 = smov %s3943_s27 }
 0x767   : > { %s4721_s28 = smov %s4190_s5  ;;  %29 = sbr.rel (!%p27_p12) target bundleno = 19 (0x13), region = 158 }
 0x76b   : > { %s4720_s27 = smov %s4717_s30 }
 0x76e   :  { %2654 = vsyncpa [#allocation6], 1 }
 0x76f   :  { %2656 = vsyncpa [#allocation6 + $0x1], 1 }
 0x770   :  { %2657 = vsyncpa [#allocation9], 1 }
 0x771   :  { %2658 = vsyncpa [#allocation12], 1 }
 0x772   :  { %2659 = vsyncpa [#allocation15], 1 }
 0x773   :  { %2660 = vsyncpa [#allocation7], 1 }
 0x774   :  { %2662 = vsyncpa [#allocation7 + $0x1], 1 }

// kernel: tpu_custom_call.1
= control target key start
LH: loop header
LB: loop body
LE: loop exit
PB: predicated region body
PF: predicated region fallthrough
CT: control target
= control target key end

     0   :  { %s4697_s0 = inlined_call_operand.hbm [shape: bf16[128,128], index: 0, kind: input, shape index: {}]   ;;  %s4698_s1 = inlined_call_operand.hbm [shape: bf16[128,128], index: 1, kind: input, shape index: {}]   ;;  %s4699_s2 = inlined_call_operand.hbm [shape: bf16[256,128], index: 2, kind: input, shape index: {}]   ;;  %s4700_s3 = inlined_call_operand.hbm [shape: bf16[128,128], index: 3, kind: input, shape index: {}]   ;;  %s4701_s4 = inlined_call_operand.vmem [shape: f32[1,128], index: 4, kind: input, shape index: {}]   ;;  %s4702_s5 = inlined_call_operand.vmem [shape: f32[1,128], index: 5, kind: input, shape index: {}]   ;;  %s4703_s6 = inlined_call_operand.hbm [shape: bf16[128,128], index: 6, kind: input, shape index: {}]   ;;  %s4704_s7 = inlined_call_operand.vmem [shape: f32[1,128], index: 7, kind: input, shape index: {}]   ;;  %s4705_s8 = inlined_call_operand.vmem [shape: f32[1,128], index: 8, kind: input, shape index: {}]   ;;  %s4706_s9 = inlined_call_operand.hbm [shape: bf16[128,128], index: 9, kind: input, shape index: {}]   ;;  %s4707_s10 = inlined_call_operand.vmem [shape: f32[1,128], index: 10, kind: input, shape index: {}]   ;;  %s4708_s11 = inlined_call_operand.hbm [shape: bf16[128,128], index: 11, kind: input, shape index: {}]   ;;  %s4709_s12 = inlined_call_operand.vmem [shape: f32[1,128], index: 12, kind: input, shape index: {}]   ;;  %s4710_s13 = inlined_call_operand.hbm [shape: f32[256,128], index: 13, kind: output, shape index: {}]  }
   0x1   :  { %4718 = sst [smem:[#allocation25_spill]] %s4697_s0 }
   0x2   :  { %4719 = sst [smem:[#allocation26_spill]] %s4698_s1 }
   0x3   :  { %4720 = sst [smem:[#allocation27_spill]] %s4704_s7 }
   0x4   :  { %4721 = sst [smem:[#allocation28_spill]] %s4705_s8 }
   0x5   :  { %4722 = sst [smem:[#allocation29_spill]] %s4707_s10 }
   0x6   :  { %4723 = sst [smem:[#allocation30_spill]] %s4709_s12 }
   0x7   :  { %4724 = sst [smem:[#allocation31_spill]] %s4710_s13 }
   0x8   :  { %18 = vsyncpa [#allocation6], 0 }
   0x9   :  { %19 = vsyncpa [#allocation9], 0 }
   0xa   :  { %20 = vsyncpa [#allocation13], 0 }
   0xb   :  { %21 = vsyncpa [#allocation16], 0 }
   0xc   :  { %22 = vsyncpa [#allocation7], 0 }
   0xd   :  { %24 = vsyncpa [#allocation7 + $0x1], 0  ;;  %s4064_s25 = smov 0   ;;  %s4066_s26 = smov 0  }
   0xe   :  { %s4068_s27 = smov 0   ;;  %s4070_s28 = smov 0  }
   0xf LB: > { %s3981_s29 = smov [#allocation5]   ;;  %s4085_s14 = sadd.s32 4294967295, %s3979_s28   ;;  %s3979_s28 = sphi %s4070_s28, %s4763_s28   ;;  %s3975_s27 = sphi %s4068_s27, %s4762_s27   ;;  %s3971_s26 = sphi %s4066_s26, %s4761_s26   ;;  %s3967_s25 = sphi %s4064_s25, %s4760_s25  }
  0x10   : > { %s363_s30 = sshll.u32 %s3981_s29, 4  ;;  %p2783_p0 = scmp.ge.s32.totalorder %s3979_s28, 1  ;;  %s4091_s30 = int_to_ptr.vmem [resolvable:$true] %s363_s30 }
  0x11   : > { %p4712_p1 = scmp.eq.s32.totalorder %s4085_s14, 0  ;;  %p351_p2 = scmp.lt.s32.totalorder %s3979_s28, 4 }
  0x12   : > { %s3982_s16 = smov [#allocation8]   ;;  %s3983_s19 = smov [#allocation12]  }
  0x13   : > { %p4093_p4 = pnand %p2783_p0, %p351_p2  ;;  %s376_s17 = sshll.u32 %s3982_s16, 4  ;;  %s4105_s17 = int_to_ptr.vmem [resolvable:$true] %s376_s17 }
  0x14   : > { %s408_s20 = sshll.u32 %s3983_s19, 4  ;;  %s4727_s0 = sld [smem:[#allocation25_spill]]  ;;  %s4107_s20 = int_to_ptr.vmem [resolvable:$true] %s408_s20 }
  0x15   : > { %s4725_s15 = scalar_select %p4093_p4, 1, 0 }
  0x16   : > { %p3387_p5 = pneg %p4093_p4 }
  0x18   : > { %p4101_p6 = pnand %p3387_p5, %p4712_p1 }
  0x1a   : > { %s3695_s23 = scalar_lea.hbm %s4727_s0, 1024  ;;  %p4117_p8 = pneg %p4101_p6 }
  0x1b   : > { %p3696_p7 = scmp.ne.s32.totalorder %s4727_s0, %s3695_s23  ;;  %p3702_p11 = scmp.lt.u32.totalorder %s3695_s23, %s4727_s0 }
  0x1d   : > { %p3698_p9 = pnand %p4117_p8, %p3696_p7 }
  0x1f   : > { %p3699_p10 = pneg %p3698_p9 }
  0x21   : > { %p3704_p12 = pnand %p3702_p11, %p3699_p10 }
  0x23   : > { %3707 = shalt.err (!%p3704_p12)
}
  0x24   : > { %s3708_s21 = scalar_lea.vmem %s4091_s30, 1024  ;;  %p3716_p5 = scmp.lt.s32.totalorder %s4091_s30, %s4091_s30 }
  0x25   : > { %p3709_p13 = scmp.ne.s32.totalorder %s4091_s30, %s3708_s21  ;;  %p3717_p3 = scmp.lt.s32.totalorder %s3708_s21, %s3708_s21 }
  0x27   : > { %p3711_p0 = pnand %p3709_p13, %p4117_p8  ;;  %p3718_p7 = por %p3717_p3, %p3716_p5 }
  0x29   : > { %p3712_p2 = pneg %p3711_p0 }
  0x2b   : > { %p3719_p9 = pnand %p3718_p7, %p3712_p2 }
  0x2d   : > { %3722 = shalt.err (!%p3719_p9)
}
  0x2e   : > { %s4714_s22 = smov 64   ;;  %s4715_s13 = smov 4  }
  0x2f   : > { %3390 = dma.hbm_to_vmem [thread:$0]  (!%p4101_p6), %s4727_s0, 1024, %s4091_s30, [#allocation6], %s4714_s22, %s4714_s22, %s4715_s13  }
  0x30   : > { %s4729_s1 = sld [smem:[#allocation26_spill]] }
  0x36   : > { %s3723_s21 = scalar_lea.hbm %s4729_s1, 1024 }
  0x37   : > { %p3724_p3 = scmp.ne.s32.totalorder %s4729_s1, %s3723_s21  ;;  %p3730_p12 = scmp.lt.u32.totalorder %s3723_s21, %s4729_s1 }
  0x39   : > { %p3726_p10 = pnand %p3724_p3, %p4117_p8 }
  0x3b   : > { %p3727_p11 = pneg %p3726_p10 }
  0x3d   : > { %p3732_p13 = pnand %p3730_p12, %p3727_p11 }
  0x3f   : > { %3735 = shalt.err (!%p3732_p13)
}
  0x40   : > { %s3736_s30 = scalar_lea.vmem %s4105_s17, 1024  ;;  %p3744_p7 = scmp.lt.s32.totalorder %s4105_s17, %s4105_s17 }
  0x41   : > { %p3737_p0 = scmp.ne.s32.totalorder %s4105_s17, %s3736_s30  ;;  %p3745_p9 = scmp.lt.s32.totalorder %s3736_s30, %s3736_s30 }
  0x43   : > { %p3739_p2 = pnand %p3737_p0, %p4117_p8  ;;  %p3746_p3 = por %p3745_p9, %p3744_p7 }
  0x45   : > { %p3740_p5 = pneg %p3739_p2 }
  0x47   : > { %p3747_p10 = pnand %p3746_p3, %p3740_p5 }
  0x49   : > { %3750 = shalt.err (!%p3747_p10)
}
  0x4a   : > { %3393 = dma.hbm_to_vmem [thread:$0]  (!%p4101_p6), %s4729_s1, 1024, %s4105_s17, [#allocation9], %s4714_s22, %s4714_s22, %s4715_s13  }
  0x4b   : > { %s3751_s23 = scalar_lea.hbm %s4703_s6, 1024 }
  0x4c   : > { %p3752_p11 = scmp.ne.s32.totalorder %s4703_s6, %s3751_s23  ;;  %p3758_p0 = scmp.lt.u32.totalorder %s3751_s23, %s4703_s6 }
  0x4e   : > { %p3754_p12 = pnand %p3752_p11, %p4117_p8 }
  0x50   : > { %p3755_p13 = pneg %p3754_p12 }
  0x52   : > { %p3760_p2 = pnand %p3758_p0, %p3755_p13 }
  0x54   : > { %3763 = shalt.err (!%p3760_p2)
}
  0x55   : > { %s3764_s17 = scalar_lea.vmem %s4107_s20, 1024  ;;  %p3772_p3 = scmp.lt.s32.totalorder %s4107_s20, %s4107_s20 }
  0x56   : > { %p3765_p5 = scmp.ne.s32.totalorder %s4107_s20, %s3764_s17  ;;  %p3773_p10 = scmp.lt.s32.totalorder %s3764_s17, %s3764_s17 }
  0x58   : > { %p3767_p7 = pnand %p3765_p5, %p4117_p8  ;;  %p3774_p11 = por %p3773_p10, %p3772_p3 }
  0x5a   : > { %p3768_p9 = pneg %p3767_p7 }
  0x5c   : > { %p3775_p12 = pnand %p3774_p11, %p3768_p9 }
  0x5e   : > { %3778 = shalt.err (!%p3775_p12)
}
  0x5f   : > { %3399 = dma.hbm_to_vmem [thread:$0]  (!%p4101_p6), %s4703_s6, 1024, %s4107_s20, [#allocation13], %s4714_s22, %s4714_s22, %s4715_s13  }
  0x60   : > { %s3986_s8 = smov [#allocation11]   ;;  %s3987_s12 = smov [#allocation14]  }
  0x61   : > { %s389_s10 = sshll.u32 %s3986_s8, 4  ;;  %s427_s23 = sshll.u32 %s3987_s12, 4  ;;  %s390_s10 = int_to_ptr.vmem [resolvable:$true] %s389_s10  ;;  %s428_s23 = int_to_ptr.vmem [resolvable:$true] %s427_s23 }
  0x62   : > { %s3779_s19 = scalar_lea.hbm %s4700_s3, 1024 }
  0x63   : > { %p3780_p13 = scmp.ne.s32.totalorder %s4700_s3, %s3779_s19  ;;  %p3786_p5 = scmp.lt.u32.totalorder %s3779_s19, %s4700_s3 }
  0x65   : > { %p3782_p0 = pnand %p3780_p13, %p4117_p8 }
  0x67   : > { %p3783_p2 = pneg %p3782_p0 }
  0x69   : > { %p3788_p7 = pnand %p3786_p5, %p3783_p2 }
  0x6b   : > { %3791 = shalt.err (!%p3788_p7)
}
  0x6c   : > { %s3792_s20 = scalar_lea.vmem %s390_s10, 1024  ;;  %p3800_p11 = scmp.lt.s32.totalorder %s390_s10, %s390_s10 }
  0x6d   : > { %p3793_p9 = scmp.ne.s32.totalorder %s390_s10, %s3792_s20  ;;  %p3801_p12 = scmp.lt.s32.totalorder %s3792_s20, %s3792_s20 }
  0x6f   : > { %p3795_p3 = pnand %p3793_p9, %p4117_p8  ;;  %p3802_p1 = por %p3801_p12, %p3800_p11 }
  0x71   : > { %p3796_p10 = pneg %p3795_p3 }
  0x73   : > { %p3803_p4 = pnand %p3802_p1, %p3796_p10 }
  0x75   : > { %3806 = shalt.err (!%p3803_p4)
}
  0x76   : > { %3396 = dma.hbm_to_vmem [thread:$0]  (!%p4101_p6), %s4700_s3, 1024, %s390_s10, [#allocation9], %s4714_s22, %s4714_s22, %s4715_s13  }
  0x77   : > { %s3807_s24 = scalar_lea.hbm %s4706_s9, 1024 }
  0x78   : > { %p3808_p1 = scmp.ne.s32.totalorder %s4706_s9, %s3807_s24  ;;  %p3814_p0 = scmp.lt.u32.totalorder %s3807_s24, %s4706_s9 }
  0x7a   : > { %p3810_p4 = pnand %p3808_p1, %p4117_p8 }
  0x7c   : > { %p3811_p13 = pneg %p3810_p4 }
  0x7e   : > { %p3816_p2 = pnand %p3814_p0, %p3811_p13 }
  0x80   : > { %3819 = shalt.err (!%p3816_p2)
}
  0x81   : > { %s3820_s30 = scalar_lea.vmem %s428_s23, 1024  ;;  %p3828_p3 = scmp.lt.s32.totalorder %s428_s23, %s428_s23 }
  0x82   : > { %p3821_p5 = scmp.ne.s32.totalorder %s428_s23, %s3820_s30  ;;  %p3829_p10 = scmp.lt.s32.totalorder %s3820_s30, %s3820_s30 }
  0x84   : > { %p3823_p7 = pnand %p3821_p5, %p4117_p8  ;;  %p3830_p11 = por %p3829_p10, %p3828_p3 }
  0x86   : > { %p3824_p9 = pneg %p3823_p7 }
  0x88   : > { %p3831_p12 = pnand %p3830_p11, %p3824_p9 }
  0x8a   : > { %3834 = shalt.err (!%p3831_p12)
}
  0x8b   : > { %3402 = dma.hbm_to_vmem [thread:$0]  (!%p4101_p6), %s4706_s9, 1024, %s428_s23, [#allocation13], %s4714_s22, %s4714_s22, %s4715_s13  }
  0x8c   : > { %s3988_s0 = smov [#allocation15]   ;;  %s3835_s24 = scalar_lea.hbm %s4708_s11, 1024 }
  0x8d   : > { %s443_s7 = sshll.u32 %s3988_s0, 4  ;;  %p3836_p1 = scmp.ne.s32.totalorder %s4708_s11, %s3835_s24  ;;  %s444_s7 = int_to_ptr.vmem [resolvable:$true] %s443_s7 }
  0x8e   : > { %p3842_p0 = scmp.lt.u32.totalorder %s3835_s24, %s4708_s11 }
  0x8f   : > { %p3838_p4 = pnand %p3836_p1, %p4117_p8 }
  0x91   : > { %p3839_p13 = pneg %p3838_p4 }
  0x93   : > { %p3844_p2 = pnand %p3842_p0, %p3839_p13 }
  0x95   : > { %3847 = shalt.err (!%p3844_p2)
}
  0x96   : > { %s3848_s23 = scalar_lea.vmem %s444_s7, 1024  ;;  %p3856_p3 = scmp.lt.s32.totalorder %s444_s7, %s444_s7 }
  0x97   : > { %p3849_p5 = scmp.ne.s32.totalorder %s444_s7, %s3848_s23  ;;  %p3857_p10 = scmp.lt.s32.totalorder %s3848_s23, %s3848_s23 }
  0x99   : > { %p3851_p7 = pnand %p3849_p5, %p4117_p8  ;;  %p3858_p11 = por %p3857_p10, %p3856_p3 }
  0x9b   : > { %p3852_p9 = pneg %p3851_p7 }
  0x9d   : > { %p3859_p12 = pnand %p3858_p11, %p3852_p9 }
  0x9f   : > { %3862 = shalt.err (!%p3859_p12)
}
  0xa0   : > { %3405 = dma.hbm_to_vmem [thread:$0]  (!%p4101_p6), %s4708_s11, 1024, %s444_s7, [#allocation16], %s4714_s22, %s4714_s22, %s4715_s13  }
  0xa1   : > { %s2778_s18 = sadd.s32 4294967294, %s3979_s28   ;;  %s4258_s16 = sadd.s32 1, %s3979_s28  }
  0xa2   : > { %p4716_p8 = scmp.ge.s32.totalorder %s3979_s28, 2  ;;  %p79_p1 = scmp.ge.s32.totalorder %s4258_s16, 2 }
  0xa3   : > { %s2780_s20 = sadd.s32 4294967294, %s4258_s16  ;;  %s85_s0 = sadd.s32 1, %s3975_s27 }
  0xa4   : > { %s78_s8 = scalar_select %p4716_p8, %s2778_s18, 0 }
  0xa5   : > { %s4765_s20 = smov (!%p79_p1, %s2780_s20), 0  ;;  %p92_p4 = scmp.ne.s32.totalorder %s3975_s27, %s3971_s26 }
  0xa6   : > { %p93_p13 = scmp.eq.s32.totalorder %s3979_s28, 0  ;;  %s82_s7 = ssub.s32 %s78_s8, %s4765_s20 }
  0xa7   : > { %p98_p6 = scmp.ne.s32.totalorder %s3971_s26, %s3967_s25  ;;  %p83_p0 = scmp.eq.s32.totalorder %s82_s7, 0 }
  0xa8   : > { %p4271_p2 = por %p93_p13, %p92_p4  ;;  %p4731_p5 = scmp.eq.s32.totalorder %s4085_s14, 0 }
  0xa9   : > { %p338_p9 = scmp.eq.s32.totalorder %s4085_s14, 2  ;;  %p344_p10 = scmp.eq.s32.totalorder %s2778_s18, 2 }
  0xaa   : > { %p4277_p7 = por %p4731_p5, %p98_p6  ;;  %p3420_p11 = scmp.lt.s32.totalorder %s3979_s28, 3 }
  0xab   : > { %s4283_s29 = scalar_select %p83_p0, %s3975_s27, %s85_s0  }
  0xac   : > { %p4285_p3 = por %p338_p9, %p92_p4  ;;  %s460_s21 = sand.u32 1, %s3979_s28  }
  0xad   : > { %p4291_p12 = por %p344_p10, %p98_p6  ;;  %s462_s23 = sand.u32 1, %s3975_s27  }
  0xae   : > { %s4733_s19 = scalar_select %p4285_p3, 1, 0 }
  0xaf   : > { %s4734_s17 = scalar_select %p4291_p12, 1, 0 }
  0xb0   : > { %s2933_s30 = sshll.u32 %s78_s8, 11  ;;  %s2791_s10 = sshll.u32 %s462_s23, 7 }
  0xb1   : > { %s4299_s22 = scalar_lea.hbm %s4699_s2, %s2933_s30  ;;  %p4303_p1 = pnand %p3420_p11, %p4271_p2 }
  0xb2   : > { %s464_s0 = scalar_lea.vmem [#allocation10], %s2791_s10  ;;  %s4309_s8 = scalar_lea.sflag [#allocation6], %s460_s21 }
  0xb3   : > { %s474_s13 = sshll.u32 %s464_s0, 4  ;;  %s3863_s23 = scalar_lea.hbm %s4299_s22, 2048  ;;  %s4307_s13 = int_to_ptr.vmem [resolvable:$true] %s474_s13 }
  0xb4   : > { %p3864_p4 = scmp.ne.s32.totalorder %s4299_s22, %s3863_s23  ;;  %p3865_p13 = pneg %p4303_p1 }
  0xb5   : > { %s3868_s20 = scalar_lea.hbm %s4699_s2, 2048  ;;  %p3869_p2 = scmp.lt.u32.totalorder %s4299_s22, %s4699_s2 }
  0xb6   : > { %p3866_p6 = pnand %p3865_p13, %p3864_p4  ;;  %p3870_p5 = scmp.lt.u32.totalorder %s3868_s20, %s3863_s23 }
  0xb7   : > { %p3872_p10 = scmp.lt.u32.totalorder %s3863_s23, %s4299_s22 }
  0xb8   : > { %p3867_p0 = pneg %p3866_p6  ;;  %p3871_p9 = por %p3870_p5, %p3869_p2 }
  0xba   : > { %p3873_p11 = por %p3872_p10, %p3871_p9 }
  0xbc   : > { %p3874_p8 = pnand %p3873_p11, %p3867_p0 }
  0xbe   : > { %3877 = shalt.err (!%p3874_p8)
}
  0xbf   : > { %s3878_s21 = scalar_lea.vmem %s4307_s13, 2048  ;;  %s3989_s10 = smov [#allocation10]  }
  0xc0   : > { %p3879_p4 = scmp.ne.s32.totalorder %s4307_s13, %s3878_s21  ;;  %s3883_s0 = sshll.u32 %s3989_s10, 4  ;;  %s3884_s0 = int_to_ptr.vmem [resolvable:$false] %s3883_s0 }
  0xc1   : > { %s3885_s1 = scalar_lea.vmem %s3884_s0, 4096  ;;  %p3886_p3 = scmp.lt.s32.totalorder %s4307_s13, %s3884_s0 }
  0xc2   : > { %p3881_p6 = pnand %p3879_p4, %p3865_p13  ;;  %p3887_p2 = scmp.lt.s32.totalorder %s3885_s1, %s3878_s21 }
  0xc4   : > { %p3882_p12 = pneg %p3881_p6  ;;  %p3888_p5 = por %p3887_p2, %p3886_p3 }
  0xc6   : > { %p3889_p9 = pnand %p3888_p5, %p3882_p12 }
  0xc8   : > { %3892 = shalt.err (!%p3889_p9)
}
  0xc9   : > { %s4736_s23 = smov 4   ;;  %s4737_s12 = smov 64  }
  0xca   : > { %3409 = dma.hbm_to_vmem [thread:$0]  (!%p4303_p1), %s4299_s22, 2048, %s4307_s13, %s4309_s8, %s4737_s12, %s4737_s12, %s4736_s23  }
  0xcb   : > { %p4738_p8 = scmp.ne.s32.totalorder %s4725_s15, 0 }
  0xcc   : > { %p4739_p13 = scmp.eq.s32.totalorder (!%p4738_p8), %s4085_s14, 0 }
  0xcd   : > { %486 = sbr.rel (%p4738_p8) target bundleno = 1870 (0x74e), region = 72 }
  0xd4   : > { %3938 = dma.done.wait (%p4739_p13), [#allocation6], 1024   ;;  %p4740_p0 = pmov %p4739_p13 }
  0xd6   : > { %3940 = vsyncadd (%p4740_p0), [#allocation6], 4294966272  ;;  %p4741_p3 = pmov %p4740_p0 }
  0xd7   : > { %p4742_p12 = pmov %p4740_p0 }
  0xd8   : > { %3942 = dma.done.wait (%p4741_p3), [#allocation9], 1024  }
  0xd9   : > { %3944 = vsyncadd (%p4742_p12), [#allocation9], 4294966272  ;;  %s496_s18 = sand.u32 1, %s4085_s14   ;;  %s4352_s22 = sand.u32 1, %s3971_s26  }
  0xda   : > { %s2798_s15 = sshll.u32 %s4352_s22, 7  ;;  %s497_s13 = scalar_lea.sflag [#allocation6], %s496_s18 }
  0xdb   : > { %s4355_s8 = scalar_lea.vmem [#allocation10], %s2798_s15 }
  0xdc   : > { %3946 = dma.done.wait (%p4277_p7), %s497_s13, 2048  }
  0xdd   : > { %3948 = vsyncadd (%p4277_p7), %s497_s13, 4294965248  ;;  %p4743_p1 = pmov %p4740_p0 }
  0xde   : > { %p4744_p10 = pmov %p4740_p0 }
  0xdf   : > { %3950 = dma.done.wait (%p4743_p1), [#allocation9], 1024  }
  0xe0   : > { %3952 = vsyncadd (%p4744_p10), [#allocation9], 4294966272  ;;  %p4745_p11 = pmov %p4740_p0 }
  0xe1   : > { %p4746_p4 = pmov %p4740_p0 }
  0xe2   : > { %3954 = dma.done.wait (%p4745_p11), [#allocation13], 2048  }
  0xe3   : > { %3956 = vsyncadd (%p4746_p4), [#allocation13], 4294965248  ;;  %p4747_p6 = pmov %p4740_p0 }
  0xe4   : > { %p4748_p2 = pmov %p4740_p0 }
  0xe5   : > { %3958 = dma.done.wait (%p4747_p6), [#allocation16], 1024  }
  0xe6   : > { %3960 = vsyncadd (%p4748_p2), [#allocation16], 4294966272  ;;  %s2803_s24 = sshll.u32 %s4352_s22, 8  ;;  %p4749_p7 = scmp.ne.s32.totalorder %s4085_s14, 0 }
  0xe7   : > { %s4374_s30 = scalar_lea.vmem [#allocation17], %s2803_s24  ;;  %v3471_v0 = vld [vmem:[#allocation11] sm:$0xff] (!%p4749_p7)   ;;  %v3472_v1 = vld [vmem:[#allocation11 + $0x8] sm:$0xff] (!%p4749_p7)   ;;  %v3473_v2 = vld [vmem:[#allocation11 + $0x10] sm:$0xff] (!%p4749_p7)  }
  0xe8   : > { %572 = sbr.rel (%p4749_p7) target bundleno = 492 (0x1ec), region = 104  ;;  %3055 = vmatprep.subr.bf16.mxu0 (!%p4749_p7), %v3471_v0  ;;  %3295 = vmatprep.subr.bf16.mxu1 (!%p4749_p7), %v3471_v0  ;;  %v3474_v3 = vld [vmem:[#allocation11 + $0x18] sm:$0xff] (!%p4749_p7)   ;;  %v3479_v4 = vld [vmem:[#allocation5] sm:$0xff] (!%p4749_p7)   ;;  %v3476_v7 = vld [vmem:[#allocation11 + $0x28] sm:$0xff] (!%p4749_p7)  }
  0xe9   : > { %3056 = vmatpush3.bf16.msra.mxu0 (!%p4749_p7), %v3471_v0  ;;  %3303 = vmatpush3.bf16.msra.mxu1 (!%p4749_p7), %v3471_v0  ;;  %v3480_v5 = vld [vmem:[#allocation5 + $0x20] sm:$0xff] (!%p4749_p7)   ;;  %v3477_v8 = vld [vmem:[#allocation11 + $0x30] sm:$0xff] (!%p4749_p7)   ;;  %v3478_v9 = vld [vmem:[#allocation11 + $0x38] sm:$0xff] (!%p4749_p7)  }
  0xea   : > { %3057 = vmatprep.subr.bf16.mxu0 (!%p4749_p7), %v3472_v1  ;;  %3296 = vmatprep.subr.bf16.mxu1 (!%p4749_p7), %v3472_v1  ;;  %v3475_v6 = vld [vmem:[#allocation11 + $0x20] sm:$0xff] (!%p4749_p7)   ;;  %v3481_v10 = vld [vmem:[#allocation5 + $0x8] sm:$0xff] (!%p4749_p7)   ;;  %v3483_v12 = vld [vmem:[#allocation5 + $0x10] sm:$0xff] (!%p4749_p7)  }
  0xeb   : > { %3071 = vmatprep.mubr.bf16.mxu0 (!%p4749_p7), %v3479_v4  ;;  %3079 = vmatprep.mubr.bf16.mxu1 (!%p4749_p7), %v3480_v5  ;;  %v3482_v11 = vld [vmem:[#allocation5 + $0x28] sm:$0xff] (!%p4749_p7)   ;;  %v3484_v13 = vld [vmem:[#allocation5 + $0x30] sm:$0xff] (!%p4749_p7)   ;;  %v3485_v14 = vld [vmem:[#allocation5 + $0x18] sm:$0xff] (!%p4749_p7)  }
  0xec   : > { %v3486_v15 = vld [vmem:[#allocation5 + $0x38] sm:$0xff] (!%p4749_p7)   ;;  %v2805_v16 = vld [vmem:[%s4701_s4] ss:$0 sm:$0xff] (!%p4749_p7) }
  0xed   : > { %3058 = vmatpush3.bf16.msra.mxu0 (!%p4749_p7), %v3472_v1  ;;  %3304 = vmatpush3.bf16.msra.mxu1 (!%p4749_p7), %v3472_v1 }
  0xee   : > { %3059 = vmatprep.subr.bf16.mxu0 (!%p4749_p7), %v3473_v2  ;;  %3297 = vmatprep.subr.bf16.mxu1 (!%p4749_p7), %v3473_v2 }
  0xf1   : > { %3060 = vmatpush3.bf16.msra.mxu0 %v3473_v2  ;;  %3305 = vmatpush3.bf16.msra.mxu1 %v3473_v2 }
  0xf2   : > { %3061 = vmatprep.subr.bf16.mxu0 %v3474_v3  ;;  %3298 = vmatprep.subr.bf16.mxu1 %v3474_v3 }
  0xf5   : > { %3062 = vmatpush3.bf16.msra.mxu0 %v3474_v3  ;;  %3306 = vmatpush3.bf16.msra.mxu1 %v3474_v3 }
  0xf6   : > { %3063 = vmatprep.subr.bf16.mxu0 %v3475_v6  ;;  %3299 = vmatprep.subr.bf16.mxu1 %v3475_v6 }
  0xf9   : > { %3064 = vmatpush3.bf16.msra.mxu0 %v3475_v6  ;;  %3307 = vmatpush3.bf16.msra.mxu1 %v3475_v6 }
  0xfa   : > { %3065 = vmatprep.subr.bf16.mxu0 %v3476_v7  ;;  %3300 = vmatprep.subr.bf16.mxu1 %v3476_v7 }
  0xfd   : > { %3066 = vmatpush3.bf16.msra.mxu0 %v3476_v7  ;;  %3308 = vmatpush3.bf16.msra.mxu1 %v3476_v7 }
  0xfe   : > { %3067 = vmatprep.subr.bf16.mxu0 %v3477_v8  ;;  %3301 = vmatprep.subr.bf16.mxu1 %v3477_v8 }
 0x101   : > { %3068 = vmatpush3.bf16.msra.mxu0 %v3477_v8  ;;  %3309 = vmatpush3.bf16.msra.mxu1 %v3477_v8 }
 0x102   : > { %3069 = vmatprep.subr.bf16.mxu0 %v3478_v9  ;;  %3302 = vmatprep.subr.bf16.mxu1 %v3478_v9 }
 0x105   : > { %3070 = vmatpush3.bf16.msra.mxu0 %v3478_v9  ;;  %3310 = vmatpush3.bf16.msra.mxu1 %v3478_v9 }
 0x108   : > { %3072 = vmatmul.mubr.bf16.vlgmr.msra.gmra.mrb[0].mxu0 %v3481_v10  ;;  %3080 = vmatmul.mubr.bf16.vlgmr.msra.gmra.mrb[0].mxu1 %v3482_v11 }
 0x109   : > { %3075 = vmatprep.mubr.bf16.mxu0 %v3483_v12  ;;  %3083 = vmatprep.mubr.bf16.mxu1 %v3484_v13 }
 0x110   : > { %3076 = vmatmul.mubr.bf16.gmra.mrb[4].mxu0 %v3485_v14  ;;  %3084 = vmatmul.mubr.bf16.gmra.mrb[4].mxu1 %v3486_v15 }
 0x1db   : > { %v3073_v17 = vpop.f32.mrb[0].mxu0  ;;  %v3081_v18 = vpop.f32.mrb[0].mxu1 }
 0x1dc   : > { %v751_v19 = vadd.f32 %v3073_v17, %v2805_v16  ;;  %v783_v20 = vadd.f32 %v3081_v18, %v2805_v16  ;;  %v742_v21 = vpop.f32.mrb[1].mxu0  ;;  %v774_v22 = vpop.f32.mrb[1].mxu1 }
 0x1dd   : > { %v743_v23 = vadd.f32 %v2805_v16, %v742_v21  ;;  %v775_v24 = vadd.f32 %v2805_v16, %v774_v22  ;;  %v3074_v25 = vpop.f32.mrb[2].mxu0  ;;  %v3082_v26 = vpop.f32.mrb[2].mxu1 }
 0x1de   : > { %807 = vst [vmem:[#allocation2 + $0x10] sm:$0xff] %v751_v19  ;;  %815 = vst [vmem:[#allocation2 + $0x50] sm:$0xff] %v783_v20  ;;  %v754_v27 = vadd.f32 %v3074_v25, %v2805_v16  ;;  %v786_v28 = vadd.f32 %v3082_v26, %v2805_v16  ;;  %v745_v29 = vpop.f32.mrb[3].mxu0  ;;  %v777_v30 = vpop.f32.mrb[3].mxu1 }
 0x1df   : > { %805 = vst [vmem:[#allocation2] sm:$0xff] %v743_v23  ;;  %813 = vst [vmem:[#allocation2 + $0x40] sm:$0xff] %v775_v24  ;;  %v746_v31 = vadd.f32 %v2805_v16, %v745_v29  ;;  %v778_v32 = vadd.f32 %v2805_v16, %v777_v30 }
 0x1e0   : > { %808 = vst [vmem:[#allocation2 + $0x18] sm:$0xff] %v754_v27  ;;  %v822_v33 = vpack.c.bf16 %v754_v27, %v751_v19  ;;  %816 = vst [vmem:[#allocation2 + $0x58] sm:$0xff] %v786_v28  ;;  %v826_v34 = vpack.c.bf16 %v786_v28, %v783_v20 }
 0x1e1   : > { %806 = vst [vmem:[#allocation2 + $0x8] sm:$0xff] %v746_v31  ;;  %v821_v35 = vpack.c.bf16 %v746_v31, %v743_v23  ;;  %814 = vst [vmem:[#allocation2 + $0x48] sm:$0xff] %v778_v32  ;;  %v825_v36 = vpack.c.bf16 %v778_v32, %v775_v24 }
 0x1e2   : > { %830 = vst [vmem:[#allocation3 + $0x8] sm:$0xff] %v822_v33  ;;  %834 = vst [vmem:[#allocation3 + $0x28] sm:$0xff] %v826_v34 }
 0x1e3   : > { %829 = vst [vmem:[#allocation3] sm:$0xff] %v821_v35  ;;  %833 = vst [vmem:[#allocation3 + $0x20] sm:$0xff] %v825_v36  ;;  %v3077_v37 = vpop.f32.mrb[4].mxu0  ;;  %v3085_v38 = vpop.f32.mrb[4].mxu1 }
 0x1e4   : > { %v767_v39 = vadd.f32 %v3077_v37, %v2805_v16  ;;  %v799_v40 = vadd.f32 %v3085_v38, %v2805_v16  ;;  %v758_v41 = vpop.f32.mrb[5].mxu0  ;;  %v790_v42 = vpop.f32.mrb[5].mxu1 }
 0x1e5   : > { %v759_v43 = vadd.f32 %v2805_v16, %v758_v41  ;;  %v791_v44 = vadd.f32 %v2805_v16, %v790_v42  ;;  %v3078_v45 = vpop.f32.mrb[6].mxu0  ;;  %v3086_v46 = vpop.f32.mrb[6].mxu1 }
 0x1e6   : > { %811 = vst [vmem:[#allocation2 + $0x30] sm:$0xff] %v767_v39  ;;  %819 = vst [vmem:[#allocation2 + $0x70] sm:$0xff] %v799_v40  ;;  %v770_v47 = vadd.f32 %v3078_v45, %v2805_v16  ;;  %v802_v48 = vadd.f32 %v3086_v46, %v2805_v16  ;;  %v761_v49 = vpop.f32.mrb[7].mxu0  ;;  %v793_v50 = vpop.f32.mrb[7].mxu1 }
 0x1e7   : > { %809 = vst [vmem:[#allocation2 + $0x20] sm:$0xff] %v759_v43  ;;  %817 = vst [vmem:[#allocation2 + $0x60] sm:$0xff] %v791_v44  ;;  %v762_v51 = vadd.f32 %v2805_v16, %v761_v49  ;;  %v794_v52 = vadd.f32 %v2805_v16, %v793_v50 }
 0x1e8   : > { %812 = vst [vmem:[#allocation2 + $0x38] sm:$0xff] %v770_v47  ;;  %v824_v53 = vpack.c.bf16 %v770_v47, %v767_v39  ;;  %820 = vst [vmem:[#allocation2 + $0x78] sm:$0xff] %v802_v48  ;;  %v828_v54 = vpack.c.bf16 %v802_v48, %v799_v40 }
 0x1e9   : > { %810 = vst [vmem:[#allocation2 + $0x28] sm:$0xff] %v762_v51  ;;  %v823_v55 = vpack.c.bf16 %v762_v51, %v759_v43  ;;  %818 = vst [vmem:[#allocation2 + $0x68] sm:$0xff] %v794_v52  ;;  %v827_v56 = vpack.c.bf16 %v794_v52, %v791_v44 }
 0x1ea   : > { %832 = vst [vmem:[#allocation3 + $0x18] sm:$0xff] %v824_v53  ;;  %836 = vst [vmem:[#allocation3 + $0x38] sm:$0xff] %v828_v54 }
 0x1eb   : > { %831 = vst [vmem:[#allocation3 + $0x10] sm:$0xff] %v823_v55  ;;  %835 = vst [vmem:[#allocation3 + $0x30] sm:$0xff] %v827_v56 }
 0x1ec PF: > { %p837_p5 = scmp.eq.s32.totalorder %s4085_s14, 1  ;;  %p4750_p9 = scmp.eq.s32.totalorder %s4085_s14, 0 }
 0x1ee   : > { %p838_p8 = por %p837_p5, %p4750_p9 }
 0x1ef   : > { %v3990_v57 = vmov (%p838_p8), 0.0  }
 0x1f0   : > { %841 = sbr.rel (!%p838_p8) target bundleno = 504 (0x1f8), region = 108  ;;  %842 = vst [vmem:[#allocation4] sm:$0xff] (%p838_p8), %v3990_v57  ;;  %843 = vst [vmem:[#allocation4 + $0x8] sm:$0xff] (%p838_p8), %v3990_v57 }
 0x1f1   : > { %844 = vst [vmem:[#allocation4 + $0x10] sm:$0xff] (%p838_p8), %v3990_v57  ;;  %845 = vst [vmem:[#allocation4 + $0x18] sm:$0xff] (%p838_p8), %v3990_v57 }
 0x1f2   : > { %846 = vst [vmem:[#allocation4 + $0x20] sm:$0xff] (%p838_p8), %v3990_v57  ;;  %847 = vst [vmem:[#allocation4 + $0x28] sm:$0xff] (%p838_p8), %v3990_v57 }
 0x1f3   : > { %848 = vst [vmem:[#allocation4 + $0x30] sm:$0xff] (%p838_p8), %v3990_v57  ;;  %849 = vst [vmem:[#allocation4 + $0x38] sm:$0xff] (%p838_p8), %v3990_v57 }
 0x1f4   : > { %850 = vst [vmem:[#allocation4 + $0x40] sm:$0xff] (%p838_p8), %v3990_v57  ;;  %851 = vst [vmem:[#allocation4 + $0x48] sm:$0xff] (%p838_p8), %v3990_v57 }
 0x1f5   : > { %852 = vst [vmem:[#allocation4 + $0x50] sm:$0xff] (%p838_p8), %v3990_v57  ;;  %853 = vst [vmem:[#allocation4 + $0x58] sm:$0xff] (%p838_p8), %v3990_v57 }
 0x1f6   : > { %854 = vst [vmem:[#allocation4 + $0x60] sm:$0xff] (%p838_p8), %v3990_v57  ;;  %855 = vst [vmem:[#allocation4 + $0x68] sm:$0xff] (%p838_p8), %v3990_v57 }
 0x1f7   : > { %856 = vst [vmem:[#allocation4 + $0x70] sm:$0xff] %v3990_v57  ;;  %857 = vst [vmem:[#allocation4 + $0x78] sm:$0xff] %v3990_v57 }
 0x1f8 PF: > { %p2822_p13 = scmp.ge.s32.totalorder %s4085_s14, 2 }
 0x1f9   : > { %v893_v58 = vld [vmem:[#allocation3] sm:$0xff] (!%p2822_p13)  ;;  %v894_v59 = vld [vmem:[#allocation3 + $0x8] sm:$0xff] (!%p2822_p13)  ;;  %v895_v60 = vld [vmem:[#allocation3 + $0x10] sm:$0xff] (!%p2822_p13) }
 0x1fa   : > { %860 = sbr.rel (%p2822_p13) target bundleno = 764 (0x2fc), region = 112  ;;  %3087 = vmatprep.subr.bf16.mxu0 (!%p2822_p13), %v893_v58  ;;  %3311 = vmatprep.subr.bf16.mxu1 (!%p2822_p13), %v893_v58  ;;  %v3487_v61 = vld [vmem:[#allocation8] sm:$0xff] (!%p2822_p13)   ;;  %v896_v63 = vld [vmem:[#allocation3 + $0x18] sm:$0xff] (!%p2822_p13)  ;;  %v898_v1 = vld [vmem:[#allocation3 + $0x28] sm:$0xff] (!%p2822_p13) }
 0x1fb   : > { %3088 = vmatpush3.bf16.msra.mxu0 (!%p2822_p13), %v893_v58  ;;  %3319 = vmatpush3.bf16.msra.mxu1 (!%p2822_p13), %v893_v58  ;;  %v3488_v62 = vld [vmem:[#allocation8 + $0x20] sm:$0xff] (!%p2822_p13)   ;;  %v899_v2 = vld [vmem:[#allocation3 + $0x30] sm:$0xff] (!%p2822_p13)  ;;  %v900_v3 = vld [vmem:[#allocation3 + $0x38] sm:$0xff] (!%p2822_p13) }
 0x1fc   : > { %3089 = vmatprep.subr.bf16.mxu0 (!%p2822_p13), %v894_v59  ;;  %3312 = vmatprep.subr.bf16.mxu1 (!%p2822_p13), %v894_v59  ;;  %v897_v0 = vld [vmem:[#allocation3 + $0x20] sm:$0xff] (!%p2822_p13)  ;;  %v3489_v4 = vld [vmem:[#allocation8 + $0x8] sm:$0xff] (!%p2822_p13)   ;;  %v3491_v6 = vld [vmem:[#allocation8 + $0x10] sm:$0xff] (!%p2822_p13)  }
 0x1fd   : > { %3103 = vmatprep.mubr.bf16.mxu0 (!%p2822_p13), %v3487_v61  ;;  %3111 = vmatprep.mubr.bf16.mxu1 (!%p2822_p13), %v3488_v62  ;;  %v3490_v5 = vld [vmem:[#allocation8 + $0x28] sm:$0xff] (!%p2822_p13)   ;;  %v3492_v7 = vld [vmem:[#allocation8 + $0x30] sm:$0xff] (!%p2822_p13)   ;;  %v3493_v8 = vld [vmem:[#allocation8 + $0x18] sm:$0xff] (!%p2822_p13)  }
 0x1fe   : > { %v3494_v9 = vld [vmem:[#allocation8 + $0x38] sm:$0xff] (!%p2822_p13)   ;;  %v863_v10 = vld [vmem:[#allocation4 + $0x10] sm:$0xff] (!%p2822_p13)  ;;  %v861_v12 = vld [vmem:[#allocation4] sm:$0xff] (!%p2822_p13) }
 0x1ff   : > { %3090 = vmatpush3.bf16.msra.mxu0 (!%p2822_p13), %v894_v59  ;;  %3320 = vmatpush3.bf16.msra.mxu1 (!%p2822_p13), %v894_v59  ;;  %v871_v11 = vld [vmem:[#allocation4 + $0x50] sm:$0xff] (!%p2822_p13)  ;;  %v869_v13 = vld [vmem:[#allocation4 + $0x40] sm:$0xff] (!%p2822_p13)  ;;  %v864_v16 = vld [vmem:[#allocation4 + $0x18] sm:$0xff] (!%p2822_p13) }
 0x200   : > { %3091 = vmatprep.subr.bf16.mxu0 (!%p2822_p13), %v895_v60  ;;  %3313 = vmatprep.subr.bf16.mxu1 (!%p2822_p13), %v895_v60  ;;  %v872_v17 = vld [vmem:[#allocation4 + $0x58] sm:$0xff] (!%p2822_p13)  ;;  %v862_v22 = vld [vmem:[#allocation4 + $0x8] sm:$0xff] (!%p2822_p13)  ;;  %v867_v34 = vld [vmem:[#allocation4 + $0x30] sm:$0xff] (!%p2822_p13) }
 0x201   : > { %v870_v23 = vld [vmem:[#allocation4 + $0x48] sm:$0xff]  ;;  %v875_v35 = vld [vmem:[#allocation4 + $0x70] sm:$0xff]  ;;  %v865_v36 = vld [vmem:[#allocation4 + $0x20] sm:$0xff] }
 0x202   : > { %v873_v37 = vld [vmem:[#allocation4 + $0x60] sm:$0xff]  ;;  %v868_v40 = vld [vmem:[#allocation4 + $0x38] sm:$0xff]  ;;  %v866_v46 = vld [vmem:[#allocation4 + $0x28] sm:$0xff] }
 0x203   : > { %3092 = vmatpush3.bf16.msra.mxu0 %v895_v60  ;;  %3321 = vmatpush3.bf16.msra.mxu1 %v895_v60  ;;  %v876_v41 = vld [vmem:[#allocation4 + $0x78] sm:$0xff]  ;;  %v874_v47 = vld [vmem:[#allocation4 + $0x68] sm:$0xff] }
 0x204   : > { %3093 = vmatprep.subr.bf16.mxu0 %v896_v63  ;;  %3314 = vmatprep.subr.bf16.mxu1 %v896_v63 }
 0x207   : > { %3094 = vmatpush3.bf16.msra.mxu0 %v896_v63  ;;  %3322 = vmatpush3.bf16.msra.mxu1 %v896_v63 }
 0x208   : > { %3095 = vmatprep.subr.bf16.mxu0 %v897_v0  ;;  %3315 = vmatprep.subr.bf16.mxu1 %v897_v0 }
 0x20b   : > { %3096 = vmatpush3.bf16.msra.mxu0 %v897_v0  ;;  %3323 = vmatpush3.bf16.msra.mxu1 %v897_v0 }
 0x20c   : > { %3097 = vmatprep.subr.bf16.mxu0 %v898_v1  ;;  %3316 = vmatprep.subr.bf16.mxu1 %v898_v1 }
 0x20f   : > { %3098 = vmatpush3.bf16.msra.mxu0 %v898_v1  ;;  %3324 = vmatpush3.bf16.msra.mxu1 %v898_v1 }
 0x210   : > { %3099 = vmatprep.subr.bf16.mxu0 %v899_v2  ;;  %3317 = vmatprep.subr.bf16.mxu1 %v899_v2 }
 0x213   : > { %3100 = vmatpush3.bf16.msra.mxu0 %v899_v2  ;;  %3325 = vmatpush3.bf16.msra.mxu1 %v899_v2 }
 0x214   : > { %3101 = vmatprep.subr.bf16.mxu0 %v900_v3  ;;  %3318 = vmatprep.subr.bf16.mxu1 %v900_v3 }
 0x217   : > { %3102 = vmatpush3.bf16.msra.mxu0 %v900_v3  ;;  %3326 = vmatpush3.bf16.msra.mxu1 %v900_v3 }
 0x21a   : > { %3104 = vmatmul.mubr.bf16.vlgmr.msra.gmra.mrb[0].mxu0 %v3489_v4  ;;  %3112 = vmatmul.mubr.bf16.vlgmr.msra.gmra.mrb[0].mxu1 %v3490_v5 }
 0x21b   : > { %3107 = vmatprep.mubr.bf16.mxu0 %v3491_v6  ;;  %3115 = vmatprep.mubr.bf16.mxu1 %v3492_v7 }
 0x222   : > { %3108 = vmatmul.mubr.bf16.gmra.mrb[4].mxu0 %v3493_v8  ;;  %3116 = vmatmul.mubr.bf16.gmra.mrb[4].mxu1 %v3494_v9 }
 0x2ed   : > { %v3105_v14 = vpop.f32.mrb[0].mxu0  ;;  %v3113_v15 = vpop.f32.mrb[0].mxu1 }
 0x2ee   : > { %v1048_v18 = vadd.f32 %v3105_v14, %v863_v10  ;;  %v1056_v19 = vadd.f32 %v3113_v15, %v871_v11  ;;  %v983_v20 = vpop.f32.mrb[1].mxu0  ;;  %v1015_v21 = vpop.f32.mrb[1].mxu1 }
 0x2ef   : > { %v1046_v24 = vadd.f32 %v983_v20, %v861_v12  ;;  %v1054_v25 = vadd.f32 %v1015_v21, %v869_v13  ;;  %v3106_v26 = vpop.f32.mrb[2].mxu0  ;;  %v3114_v27 = vpop.f32.mrb[2].mxu1 }
 0x2f0   : > { %1064 = vst [vmem:[#allocation4 + $0x10] sm:$0xff] %v1048_v18  ;;  %1072 = vst [vmem:[#allocation4 + $0x50] sm:$0xff] %v1056_v19  ;;  %v1049_v28 = vadd.f32 %v3106_v26, %v864_v16  ;;  %v1057_v29 = vadd.f32 %v3114_v27, %v872_v17  ;;  %v986_v30 = vpop.f32.mrb[3].mxu0  ;;  %v1018_v31 = vpop.f32.mrb[3].mxu1 }
 0x2f1   : > { %1062 = vst [vmem:[#allocation4] sm:$0xff] %v1046_v24  ;;  %1070 = vst [vmem:[#allocation4 + $0x40] sm:$0xff] %v1054_v25  ;;  %v1047_v32 = vadd.f32 %v986_v30, %v862_v22  ;;  %v1055_v33 = vadd.f32 %v1018_v31, %v870_v23 }
 0x2f2   : > { %1065 = vst [vmem:[#allocation4 + $0x18] sm:$0xff] %v1049_v28  ;;  %1073 = vst [vmem:[#allocation4 + $0x58] sm:$0xff] %v1057_v29 }
 0x2f3   : > { %1063 = vst [vmem:[#allocation4 + $0x8] sm:$0xff] %v1047_v32  ;;  %1071 = vst [vmem:[#allocation4 + $0x48] sm:$0xff] %v1055_v33 }
 0x2f5   : > { %v3109_v38 = vpop.f32.mrb[4].mxu0  ;;  %v3117_v39 = vpop.f32.mrb[4].mxu1 }
 0x2f6   : > { %v1052_v42 = vadd.f32 %v3109_v38, %v867_v34  ;;  %v1060_v43 = vadd.f32 %v3117_v39, %v875_v35  ;;  %v999_v44 = vpop.f32.mrb[5].mxu0  ;;  %v1031_v45 = vpop.f32.mrb[5].mxu1 }
 0x2f7   : > { %v1050_v48 = vadd.f32 %v999_v44, %v865_v36  ;;  %v1058_v49 = vadd.f32 %v1031_v45, %v873_v37  ;;  %v3110_v50 = vpop.f32.mrb[6].mxu0  ;;  %v3118_v51 = vpop.f32.mrb[6].mxu1 }
 0x2f8   : > { %1068 = vst [vmem:[#allocation4 + $0x30] sm:$0xff] %v1052_v42  ;;  %1076 = vst [vmem:[#allocation4 + $0x70] sm:$0xff] %v1060_v43  ;;  %v1053_v52 = vadd.f32 %v3110_v50, %v868_v40  ;;  %v1061_v53 = vadd.f32 %v3118_v51, %v876_v41  ;;  %v1002_v54 = vpop.f32.mrb[7].mxu0  ;;  %v1034_v55 = vpop.f32.mrb[7].mxu1 }
 0x2f9   : > { %1066 = vst [vmem:[#allocation4 + $0x20] sm:$0xff] %v1050_v48  ;;  %1074 = vst [vmem:[#allocation4 + $0x60] sm:$0xff] %v1058_v49  ;;  %v1051_v56 = vadd.f32 %v1002_v54, %v866_v46  ;;  %v1059_v57 = vadd.f32 %v1034_v55, %v874_v47 }
 0x2fa   : > { %1069 = vst [vmem:[#allocation4 + $0x38] sm:$0xff] %v1053_v52  ;;  %1077 = vst [vmem:[#allocation4 + $0x78] sm:$0xff] %v1061_v53 }
 0x2fb   : > { %1067 = vst [vmem:[#allocation4 + $0x28] sm:$0xff] %v1051_v56  ;;  %1075 = vst [vmem:[#allocation4 + $0x68] sm:$0xff] %v1059_v57 }
 0x2fc PF: > { %p4751_p0 = scmp.ne.s32.totalorder %s4085_s14, 0 }
 0x2fd   : > { %v3495_v58 = vld [vmem:[#allocation12] sm:$0xff] (!%p4751_p0)   ;;  %v3496_v59 = vld [vmem:[#allocation12 + $0x8] sm:$0xff] (!%p4751_p0)   ;;  %v3497_v60 = vld [vmem:[#allocation12 + $0x10] sm:$0xff] (!%p4751_p0)   ;;  %s4752_s23 = sld [smem:[#allocation27_spill]] (!%p4751_p0) }
 0x2fe   : > { %1080 = sbr.rel (%p4751_p0) target bundleno = 1042 (0x412), region = 116  ;;  %3119 = vmatprep.subr.bf16.mxu0 (!%p4751_p0), %v3495_v58  ;;  %3327 = vmatprep.subr.bf16.mxu1 (!%p4751_p0), %v3495_v58  ;;  %v3498_v61 = vld [vmem:[#allocation12 + $0x18] sm:$0xff] (!%p4751_p0)   ;;  %v1081_v62 = vld [vmem:[#allocation2] sm:$0xff] (!%p4751_p0)  ;;  %v1082_v63 = vld [vmem:[#allocation2 + $0x8] sm:$0xff] (!%p4751_p0) }
 0x2ff   : > { %3120 = vmatpush3.bf16.msra.mxu0 (!%p4751_p0), %v3495_v58  ;;  %3335 = vmatpush3.bf16.msra.mxu1 (!%p4751_p0), %v3495_v58  ;;  %v1113_v0 = vld [vmem:[#allocation4] sm:$0xff] (!%p4751_p0)  ;;  %v1097_v1 = vmul.f32 (!%p4751_p0), 0.5, %v1081_v62  ;;  %v1098_v2 = vmul.f32 (!%p4751_p0), 0.5, %v1082_v63  ;;  %v1114_v3 = vld [vmem:[#allocation4 + $0x8] sm:$0xff] (!%p4751_p0)  ;;  %v1083_v13 = vld [vmem:[#allocation2 + $0x10] sm:$0xff] (!%p4751_p0) }
 0x300   : > { %3121 = vmatprep.subr.bf16.mxu0 (!%p4751_p0), %v3496_v59  ;;  %3328 = vmatprep.subr.bf16.mxu1 (!%p4751_p0), %v3496_v59  ;;  %v4392_v4 = vld [vmem:[%s4702_s5] ss:$0 sm:$0xff] (!%p4751_p0)  ;;  %v1090_v6 = vld [vmem:[#allocation2 + $0x48] sm:$0xff] (!%p4751_p0)  ;;  %v1084_v14 = vld [vmem:[#allocation2 + $0x18] sm:$0xff] (!%p4751_p0)  ;;  %v1099_v18 = vmul.f32 (!%p4751_p0), 0.5, %v1083_v13 }
 0x301   : > { %v1089_v5 = vld [vmem:[#allocation2 + $0x40] sm:$0xff] (!%p4751_p0)  ;;  %v1122_v9 = vld [vmem:[#allocation4 + $0x48] sm:$0xff] (!%p4751_p0)  ;;  %v1129_v10 = vsub.f32 (!%p4751_p0), %v1097_v1, %v1113_v0  ;;  %v1130_v11 = vsub.f32 (!%p4751_p0), %v1098_v2, %v1114_v3  ;;  %v1106_v12 = vmul.f32 (!%p4751_p0), 0.5, %v1090_v6  ;;  %v1115_v15 = vld [vmem:[#allocation4 + $0x10] sm:$0xff] (!%p4751_p0)  ;;  %v1100_v19 = vmul.f32 (!%p4751_p0), 0.5, %v1084_v14 }
 0x302   : > { %v1105_v7 = vmul.f32 (!%p4751_p0), 0.5, %v1089_v5  ;;  %v1121_v8 = vld [vmem:[#allocation4 + $0x40] sm:$0xff] (!%p4751_p0)  ;;  %v1116_v20 = vld [vmem:[#allocation4 + $0x18] sm:$0xff] (!%p4751_p0)  ;;  %v1091_v21 = vld [vmem:[#allocation2 + $0x50] sm:$0xff] (!%p4751_p0)  ;;  %v1131_v28 = vsub.f32 (!%p4751_p0), %v1099_v18, %v1115_v15 }
 0x303   : > { %3122 = vmatpush3.bf16.msra.mxu0 (!%p4751_p0), %v3496_v59  ;;  %3336 = vmatpush3.bf16.msra.mxu1 (!%p4751_p0), %v3496_v59  ;;  %v3499_v16 = vld [vmem:[#allocation12 + $0x20] sm:$0xff] (!%p4751_p0)   ;;  %v4395_v22 = vadd.f32 (!%p4751_p0), %v4392_v4, %v1129_v10  ;;  %v4398_v23 = vadd.f32 (!%p4751_p0), %v4392_v4, %v1130_v11  ;;  %v1138_v24 = vsub.f32 (!%p4751_p0), %v1106_v12, %v1122_v9  ;;  %v1092_v25 = vld [vmem:[#allocation2 + $0x58] sm:$0xff] (!%p4751_p0)  ;;  %v1107_v26 = vmul.f32 (!%p4751_p0), 0.5, %v1091_v21  ;;  %v1123_v30 = vld [vmem:[#allocation4 + $0x50] sm:$0xff] (!%p4751_p0) }
 0x304   : > { %3123 = vmatprep.subr.bf16.mxu0 (!%p4751_p0), %v3497_v60  ;;  %3329 = vmatprep.subr.bf16.mxu1 (!%p4751_p0), %v3497_v60  ;;  %v1137_v17 = vsub.f32 (!%p4751_p0), %v1105_v7, %v1121_v8  ;;  %v1132_v29 = vsub.f32 (!%p4751_p0), %v1100_v19, %v1116_v20  ;;  %v3500_v33 = vld [vmem:[#allocation12 + $0x28] sm:$0xff] (!%p4751_p0)   ;;  %v4410_v36 = vadd.f32 (!%p4751_p0), %v4392_v4, %v1131_v28  ;;  %v1108_v37 = vmul.f32 (!%p4751_p0), 0.5, %v1092_v25  ;;  %v1124_v41 = vld [vmem:[#allocation4 + $0x58] sm:$0xff] (!%p4751_p0)  ;;  %v1085_v45 = vld [vmem:[#allocation2 + $0x20] sm:$0xff] (!%p4751_p0) }
 0x305   : > { %v1184_v31 = vmin.f32 %v4395_v22, 0.0  ;;  %v1185_v32 = vmin.f32 %v4398_v23, 0.0  ;;  %v4406_v34 = vadd.f32 %v4392_v4, %v1138_v24  ;;  %v1139_v42 = vsub.f32 %v1107_v26, %v1123_v30  ;;  %v3501_v46 = vld [vmem:[#allocation12 + $0x30] sm:$0xff]   ;;  %v1086_v52 = vld [vmem:[#allocation2 + $0x28] sm:$0xff]  ;;  %v1117_v53 = vld [vmem:[#allocation4 + $0x20] sm:$0xff] }
 0x306   : > { %v4401_v27 = vadd.f32 %v4392_v4, %v1137_v17  ;;  %v4413_v40 = vadd.f32 %v4392_v4, %v1132_v29  ;;  %v1186_v47 = vmin.f32 %v4410_v36, 0.0  ;;  %v1140_v50 = vsub.f32 %v1108_v37, %v1124_v41  ;;  %v1093_v54 = vld [vmem:[#allocation2 + $0x60] sm:$0xff]  ;;  %v1087_v2 = vld [vmem:[#allocation2 + $0x30] sm:$0xff]  ;;  %v1088_v3 = vld [vmem:[#allocation2 + $0x38] sm:$0xff] }
 0x307   : > { %3124 = vmatpush3.bf16.msra.mxu0 %v3497_v60  ;;  %3337 = vmatpush3.bf16.msra.mxu1 %v3497_v60  ;;  %v1200_v38 = vmul.f32 1.442695, %v1184_v31  ;;  %v1202_v39 = vmul.f32 1.442695, %v1185_v32  ;;  %v1193_v43 = vmin.f32 %v4406_v34, 0.0  ;;  %v4419_v51 = vadd.f32 %v4392_v4, %v1139_v42  ;;  %v1118_v60 = vld [vmem:[#allocation4 + $0x28] sm:$0xff] }
 0x308   : > { %3125 = vmatprep.subr.bf16.mxu0 %v3498_v61  ;;  %3330 = vmatprep.subr.bf16.mxu1 %v3498_v61  ;;  %v1192_v35 = vmin.f32 %v4401_v27, 0.0  ;;  %v1187_v48 = vmin.f32 %v4413_v40, 0.0  ;;  %v1204_v55 = vmul.f32 1.442695, %v1186_v47  ;;  %v1101_v57 = vmul.f32 0.5, %v1085_v45  ;;  %v1125_v62 = vld [vmem:[#allocation4 + $0x60] sm:$0xff] }
 0x309   : > { %3503 = vpow2.f32 %v1200_v38  ;;  %v1218_v49 = vmul.f32 1.442695, %v1193_v43  ;;  %vm1168_vm0 = vcmp.gt.f32.partialorder %v4395_v22, 0.0  ;;  %v4423_v58 = vadd.f32 %v4392_v4, %v1140_v50  ;;  %v3502_v5 = vld [vmem:[#allocation12 + $0x38] sm:$0xff]   ;;  %v1126_v8 = vld [vmem:[#allocation4 + $0x68] sm:$0xff]  ;;  %v1119_v13 = vld [vmem:[#allocation4 + $0x30] sm:$0xff] }
 0x30a   : > { %v1216_v44 = vmul.f32 1.442695, %v1192_v35  ;;  %3505 = vpow2.f32 %v1202_v39  ;;  %v1206_v56 = vmul.f32 1.442695, %v1187_v48  ;;  %v1194_v59 = vmin.f32 %v4419_v51, 0.0  ;;  %v1120_v17 = vld [vmem:[#allocation4 + $0x38] sm:$0xff] }
 0x30b   : > { %3126 = vmatpush3.bf16.msra.mxu0 %v3498_v61  ;;  %3338 = vmatpush3.bf16.msra.mxu1 %v3498_v61  ;;  %v1094_v61 = vld [vmem:[#allocation2 + $0x68] sm:$0xff]  ;;  %v1102_v63 = vmul.f32 0.5, %v1086_v52  ;;  %v1133_v0 = vsub.f32 %v1101_v57, %v1117_v53  ;;  %v1109_v1 = vmul.f32 0.5, %v1093_v54  ;;  %vm1169_vm1 = vcmp.gt.f32.partialorder %v4398_v23, 0.0  ;;  %v1096_v57 = vld [vmem:[#allocation2 + $0x78] sm:$0xff] }
 0x30c   : > { %3127 = vmatprep.subr.bf16.mxu0 %v3499_v16  ;;  %3331 = vmatprep.subr.bf16.mxu1 %v3499_v16  ;;  %3507 = vpow2.f32 %v1216_v44  ;;  %v1195_v6 = vmin.f32 %v4423_v58, 0.0  ;;  %v1220_v7 = vmul.f32 1.442695, %v1194_v59  ;;  %v1110_v11 = vmul.f32 0.5, %v1094_v61 }
 0x30d   : > { %3509 = vpow2.f32 %v1218_v49  ;;  %v1134_v9 = vsub.f32 %v1102_v63, %v1118_v60  ;;  %v4429_v10 = vadd.f32 %v4392_v4, %v1133_v0  ;;  %v1141_v12 = vsub.f32 %v1109_v1, %v1125_v62  ;;  %v1127_v0 = vld [vmem:[#allocation4 + $0x70] sm:$0xff]  ;;  %v1128_v1 = vld [vmem:[#allocation4 + $0x78] sm:$0xff] }
 0x30e   : > { %3511 = vpow2.f32 %v1204_v55  ;;  %v1222_v14 = vmul.f32 1.442695, %v1195_v6  ;;  %v1103_v15 = vmul.f32 0.5, %v1087_v2  ;;  %vm1176_vm2 = vcmp.gt.f32.partialorder %v4401_v27, 0.0 }
 0x30f   : > { %3128 = vmatpush3.bf16.msra.mxu0 %v3499_v16  ;;  %3339 = vmatpush3.bf16.msra.mxu1 %v3499_v16  ;;  %3513 = vpow2.f32 %v1206_v56  ;;  %v1104_v16 = vmul.f32 0.5, %v1088_v3  ;;  %v4433_v18 = vadd.f32 %v4392_v4, %v1134_v9  ;;  %v1188_v19 = vmin.f32 %v4429_v10, 0.0  ;;  %v1095_v56 = vld [vmem:[#allocation2 + $0x70] sm:$0xff] }
 0x310   : > { %3129 = vmatprep.subr.bf16.mxu0 %v3500_v33  ;;  %3332 = vmatprep.subr.bf16.mxu1 %v3500_v33  ;;  %3515 = vpow2.f32 %v1220_v7  ;;  %v1142_v20 = vsub.f32 %v1110_v11, %v1126_v8  ;;  %vm1177_vm3 = vcmp.gt.f32.partialorder %v4406_v34, 0.0  ;;  %v4438_v21 = vadd.f32 %v4392_v4, %v1141_v12 }
 0x311   : > { %3517 = vpow2.f32 %v1222_v14  ;;  %v1135_v24 = vsub.f32 %v1103_v15, %v1119_v13  ;;  %v1189_v26 = vmin.f32 %v4433_v18, 0.0  ;;  %v1208_v28 = vmul.f32 1.442695, %v1188_v19 }
 0x312   : > { %v4442_v29 = vadd.f32 %v4392_v4, %v1142_v20  ;;  %v1136_v30 = vsub.f32 %v1104_v16, %v1120_v17  ;;  %vm1170_vm4 = vcmp.gt.f32.partialorder %v4410_v36, 0.0  ;;  %vm1171_vm5 = vcmp.gt.f32.partialorder %v4413_v40, 0.0 }
 0x313   : > { %3130 = vmatpush3.bf16.msra.mxu0 %v3500_v33  ;;  %3340 = vmatpush3.bf16.msra.mxu1 %v3500_v33  ;;  %v3504_v25 = vpop.eup %3503  ;;  %v1196_v33 = vmin.f32 %v4438_v21, 0.0  ;;  %3519 = vpow2.f32 %v1208_v28  ;;  %v1210_v38 = vmul.f32 1.442695, %v1189_v26  ;;  %v4448_v39 = vadd.f32 %v4392_v4, %v1135_v24 }
 0x314   : > { %3131 = vmatprep.subr.bf16.mxu0 %v3501_v46  ;;  %3333 = vmatprep.subr.bf16.mxu1 %v3501_v46  ;;  %v3506_v31 = vpop.eup %3505  ;;  %v2833_v32 = vadd.f32 -1.0, %v3504_v25  ;;  %v1197_v44 = vmin.f32 %v4442_v29, 0.0  ;;  %v4458_v49 = vadd.f32 %v4392_v4, %v1136_v30  ;;  %vm1178_vm6 = vcmp.gt.f32.partialorder %v4419_v51, 0.0 }
 0x315   : > { %v2834_v37 = vadd.f32 -1.0, %v3506_v31  ;;  %v1224_v45 = vmul.f32 1.442695, %v1196_v33  ;;  %3521 = vpow2.f32 %v1210_v38  ;;  %vm1179_vm7 = vcmp.gt.f32.partialorder %v4423_v58, 0.0 }
 0x316   : > { %v3508_v35 = vpop.eup %3507  ;;  %v1248_v42 = vsel %vm1168_vm0, %v4395_v22, %v2833_v32  ;;  %v1191_v63 = vmin.f32 %v4458_v49, 0.0  ;;  %v1111_v6 = vmul.f32 0.5, %v1095_v56  ;;  %vm1172_vm8 = vcmp.gt.f32.partialorder %v4429_v10, 0.0 }
 0x317   : > { %3132 = vmatpush3.bf16.msra.mxu0 %v3501_v46  ;;  %3341 = vmatpush3.bf16.msra.mxu1 %v3501_v46  ;;  %v3510_v41 = vpop.eup %3509  ;;  %v2841_v43 = vadd.f32 -1.0, %v3508_v35  ;;  %v1249_v47 = vsel %vm1169_vm1, %v4398_v23, %v2834_v37  ;;  %3523 = vpow2.f32 %v1224_v45  ;;  %v1226_v23 = vmul.f32 1.442695, %v1197_v44 }
 0x318   : > { %3133 = vmatprep.subr.bf16.mxu0 %v3502_v5  ;;  %3334 = vmatprep.subr.bf16.mxu1 %v3502_v5  ;;  %v3512_v46 = vpop.eup %3511  ;;  %v2842_v48 = vadd.f32 -1.0, %v3510_v41  ;;  %v1264_v52 = vpack.c.bf16 %v1249_v47, %v1248_v42  ;;  %v1214_v9 = vmul.f32 1.442695, %v1191_v63  ;;  %vm1173_vm9 = vcmp.gt.f32.partialorder %v4433_v18, 0.0 }
 0x319   : > { %v3514_v50 = vpop.eup %3513  ;;  %v1256_v22 = vsel %vm1176_vm2, %v4401_v27, %v2841_v43  ;;  %v2835_v53 = vadd.f32 -1.0, %v3512_v46  ;;  %v1190_v27 = vmin.f32 %v4448_v39, 0.0  ;;  %3525 = vpow2.f32 %v1226_v23 }
 0x31a   : > { %v1257_v54 = vsel %vm1177_vm3, %v4406_v34, %v2842_v48  ;;  %v2836_v55 = vadd.f32 -1.0, %v3514_v50  ;;  %v3516_v59 = vpop.eup %3515  ;;  %3135 = vmatprep.mubr.bf16.mxu0 %v1264_v52  ;;  %vm1180_vm10 = vcmp.gt.f32.partialorder %v4438_v21, 0.0  ;;  %vm1181_vm11 = vcmp.gt.f32.partialorder %v4442_v29, 0.0 }
 0x31b   : > { %3134 = vmatpush3.bf16.msra.mxu0 %v3502_v5  ;;  %3342 = vmatpush3.bf16.msra.mxu1 %v3502_v5  ;;  %v1268_v60 = vpack.c.bf16 %v1257_v54, %v1256_v22  ;;  %v1250_v61 = vsel %vm1170_vm4, %v4410_v36, %v2835_v53  ;;  %v2843_v62 = vadd.f32 -1.0, %v3516_v59  ;;  %v3518_v2 = vpop.eup %3517  ;;  %v1212_v5 = vmul.f32 1.442695, %v1190_v27  ;;  %v2849_v22 = vld [vmem:[%s4752_s23] ss:$0 sm:$0xff] }
 0x31c   : > { %v1251_v34 = vsel %vm1171_vm5, %v4413_v40, %v2836_v55  ;;  %v1112_v36 = vmul.f32 0.5, %v1096_v57  ;;  %v2844_v7 = vadd.f32 -1.0, %v3518_v2  ;;  %v1143_v40 = vsub.f32 %v1111_v6, %v1127_v0 }
 0x31d   : > { %3143 = vmatprep.mubr.bf16.mxu1 %v1268_v60  ;;  %v1265_v3 = vpack.c.bf16 %v1251_v34, %v1250_v61  ;;  %v1258_v8 = vsel %vm1178_vm6, %v4419_v51, %v2843_v62  ;;  %3527 = vpow2.f32 %v1212_v5  ;;  %v3520_v12 = vpop.eup %3519  ;;  %vm1174_vm12 = vcmp.gt.f32.partialorder %v4448_v39, 0.0 }
 0x31e   : > { %v1144_v11 = vsub.f32 %v1112_v36, %v1128_v1  ;;  %v1259_v13 = vsel %vm1179_vm7, %v4423_v58, %v2844_v7  ;;  %3529 = vpow2.f32 %v1214_v9  ;;  %v2837_v15 = vadd.f32 -1.0, %v3520_v12 }
 0x31f   : > { %3136 = vmatmul.mubr.bf16.vlgmr.msra.gmra.mrb[0].mxu0 %v1265_v3  ;;  %v1269_v14 = vpack.c.bf16 %v1259_v13, %v1258_v8  ;;  %v1166_v16 = vadd.f32 %v4392_v4, %v1143_v40  ;;  %v3522_v51 = vpop.eup %3521  ;;  %vm1175_vm13 = vcmp.gt.f32.partialorder %v4458_v49, 0.0 }
 0x320   : > { %v1167_v17 = vadd.f32 %v4392_v4, %v1144_v11  ;;  %v2838_v20 = vadd.f32 -1.0, %v3522_v51  ;;  %v1252_v24 = vsel %vm1172_vm8, %v4429_v10, %v2837_v15 }
 0x321   : > { %v3524_v19 = vpop.eup %3523  ;;  %3144 = vmatmul.mubr.bf16.vlgmr.msra.gmra.mrb[0].mxu1 %v1269_v14  ;;  %v1198_v25 = vmin.f32 %v1166_v16, 0.0  ;;  %vm1182_vm14 = vcmp.gt.f32.partialorder %v1166_v16, 0.0 }
 0x322   : > { %v2845_v58 = vadd.f32 -1.0, %v3524_v19  ;;  %v1199_v26 = vmin.f32 %v1167_v17, 0.0  ;;  %v1253_v28 = vsel %vm1173_vm9, %v4433_v18, %v2838_v20  ;;  %vm1183_vm15 = vcmp.gt.f32.partialorder %v1167_v17, 0.0 }
 0x323   : > { %v3526_v30 = vpop.eup %3525  ;;  %v1266_v31 = vpack.c.bf16 %v1253_v28, %v1252_v24  ;;  %v1228_v4 = vmul.f32 1.442695, %v1198_v25 }
 0x324   : > { %v1230_v32 = vmul.f32 1.442695, %v1199_v26  ;;  %v2846_v33 = vadd.f32 -1.0, %v3526_v30  ;;  %v1260_v35 = vsel %vm1180_vm10, %v4438_v21, %v2845_v58 }
 0x325   : > { %3139 = vmatprep.mubr.bf16.mxu0 %v1266_v31  ;;  %3531 = vpow2.f32 %v1228_v4 }
 0x326   : > { %v1261_v10 = vsel %vm1181_vm11, %v4442_v29, %v2846_v33  ;;  %3533 = vpow2.f32 %v1230_v32 }
 0x327   : > { %v3528_v37 = vpop.eup %3527  ;;  %v1270_v41 = vpack.c.bf16 %v1261_v10, %v1260_v35 }
 0x328   : > { %v3530_v38 = vpop.eup %3529  ;;  %v2839_v18 = vadd.f32 -1.0, %v3528_v37 }
 0x329   : > { %v2840_v42 = vadd.f32 -1.0, %v3530_v38  ;;  %3147 = vmatprep.mubr.bf16.mxu1 %v1270_v41 }
 0x32a   : > { %v1254_v43 = vsel %vm1174_vm12, %v4448_v39, %v2839_v18 }
 0x32b   : > { %v1255_v44 = vsel %vm1175_vm13, %v4458_v49, %v2840_v42 }
 0x32c   : > { %v1267_v21 = vpack.c.bf16 %v1255_v44, %v1254_v43 }
 0x32e   : > { %3140 = vmatmul.mubr.bf16.gmra.mrb[4].mxu0 %v1267_v21 }
 0x32f   : > { %v3532_v45 = vpop.eup %3531 }
 0x330   : > { %v3534_v46 = vpop.eup %3533  ;;  %v2847_v29 = vadd.f32 -1.0, %v3532_v45 }
 0x331   : > { %v2848_v47 = vadd.f32 -1.0, %v3534_v46 }
 0x332   : > { %v1262_v48 = vsel %vm1182_vm14, %v1166_v16, %v2847_v29 }
 0x333   : > { %v1263_v50 = vsel %vm1183_vm15, %v1167_v17, %v2848_v47 }
 0x334   : > { %v1271_v52 = vpack.c.bf16 %v1263_v50, %v1262_v48 }
 0x336   : > { %3148 = vmatmul.mubr.bf16.gmra.mrb[4].mxu1 %v1271_v52 }
 0x3f2   : > { %v3137_v53 = vpop.f32.mrb[0].mxu0 }
 0x3f3   : > { %v1386_v39 = vadd.f32 %v3137_v53, %v2849_v22  ;;  %v1377_v54 = vpop.f32.mrb[1].mxu0 }
 0x3f4   : > { %v1378_v49 = vadd.f32 %v2849_v22, %v1377_v54  ;;  %v3138_v55 = vpop.f32.mrb[2].mxu0  ;;  %v3145_v57 = vpop.f32.mrb[0].mxu1 }
 0x3f5   : > { %1442 = vst [vmem:[#allocation2 + $0x10] sm:$0xff] %v1386_v39  ;;  %v1389_v23 = vadd.f32 %v3138_v55, %v2849_v22  ;;  %v1380_v56 = vpop.f32.mrb[3].mxu0  ;;  %v1418_v60 = vadd.f32 %v3145_v57, %v2849_v22  ;;  %v1409_v61 = vpop.f32.mrb[1].mxu1 }
 0x3f6   : > { %1440 = vst [vmem:[#allocation2] sm:$0xff] %v1378_v49  ;;  %v1381_v59 = vadd.f32 %v2849_v22, %v1380_v56  ;;  %v1410_v34 = vadd.f32 %v2849_v22, %v1409_v61  ;;  %v3146_v62 = vpop.f32.mrb[2].mxu1 }
 0x3f7   : > { %1443 = vst [vmem:[#allocation2 + $0x18] sm:$0xff] %v1389_v23  ;;  %v1457_v27 = vpack.c.bf16 %v1389_v23, %v1386_v39  ;;  %1450 = vst [vmem:[#allocation2 + $0x50] sm:$0xff] %v1418_v60  ;;  %v1421_v0 = vadd.f32 %v3146_v62, %v2849_v22  ;;  %v1412_v1 = vpop.f32.mrb[3].mxu1 }
 0x3f8   : > { %1441 = vst [vmem:[#allocation2 + $0x8] sm:$0xff] %v1381_v59  ;;  %v1456_v63 = vpack.c.bf16 %v1381_v59, %v1378_v49  ;;  %1448 = vst [vmem:[#allocation2 + $0x40] sm:$0xff] %v1410_v34  ;;  %v1413_v2 = vadd.f32 %v2849_v22, %v1412_v1 }
 0x3f9   : > { %1465 = vst [vmem:[#allocation3 + $0x8] sm:$0xff] %v1457_v27  ;;  %1451 = vst [vmem:[#allocation2 + $0x58] sm:$0xff] %v1421_v0  ;;  %v1461_v3 = vpack.c.bf16 %v1421_v0, %v1418_v60 }
 0x3fa   : > { %1464 = vst [vmem:[#allocation3] sm:$0xff] %v1456_v63  ;;  %1449 = vst [vmem:[#allocation2 + $0x48] sm:$0xff] %v1413_v2  ;;  %v1460_v5 = vpack.c.bf16 %v1413_v2, %v1410_v34 }
 0x3fb   : > { %1469 = vst [vmem:[#allocation3 + $0x28] sm:$0xff] %v1461_v3 }
 0x3fc   : > { %1468 = vst [vmem:[#allocation3 + $0x20] sm:$0xff] %v1460_v5 }
 0x401   : > { %v3141_v6 = vpop.f32.mrb[4].mxu0 }
 0x402   : > { %v1402_v36 = vadd.f32 %v3141_v6, %v2849_v22  ;;  %v1393_v7 = vpop.f32.mrb[5].mxu0 }
 0x403   : > { %v1394_v8 = vadd.f32 %v2849_v22, %v1393_v7  ;;  %v3142_v9 = vpop.f32.mrb[6].mxu0 }
 0x404   : > { %1446 = vst [vmem:[#allocation2 + $0x30] sm:$0xff] %v1402_v36  ;;  %v1405_v40 = vadd.f32 %v3142_v9, %v2849_v22  ;;  %v1396_v11 = vpop.f32.mrb[7].mxu0 }
 0x405   : > { %1444 = vst [vmem:[#allocation2 + $0x20] sm:$0xff] %v1394_v8  ;;  %v1397_v12 = vadd.f32 %v2849_v22, %v1396_v11 }
 0x406   : > { %1447 = vst [vmem:[#allocation2 + $0x38] sm:$0xff] %v1405_v40  ;;  %v1459_v13 = vpack.c.bf16 %v1405_v40, %v1402_v36 }
 0x407   : > { %1445 = vst [vmem:[#allocation2 + $0x28] sm:$0xff] %v1397_v12  ;;  %v1458_v14 = vpack.c.bf16 %v1397_v12, %v1394_v8 }
 0x408   : > { %1467 = vst [vmem:[#allocation3 + $0x18] sm:$0xff] %v1459_v13 }
 0x409   : > { %1466 = vst [vmem:[#allocation3 + $0x10] sm:$0xff] %v1458_v14  ;;  %v3149_v15 = vpop.f32.mrb[4].mxu1 }
 0x40a   : > { %v1434_v16 = vadd.f32 %v3149_v15, %v2849_v22  ;;  %v1425_v17 = vpop.f32.mrb[5].mxu1 }
 0x40b   : > { %v1426_v51 = vadd.f32 %v2849_v22, %v1425_v17  ;;  %v3150_v19 = vpop.f32.mrb[6].mxu1 }
 0x40c   : > { %1454 = vst [vmem:[#allocation2 + $0x70] sm:$0xff] %v1434_v16  ;;  %v1437_v20 = vadd.f32 %v3150_v19, %v2849_v22  ;;  %v1428_v24 = vpop.f32.mrb[7].mxu1 }
 0x40d   : > { %1452 = vst [vmem:[#allocation2 + $0x60] sm:$0xff] %v1426_v51  ;;  %v1429_v58 = vadd.f32 %v2849_v22, %v1428_v24 }
 0x40e   : > { %1455 = vst [vmem:[#allocation2 + $0x78] sm:$0xff] %v1437_v20  ;;  %v1463_v25 = vpack.c.bf16 %v1437_v20, %v1434_v16 }
 0x40f   : > { %1453 = vst [vmem:[#allocation2 + $0x68] sm:$0xff] %v1429_v58  ;;  %v1462_v26 = vpack.c.bf16 %v1429_v58, %v1426_v51 }
 0x410   : > { %1471 = vst [vmem:[#allocation3 + $0x38] sm:$0xff] %v1463_v25 }
 0x411   : > { %1470 = vst [vmem:[#allocation3 + $0x30] sm:$0xff] %v1462_v26 }
 0x412 PF: > { %p2858_p3 = scmp.ne.s32.totalorder %s4085_s14, 1 }
 0x413   : > { %v1475_v28 = vld [vmem:[#allocation2] sm:$0xff] (!%p2858_p3)  ;;  %v1476_v30 = vld [vmem:[#allocation2 + $0x8] sm:$0xff] (!%p2858_p3)  ;;  %s4753_s15 = sld [smem:[#allocation28_spill]] (!%p2858_p3)  ;;  %v1477_v37 = vld [vmem:[#allocation2 + $0x10] sm:$0xff] (!%p2858_p3) }
 0x414   : > { %1474 = sbr.rel (%p2858_p3) target bundleno = 1065 (0x429), region = 120  ;;  %v1507_v31 = vld [vmem:[#allocation4] sm:$0xff] (!%p2858_p3)  ;;  %v1491_v4 = vmul.f32 (!%p2858_p3), 0.5, %v1475_v28  ;;  %v1492_v32 = vmul.f32 (!%p2858_p3), 0.5, %v1476_v30  ;;  %v1508_v33 = vld [vmem:[#allocation4 + $0x8] sm:$0xff] (!%p2858_p3)  ;;  %v1478_v10 = vld [vmem:[#allocation2 + $0x18] sm:$0xff] (!%p2858_p3) }
 0x415   : > { %v1493_v38 = vmul.f32 (!%p2858_p3), 0.5, %v1477_v37  ;;  %v1509_v41 = vld [vmem:[#allocation4 + $0x10] sm:$0xff] (!%p2858_p3)  ;;  %v1510_v18 = vld [vmem:[#allocation4 + $0x18] sm:$0xff] (!%p2858_p3)  ;;  %v1494_v44 = vmul.f32 (!%p2858_p3), 0.5, %v1478_v10  ;;  %v1479_v21 = vld [vmem:[#allocation2 + $0x20] sm:$0xff] (!%p2858_p3) }
 0x416   : > { %v1523_v42 = vsub.f32 (!%p2858_p3), %v1491_v4, %v1507_v31  ;;  %v1524_v43 = vsub.f32 (!%p2858_p3), %v1492_v32, %v1508_v33  ;;  %v1480_v45 = vld [vmem:[#allocation2 + $0x28] sm:$0xff] (!%p2858_p3)  ;;  %v1511_v46 = vld [vmem:[#allocation4 + $0x20] sm:$0xff] (!%p2858_p3)  ;;  %v1495_v47 = vmul.f32 (!%p2858_p3), 0.5, %v1479_v21  ;;  %v1481_v52 = vld [vmem:[#allocation2 + $0x30] sm:$0xff] (!%p2858_p3) }
 0x417   : > { %v1525_v29 = vsub.f32 (!%p2858_p3), %v1493_v38, %v1509_v41  ;;  %v1496_v48 = vmul.f32 (!%p2858_p3), 0.5, %v1480_v45  ;;  %v1512_v50 = vld [vmem:[#allocation4 + $0x28] sm:$0xff] (!%p2858_p3)  ;;  %v1482_v22 = vld [vmem:[#allocation2 + $0x38] sm:$0xff] (!%p2858_p3)  ;;  %v1526_v54 = vsub.f32 (!%p2858_p3), %v1494_v44, %v1510_v18  ;;  %v1497_v49 = vmul.f32 (!%p2858_p3), 0.5, %v1481_v52  ;;  %v1513_v55 = vld [vmem:[#allocation4 + $0x30] sm:$0xff] (!%p2858_p3) }
 0x418   : > { %v1514_v23 = vld [vmem:[#allocation4 + $0x38] sm:$0xff] (!%p2858_p3)  ;;  %v1483_v56 = vld [vmem:[#allocation2 + $0x40] sm:$0xff] (!%p2858_p3)  ;;  %v1527_v59 = vsub.f32 (!%p2858_p3), %v1495_v47, %v1511_v46  ;;  %v1498_v61 = vmul.f32 (!%p2858_p3), 0.5, %v1482_v22  ;;  %v1484_v27 = vld [vmem:[#allocation2 + $0x48] sm:$0xff] (!%p2858_p3) }
 0x419   : > { %v4503_v35 = vld [vmem:[%s4753_s15] ss:$0 sm:$0xff] (!%p2858_p3)  ;;  %v1528_v60 = vsub.f32 (!%p2858_p3), %v1496_v48, %v1512_v50  ;;  %v1529_v0 = vsub.f32 (!%p2858_p3), %v1497_v49, %v1513_v55  ;;  %v1499_v1 = vmul.f32 (!%p2858_p3), 0.5, %v1483_v56  ;;  %v1516_v2 = vld [vmem:[#allocation4 + $0x48] sm:$0xff] (!%p2858_p3)  ;;  %v1485_v3 = vld [vmem:[#allocation2 + $0x50] sm:$0xff] (!%p2858_p3)  ;;  %v1500_v8 = vmul.f32 (!%p2858_p3), 0.5, %v1484_v27 }
 0x41a   : > { %v1546_v53 = vadd.f32 (!%p2858_p3), %v4503_v35, %v1523_v42  ;;  %v1547_v39 = vadd.f32 (!%p2858_p3), %v4503_v35, %v1524_v43  ;;  %v1548_v57 = vadd.f32 (!%p2858_p3), %v4503_v35, %v1525_v29  ;;  %v1515_v34 = vld [vmem:[#allocation4 + $0x40] sm:$0xff] (!%p2858_p3)  ;;  %v1549_v63 = vadd.f32 (!%p2858_p3), %v4503_v35, %v1526_v54  ;;  %v1486_v5 = vld [vmem:[#allocation2 + $0x58] sm:$0xff] (!%p2858_p3)  ;;  %v1517_v9 = vld [vmem:[#allocation4 + $0x50] sm:$0xff] (!%p2858_p3) }
 0x41b   : > { %v1550_v6 = vadd.f32 %v4503_v35, %v1527_v59  ;;  %v1551_v36 = vadd.f32 %v4503_v35, %v1528_v60  ;;  %v1530_v7 = vsub.f32 %v1498_v61, %v1514_v23  ;;  %v1487_v40 = vld [vmem:[#allocation2 + $0x60] sm:$0xff]  ;;  %v1488_v11 = vld [vmem:[#allocation2 + $0x68] sm:$0xff]  ;;  %v1552_v13 = vadd.f32 %v4503_v35, %v1529_v0  ;;  %v1518_v16 = vld [vmem:[#allocation4 + $0x58] sm:$0xff] }
 0x41c   : > { %v1562_v62 = vpack.c.bf16 %v1547_v39, %v1546_v53  ;;  %v1563_v12 = vpack.c.bf16 %v1549_v63, %v1548_v57  ;;  %v1531_v14 = vsub.f32 %v1499_v1, %v1515_v34  ;;  %v1501_v15 = vmul.f32 0.5, %v1485_v3  ;;  %v1489_v17 = vld [vmem:[#allocation2 + $0x70] sm:$0xff]  ;;  %v1519_v58 = vld [vmem:[#allocation4 + $0x60] sm:$0xff]  ;;  %v1520_v25 = vld [vmem:[#allocation4 + $0x68] sm:$0xff] }
 0x41d   : > { %v1564_v51 = vpack.c.bf16 %v1551_v36, %v1550_v6  ;;  %v1553_v19 = vadd.f32 %v4503_v35, %v1530_v7  ;;  %v1532_v20 = vsub.f32 %v1500_v8, %v1516_v2  ;;  %v1502_v24 = vmul.f32 0.5, %v1486_v5  ;;  %v1490_v26 = vld [vmem:[#allocation2 + $0x78] sm:$0xff]  ;;  %v1521_v32 = vld [vmem:[#allocation4 + $0x70] sm:$0xff] }
 0x41e   : > { %1570 = vst [vmem:[#allocation3] sm:$0xff] %v1562_v62  ;;  %1571 = vst [vmem:[#allocation3 + $0x8] sm:$0xff] %v1563_v12  ;;  %v1554_v28 = vadd.f32 %v4503_v35, %v1531_v14  ;;  %v1533_v30 = vsub.f32 %v1501_v15, %v1517_v9  ;;  %v1503_v31 = vmul.f32 0.5, %v1487_v40  ;;  %v1504_v4 = vmul.f32 0.5, %v1488_v11  ;;  %v1522_v41 = vld [vmem:[#allocation4 + $0x78] sm:$0xff] }
 0x41f   : > { %1572 = vst [vmem:[#allocation3 + $0x10] sm:$0xff] %v1564_v51  ;;  %v1565_v33 = vpack.c.bf16 %v1553_v19, %v1552_v13  ;;  %v1555_v37 = vadd.f32 %v4503_v35, %v1532_v20  ;;  %v1534_v10 = vsub.f32 %v1502_v24, %v1518_v16  ;;  %v1505_v38 = vmul.f32 0.5, %v1489_v17 }
 0x420   : > { %v1556_v18 = vadd.f32 %v4503_v35, %v1533_v30  ;;  %v1535_v42 = vsub.f32 %v1503_v31, %v1519_v58  ;;  %v1536_v43 = vsub.f32 %v1504_v4, %v1520_v25  ;;  %v1506_v44 = vmul.f32 0.5, %v1490_v26 }
 0x421   : > { %1573 = vst [vmem:[#allocation3 + $0x18] sm:$0xff] %v1565_v33  ;;  %v1566_v21 = vpack.c.bf16 %v1555_v37, %v1554_v28  ;;  %v1557_v45 = vadd.f32 %v4503_v35, %v1534_v10  ;;  %v1537_v46 = vsub.f32 %v1505_v38, %v1521_v32 }
 0x422   : > { %v1558_v29 = vadd.f32 %v4503_v35, %v1535_v42  ;;  %v1559_v47 = vadd.f32 %v4503_v35, %v1536_v43  ;;  %v1538_v48 = vsub.f32 %v1506_v44, %v1522_v41 }
 0x423   : > { %1574 = vst [vmem:[#allocation3 + $0x20] sm:$0xff] %v1566_v21  ;;  %v1567_v50 = vpack.c.bf16 %v1557_v45, %v1556_v18  ;;  %v1560_v52 = vadd.f32 %v4503_v35, %v1537_v46 }
 0x424   : > { %v1568_v22 = vpack.c.bf16 %v1559_v47, %v1558_v29  ;;  %v1561_v53 = vadd.f32 %v4503_v35, %v1538_v48 }
 0x425   : > { %1575 = vst [vmem:[#allocation3 + $0x28] sm:$0xff] %v1567_v50 }
 0x426   : > { %1576 = vst [vmem:[#allocation3 + $0x30] sm:$0xff] %v1568_v22  ;;  %v1569_v39 = vpack.c.bf16 %v1561_v53, %v1560_v52 }
 0x428   : > { %1577 = vst [vmem:[#allocation3 + $0x38] sm:$0xff] %v1569_v39 }
 0x429 PF: > { %p2860_p12 = scmp.lt.s32.totalorder %s4085_s14, 2 }
 0x42a   : > { %v1614_v54 = vld [vmem:[#allocation3] sm:$0xff] (!%p2860_p12)  ;;  %v1615_v49 = vld [vmem:[#allocation3 + $0x8] sm:$0xff] (!%p2860_p12)  ;;  %v1616_v35 = vld [vmem:[#allocation3 + $0x10] sm:$0xff] (!%p2860_p12)  ;;  %s4754_s24 = sld [smem:[#allocation29_spill]] (!%p2860_p12)  ;;  %s4755_s21 = sld [smem:[#allocation30_spill]] (!%p2860_p12) }
 0x42b   : > { %1581 = sbr.rel (%p2860_p12) target bundleno = 1842 (0x732), region = 124  ;;  %3151 = vmatprep.subr.bf16.mxu0 (!%p2860_p12), %v1614_v54  ;;  %3343 = vmatprep.subr.bf16.mxu1 (!%p2860_p12), %v1614_v54  ;;  %v3535_v55 = vld [vmem:[%s4355_s8] sm:$0xff] (!%p2860_p12)   ;;  %v1617_v23 = vld [vmem:[#allocation3 + $0x18] sm:$0xff] (!%p2860_p12)  ;;  %v3536_v34 = vld [vmem:[%s4355_s8 + $0x8] sm:$0xff] (!%p2860_p12)  }
 0x42c   : > { %3152 = vmatpush3.bf16.msra.mxu0 (!%p2860_p12), %v1614_v54  ;;  %3351 = vmatpush3.bf16.msra.mxu1 (!%p2860_p12), %v1614_v54  ;;  %v3543_v56 = vld [vmem:[%s4355_s8 + $0x40] sm:$0xff] (!%p2860_p12)   ;;  %v1619_v59 = vld [vmem:[#allocation3 + $0x28] sm:$0xff] (!%p2860_p12)  ;;  %v3537_v63 = vld [vmem:[%s4355_s8 + $0x10] sm:$0xff] (!%p2860_p12)  }
 0x42d   : > { %3153 = vmatprep.subr.bf16.mxu0 (!%p2860_p12), %v1615_v49  ;;  %3344 = vmatprep.subr.bf16.mxu1 (!%p2860_p12), %v1615_v49  ;;  %v1618_v57 = vld [vmem:[#allocation3 + $0x20] sm:$0xff] (!%p2860_p12)  ;;  %v1620_v60 = vld [vmem:[#allocation3 + $0x30] sm:$0xff] (!%p2860_p12)  ;;  %v3544_v62 = vld [vmem:[%s4355_s8 + $0x48] sm:$0xff] (!%p2860_p12)  }
 0x42e   : > { %3167 = vmatprep.mubr.bf16.mxu0 (!%p2860_p12), %v3535_v55  ;;  %3183 = vmatprep.mubr.bf16.mxu1 (!%p2860_p12), %v3543_v56  ;;  %v3551_v27 = vld [vmem:[#allocation14] sm:$0xff] (!%p2860_p12)   ;;  %v3545_v0 = vld [vmem:[%s4355_s8 + $0x50] sm:$0xff] (!%p2860_p12)   ;;  %v3552_v1 = vld [vmem:[#allocation14 + $0x8] sm:$0xff] (!%p2860_p12)  }
 0x42f   : > { %v1621_v61 = vld [vmem:[#allocation3 + $0x38] sm:$0xff] (!%p2860_p12)  ;;  %v3553_v2 = vld [vmem:[#allocation14 + $0x10] sm:$0xff] (!%p2860_p12)   ;;  %v3539_v6 = vld [vmem:[%s4355_s8 + $0x20] sm:$0xff] (!%p2860_p12)  }
 0x430   : > { %3154 = vmatpush3.bf16.msra.mxu0 (!%p2860_p12), %v1615_v49  ;;  %3352 = vmatpush3.bf16.msra.mxu1 (!%p2860_p12), %v1615_v49  ;;  %v3538_v3 = vld [vmem:[%s4355_s8 + $0x18] sm:$0xff] (!%p2860_p12)   ;;  %v3547_v36 = vld [vmem:[%s4355_s8 + $0x60] sm:$0xff] (!%p2860_p12)   ;;  %v3540_v9 = vld [vmem:[%s4355_s8 + $0x28] sm:$0xff] (!%p2860_p12)  }
 0x431   : > { %3155 = vmatprep.subr.bf16.mxu0 (!%p2860_p12), %v1616_v35  ;;  %3345 = vmatprep.subr.bf16.mxu1 (!%p2860_p12), %v1616_v35  ;;  %v3546_v5 = vld [vmem:[%s4355_s8 + $0x58] sm:$0xff] (!%p2860_p12)   ;;  %v3555_v8 = vld [vmem:[#allocation14 + $0x20] sm:$0xff] (!%p2860_p12)   ;;  %v3548_v40 = vld [vmem:[%s4355_s8 + $0x68] sm:$0xff] (!%p2860_p12)  }
 0x432   : > { %v3554_v7 = vld [vmem:[#allocation14 + $0x18] sm:$0xff]   ;;  %v3541_v11 = vld [vmem:[%s4355_s8 + $0x30] sm:$0xff]   ;;  %v3556_v13 = vld [vmem:[#allocation14 + $0x28] sm:$0xff]  }
 0x433   : > { %v3549_v12 = vld [vmem:[%s4355_s8 + $0x70] sm:$0xff]   ;;  %v3542_v15 = vld [vmem:[%s4355_s8 + $0x38] sm:$0xff]   ;;  %v3559_v51 = vld [vmem:[#allocation15] sm:$0xff]  }
 0x434   : > { %3156 = vmatpush3.bf16.msra.mxu0 %v1616_v35  ;;  %3353 = vmatpush3.bf16.msra.mxu1 %v1616_v35  ;;  %v3557_v14 = vld [vmem:[#allocation14 + $0x30] sm:$0xff]   ;;  %v3550_v16 = vld [vmem:[%s4355_s8 + $0x78] sm:$0xff]   ;;  %v3560_v19 = vld [vmem:[#allocation15 + $0x8] sm:$0xff]  }
 0x435   : > { %3157 = vmatprep.subr.bf16.mxu0 %v1617_v23  ;;  %3346 = vmatprep.subr.bf16.mxu1 %v1617_v23  ;;  %v3558_v17 = vld [vmem:[#allocation14 + $0x38] sm:$0xff]   ;;  %v3561_v20 = vld [vmem:[#allocation15 + $0x10] sm:$0xff]   ;;  %v3563_v58 = vld [vmem:[#allocation15 + $0x20] sm:$0xff]  }
 0x436   : > { %v3562_v24 = vld [vmem:[#allocation15 + $0x18] sm:$0xff]   ;;  %v3564_v25 = vld [vmem:[#allocation15 + $0x28] sm:$0xff]  }
 0x438   : > { %3158 = vmatpush3.bf16.msra.mxu0 %v1617_v23  ;;  %3354 = vmatpush3.bf16.msra.mxu1 %v1617_v23 }
 0x439   : > { %3159 = vmatprep.subr.bf16.mxu0 %v1618_v57  ;;  %3347 = vmatprep.subr.bf16.mxu1 %v1618_v57 }
 0x43c   : > { %3160 = vmatpush3.bf16.msra.mxu0 %v1618_v57  ;;  %3355 = vmatpush3.bf16.msra.mxu1 %v1618_v57 }
 0x43d   : > { %3161 = vmatprep.subr.bf16.mxu0 %v1619_v59  ;;  %3348 = vmatprep.subr.bf16.mxu1 %v1619_v59 }
 0x440   : > { %3162 = vmatpush3.bf16.msra.mxu0 %v1619_v59  ;;  %3356 = vmatpush3.bf16.msra.mxu1 %v1619_v59 }
 0x441   : > { %3163 = vmatprep.subr.bf16.mxu0 %v1620_v60  ;;  %3349 = vmatprep.subr.bf16.mxu1 %v1620_v60 }
 0x444   : > { %3164 = vmatpush3.bf16.msra.mxu0 %v1620_v60  ;;  %3357 = vmatpush3.bf16.msra.mxu1 %v1620_v60 }
 0x445   : > { %3165 = vmatprep.subr.bf16.mxu0 %v1621_v61  ;;  %3350 = vmatprep.subr.bf16.mxu1 %v1621_v61 }
 0x448   : > { %3166 = vmatpush3.bf16.msra.mxu0 %v1621_v61  ;;  %3358 = vmatpush3.bf16.msra.mxu1 %v1621_v61 }
 0x449   : > { %3199 = vmatprep.subr.bf16.mxu1 %v3551_v27  ;;  %3247 = vmatprep.subr.bf16.mxu0 %v3559_v51 }
 0x44b   : > { %3168 = vmatmul.mubr.bf16.vlgmr.msra.gmra.mrb[0].mxu0 %v3536_v34  ;;  %3184 = vmatmul.mubr.bf16.vlgmr.msra.gmra.mrb[0].mxu1 %v3544_v62 }
 0x44c   : > { %3171 = vmatprep.mubr.bf16.mxu0 %v3537_v63  ;;  %3187 = vmatprep.mubr.bf16.mxu1 %v3545_v0 }
 0x44d   : > { %3200 = vmatpush3.bf16.msra.mxu1 %v3551_v27  ;;  %3248 = vmatpush3.bf16.msra.mxu0 %v3559_v51 }
 0x44e   : > { %3201 = vmatprep.subr.bf16.mxu1 %v3552_v1  ;;  %3249 = vmatprep.subr.bf16.mxu0 %v3560_v19 }
 0x451   : > { %3202 = vmatpush3.bf16.msra.mxu1 %v3552_v1  ;;  %3250 = vmatpush3.bf16.msra.mxu0 %v3560_v19 }
 0x452   : > { %3203 = vmatprep.subr.bf16.mxu1 %v3553_v2  ;;  %3251 = vmatprep.subr.bf16.mxu0 %v3561_v20 }
 0x453   : > { %3172 = vmatmul.mubr.bf16.gmra.mrb[4].mxu0 %v3538_v3  ;;  %3188 = vmatmul.mubr.bf16.gmra.mrb[4].mxu1 %v3546_v5 }
 0x454   : > { %3175 = vmatprep.mubr.bf16.mxu0 %v3539_v6  ;;  %3191 = vmatprep.mubr.bf16.mxu1 %v3547_v36 }
 0x455   : > { %3204 = vmatpush3.bf16.msra.mxu1 %v3553_v2  ;;  %3252 = vmatpush3.bf16.msra.mxu0 %v3561_v20 }
 0x456   : > { %3205 = vmatprep.subr.bf16.mxu1 %v3554_v7  ;;  %3253 = vmatprep.subr.bf16.mxu0 %v3562_v24 }
 0x459   : > { %3206 = vmatpush3.bf16.msra.mxu1 %v3554_v7  ;;  %3254 = vmatpush3.bf16.msra.mxu0 %v3562_v24 }
 0x45a   : > { %3207 = vmatprep.subr.bf16.mxu1 %v3555_v8  ;;  %3255 = vmatprep.subr.bf16.mxu0 %v3563_v58 }
 0x45b   : > { %3176 = vmatmul.mubr.bf16.gmra.mrb[8].mxu0 %v3540_v9  ;;  %3192 = vmatmul.mubr.bf16.gmra.mrb[8].mxu1 %v3548_v40  ;;  %v3566_v9 = vld [vmem:[#allocation15 + $0x38] sm:$0xff]   ;;  %v4541_v40 = vld [vmem:[%s4754_s24] ss:$0 sm:$0xff] }
 0x45c   : > { %3179 = vmatprep.mubr.bf16.mxu0 %v3541_v11  ;;  %3195 = vmatprep.mubr.bf16.mxu1 %v3549_v12 }
 0x45d   : > { %3208 = vmatpush3.bf16.msra.mxu1 %v3555_v8  ;;  %3256 = vmatpush3.bf16.msra.mxu0 %v3563_v58  ;;  %v3565_v8 = vld [vmem:[#allocation15 + $0x30] sm:$0xff]  }
 0x45e   : > { %3209 = vmatprep.subr.bf16.mxu1 %v3556_v13  ;;  %3257 = vmatprep.subr.bf16.mxu0 %v3564_v25 }
 0x461   : > { %3210 = vmatpush3.bf16.msra.mxu1 %v3556_v13  ;;  %3258 = vmatpush3.bf16.msra.mxu0 %v3564_v25 }
 0x462   : > { %3211 = vmatprep.subr.bf16.mxu1 %v3557_v14  ;;  %3259 = vmatprep.subr.bf16.mxu0 %v3565_v8 }
 0x463   : > { %3180 = vmatmul.mubr.bf16.gmra.mrb[12].mxu0 %v3542_v15  ;;  %3196 = vmatmul.mubr.bf16.gmra.mrb[12].mxu1 %v3550_v16 }
 0x465   : > { %3212 = vmatpush3.bf16.msra.mxu1 %v3557_v14  ;;  %3260 = vmatpush3.bf16.msra.mxu0 %v3565_v8 }
 0x466   : > { %3213 = vmatprep.subr.bf16.mxu1 %v3558_v17  ;;  %3261 = vmatprep.subr.bf16.mxu0 %v3566_v9 }
 0x469   : > { %3214 = vmatpush3.bf16.msra.mxu1 %v3558_v17  ;;  %3262 = vmatpush3.bf16.msra.mxu0 %v3566_v9 }
 0x51e   : > { %v3169_v26 = vpop.f32.mrb[0].mxu0  ;;  %v3185_v28 = vpop.f32.mrb[0].mxu1 }
 0x51f   : > { %v1752_v30 = vpop.f32.mrb[1].mxu0  ;;  %v1816_v31 = vpop.f32.mrb[1].mxu1 }
 0x520   : > { %v3170_v4 = vpop.f32.mrb[2].mxu0  ;;  %v3186_v32 = vpop.f32.mrb[2].mxu1 }
 0x521   : > { %v1880_v33 = vpack.c.bf16 %v3170_v4, %v3169_v26  ;;  %v1755_v37 = vpop.f32.mrb[3].mxu0  ;;  %v1888_v10 = vpack.c.bf16 %v3186_v32, %v3185_v28  ;;  %v1819_v38 = vpop.f32.mrb[3].mxu1 }
 0x522   : > { %v1879_v41 = vpack.c.bf16 %v1755_v37, %v1752_v30  ;;  %v1887_v18 = vpack.c.bf16 %v1819_v38, %v1816_v31 }
 0x524   : > { %3215 = vmatprep.mubr.bf16.mxu1 %v1879_v41 }
 0x525   : > { %3216 = vmatmul.mubr.bf16.vlgmr.msra.gmra.mrb[16].mxu1 %v1880_v33 }
 0x526   : > { %v3173_v42 = vpop.f32.mrb[4].mxu0  ;;  %v3189_v43 = vpop.f32.mrb[4].mxu1 }
 0x527   : > { %v1768_v44 = vpop.f32.mrb[5].mxu0  ;;  %v1832_v21 = vpop.f32.mrb[5].mxu1 }
 0x528   : > { %v3174_v45 = vpop.f32.mrb[6].mxu0  ;;  %v3190_v46 = vpop.f32.mrb[6].mxu1 }
 0x529   : > { %v1882_v29 = vpack.c.bf16 %v3174_v45, %v3173_v42  ;;  %v1771_v47 = vpop.f32.mrb[7].mxu0  ;;  %v1890_v48 = vpack.c.bf16 %v3190_v46, %v3189_v43  ;;  %v1835_v50 = vpop.f32.mrb[7].mxu1 }
 0x52a   : > { %v1881_v52 = vpack.c.bf16 %v1771_v47, %v1768_v44  ;;  %v1889_v22 = vpack.c.bf16 %v1835_v50, %v1832_v21 }
 0x52c   : > { %3219 = vmatprep.mubr.bf16.mxu1 %v1881_v52 }
 0x52d   : > { %3220 = vmatmul.mubr.bf16.gmra.mrb[20].mxu1 %v1882_v29 }
 0x52e   : > { %v3177_v53 = vpop.f32.mrb[8].mxu0  ;;  %v3193_v39 = vpop.f32.mrb[8].mxu1 }
 0x52f   : > { %v1784_v54 = vpop.f32.mrb[9].mxu0  ;;  %v1848_v49 = vpop.f32.mrb[9].mxu1 }
 0x530   : > { %v3178_v55 = vpop.f32.mrb[10].mxu0  ;;  %v3194_v35 = vpop.f32.mrb[10].mxu1 }
 0x531   : > { %v1884_v23 = vpack.c.bf16 %v3178_v55, %v3177_v53  ;;  %v1787_v56 = vpop.f32.mrb[11].mxu0  ;;  %v1892_v57 = vpack.c.bf16 %v3194_v35, %v3193_v39  ;;  %v1851_v59 = vpop.f32.mrb[11].mxu1 }
 0x532   : > { %v1883_v60 = vpack.c.bf16 %v1787_v56, %v1784_v54  ;;  %v1891_v61 = vpack.c.bf16 %v1851_v59, %v1848_v49 }
 0x534   : > { %3223 = vmatprep.mubr.bf16.mxu1 %v1883_v60 }
 0x535   : > { %3224 = vmatmul.mubr.bf16.gmra.mrb[24].mxu1 %v1884_v23 }
 0x536   : > { %v3181_v27 = vpop.f32.mrb[12].mxu0  ;;  %v3197_v34 = vpop.f32.mrb[12].mxu1 }
 0x537   : > { %v1800_v62 = vpop.f32.mrb[13].mxu0  ;;  %v1864_v63 = vpop.f32.mrb[13].mxu1 }
 0x538   : > { %v3182_v0 = vpop.f32.mrb[14].mxu0  ;;  %v3198_v1 = vpop.f32.mrb[14].mxu1 }
 0x539   : > { %v1886_v2 = vpack.c.bf16 %v3182_v0, %v3181_v27  ;;  %v1803_v3 = vpop.f32.mrb[15].mxu0  ;;  %v1894_v5 = vpack.c.bf16 %v3198_v1, %v3197_v34  ;;  %v1867_v6 = vpop.f32.mrb[15].mxu1 }
 0x53a   : > { %v1885_v36 = vpack.c.bf16 %v1803_v3, %v1800_v62  ;;  %v1893_v7 = vpack.c.bf16 %v1867_v6, %v1864_v63 }
 0x53c   : > { %3227 = vmatprep.mubr.bf16.mxu1 %v1885_v36 }
 0x53d   : > { %3228 = vmatmul.mubr.bf16.gmra.mrb[28].mxu1 %v1886_v2 }
 0x53e   : > { %3231 = vmatprep.mubr.bf16.mxu1 %v1887_v18 }
 0x545   : > { %3232 = vmatmul.mubr.bf16.gmra.mrb[32].mxu1 %v1888_v10 }
 0x546   : > { %3235 = vmatprep.mubr.bf16.mxu1 %v1889_v22 }
 0x54d   : > { %3236 = vmatmul.mubr.bf16.gmra.mrb[36].mxu1 %v1890_v48 }
 0x54e   : > { %3239 = vmatprep.mubr.bf16.mxu1 %v1891_v61 }
 0x555   : > { %3240 = vmatmul.mubr.bf16.gmra.mrb[40].mxu1 %v1892_v57 }
 0x556   : > { %3243 = vmatprep.mubr.bf16.mxu1 %v1893_v7 }
 0x55d   : > { %3244 = vmatmul.mubr.bf16.gmra.mrb[44].mxu1 %v1894_v5 }
 0x5f8   : > { %v3217_v11 = vpop.f32.mrb[16].mxu1 }
 0x5f9   : > { %v2009_v12 = vadd.f32 %v3217_v11, %v4541_v40  ;;  %v2000_v13 = vpop.f32.mrb[17].mxu1 }
 0x5fa   : > { %v2001_v14 = vadd.f32 %v4541_v40, %v2000_v13  ;;  %v3218_v15 = vpop.f32.mrb[18].mxu1 }
 0x5fb   : > { %v2012_v16 = vadd.f32 %v3218_v15, %v4541_v40  ;;  %v2003_v17 = vpop.f32.mrb[19].mxu1  ;;  %v2129_v19 = vmax.f32 %v2009_v12, 0.0 }
 0x5fc   : > { %v2004_v51 = vadd.f32 %v4541_v40, %v2003_v17  ;;  %v2127_v24 = vmax.f32 %v2001_v14, 0.0 }
 0x5fd   : > { %v2130_v20 = vmax.f32 %v2012_v16, 0.0 }
 0x5fe   : > { %v2128_v58 = vmax.f32 %v2004_v51, 0.0 }
 0x5ff   : > { %v2160_v25 = vpack.c.bf16 %v2130_v20, %v2129_v19 }
 0x600   : > { %v2159_v26 = vpack.c.bf16 %v2128_v58, %v2127_v24  ;;  %v3221_v28 = vpop.f32.mrb[20].mxu1 }
 0x601   : > { %v2025_v30 = vadd.f32 %v3221_v28, %v4541_v40  ;;  %v2016_v31 = vpop.f32.mrb[21].mxu1 }
 0x602   : > { %v2017_v4 = vadd.f32 %v4541_v40, %v2016_v31  ;;  %v3222_v32 = vpop.f32.mrb[22].mxu1  ;;  %3263 = vmatprep.mubr.bf16.mxu0 %v2159_v26 }
 0x603   : > { %v2028_v33 = vadd.f32 %v3222_v32, %v4541_v40  ;;  %v2019_v37 = vpop.f32.mrb[23].mxu1  ;;  %3264 = vmatmul.mubr.bf16.vlgmr.msra.gmra.mrb[16].mxu0 %v2160_v25  ;;  %v2133_v38 = vmax.f32 %v2025_v30, 0.0 }
 0x604   : > { %v2020_v10 = vadd.f32 %v4541_v40, %v2019_v37  ;;  %v2131_v18 = vmax.f32 %v2017_v4, 0.0 }
 0x605   : > { %v2134_v41 = vmax.f32 %v2028_v33, 0.0 }
 0x606   : > { %v2132_v42 = vmax.f32 %v2020_v10, 0.0 }
 0x607   : > { %v2162_v43 = vpack.c.bf16 %v2134_v41, %v2133_v38 }
 0x608   : > { %v2161_v44 = vpack.c.bf16 %v2132_v42, %v2131_v18  ;;  %v3225_v21 = vpop.f32.mrb[24].mxu1 }
 0x609   : > { %v2041_v45 = vadd.f32 %v3225_v21, %v4541_v40  ;;  %v2032_v46 = vpop.f32.mrb[25].mxu1 }
 0x60a   : > { %v2033_v29 = vadd.f32 %v4541_v40, %v2032_v46  ;;  %v3226_v47 = vpop.f32.mrb[26].mxu1  ;;  %3267 = vmatprep.mubr.bf16.mxu0 %v2161_v44 }
 0x60b   : > { %v2044_v48 = vadd.f32 %v3226_v47, %v4541_v40  ;;  %v2035_v50 = vpop.f32.mrb[27].mxu1  ;;  %3268 = vmatmul.mubr.bf16.gmra.mrb[20].mxu0 %v2162_v43  ;;  %v2137_v22 = vmax.f32 %v2041_v45, 0.0 }
 0x60c   : > { %v2036_v52 = vadd.f32 %v4541_v40, %v2035_v50  ;;  %v2135_v39 = vmax.f32 %v2033_v29, 0.0 }
 0x60d   : > { %v2138_v53 = vmax.f32 %v2044_v48, 0.0 }
 0x60e   : > { %v2136_v54 = vmax.f32 %v2036_v52, 0.0 }
 0x60f   : > { %v2164_v49 = vpack.c.bf16 %v2138_v53, %v2137_v22 }
 0x610   : > { %v2163_v55 = vpack.c.bf16 %v2136_v54, %v2135_v39  ;;  %v3229_v35 = vpop.f32.mrb[28].mxu1 }
 0x611   : > { %v2057_v23 = vadd.f32 %v3229_v35, %v4541_v40  ;;  %v2048_v56 = vpop.f32.mrb[29].mxu1 }
 0x612   : > { %v2049_v57 = vadd.f32 %v4541_v40, %v2048_v56  ;;  %v3230_v59 = vpop.f32.mrb[30].mxu1  ;;  %3271 = vmatprep.mubr.bf16.mxu0 %v2163_v55 }
 0x613   : > { %v2060_v60 = vadd.f32 %v3230_v59, %v4541_v40  ;;  %v2051_v61 = vpop.f32.mrb[31].mxu1  ;;  %3272 = vmatmul.mubr.bf16.gmra.mrb[24].mxu0 %v2164_v49  ;;  %v2141_v34 = vmax.f32 %v2057_v23, 0.0 }
 0x614   : > { %v2052_v27 = vadd.f32 %v4541_v40, %v2051_v61  ;;  %v2139_v63 = vmax.f32 %v2049_v57, 0.0 }
 0x615   : > { %v2142_v62 = vmax.f32 %v2060_v60, 0.0 }
 0x616   : > { %v2140_v0 = vmax.f32 %v2052_v27, 0.0  ;;  %v4578_v27 = vld [vmem:[%s4755_s21] ss:$0 sm:$0xff] }
 0x617   : > { %v2166_v1 = vpack.c.bf16 %v2142_v62, %v2141_v34 }
 0x618   : > { %v2165_v2 = vpack.c.bf16 %v2140_v0, %v2139_v63  ;;  %v3233_v3 = vpop.f32.mrb[32].mxu1 }
 0x619   : > { %v2073_v5 = vadd.f32 %v3233_v3, %v4541_v40  ;;  %v2064_v6 = vpop.f32.mrb[33].mxu1 }
 0x61a   : > { %v2065_v36 = vadd.f32 %v4541_v40, %v2064_v6  ;;  %v3234_v7 = vpop.f32.mrb[34].mxu1  ;;  %3275 = vmatprep.mubr.bf16.mxu0 %v2165_v2 }
 0x61b   : > { %v2076_v8 = vadd.f32 %v3234_v7, %v4541_v40  ;;  %v2067_v9 = vpop.f32.mrb[35].mxu1  ;;  %3276 = vmatmul.mubr.bf16.gmra.mrb[28].mxu0 %v2166_v1  ;;  %v2145_v12 = vmax.f32 %v2073_v5, 0.0 }
 0x61c   : > { %v2068_v11 = vadd.f32 %v4541_v40, %v2067_v9  ;;  %v2143_v14 = vmax.f32 %v2065_v36, 0.0 }
 0x61d   : > { %v2146_v13 = vmax.f32 %v2076_v8, 0.0 }
 0x61e   : > { %v2144_v15 = vmax.f32 %v2068_v11, 0.0 }
 0x61f   : > { %v2168_v16 = vpack.c.bf16 %v2146_v13, %v2145_v12 }
 0x620   : > { %v2167_v17 = vpack.c.bf16 %v2144_v15, %v2143_v14  ;;  %v3237_v51 = vpop.f32.mrb[36].mxu1 }
 0x621   : > { %v2089_v19 = vadd.f32 %v3237_v51, %v4541_v40  ;;  %v2080_v20 = vpop.f32.mrb[37].mxu1 }
 0x622   : > { %v2081_v24 = vadd.f32 %v4541_v40, %v2080_v20  ;;  %v3238_v58 = vpop.f32.mrb[38].mxu1  ;;  %3279 = vmatprep.mubr.bf16.mxu0 %v2167_v17 }
 0x623   : > { %v2092_v25 = vadd.f32 %v3238_v58, %v4541_v40  ;;  %v2083_v26 = vpop.f32.mrb[39].mxu1  ;;  %3280 = vmatmul.mubr.bf16.gmra.mrb[32].mxu0 %v2168_v16  ;;  %v2149_v30 = vmax.f32 %v2089_v19, 0.0 }
 0x624   : > { %v2084_v28 = vadd.f32 %v4541_v40, %v2083_v26  ;;  %v2147_v4 = vmax.f32 %v2081_v24, 0.0 }
 0x625   : > { %v2150_v31 = vmax.f32 %v2092_v25, 0.0 }
 0x626   : > { %v2148_v32 = vmax.f32 %v2084_v28, 0.0 }
 0x627   : > { %v2170_v33 = vpack.c.bf16 %v2150_v31, %v2149_v30 }
 0x628   : > { %v2169_v37 = vpack.c.bf16 %v2148_v32, %v2147_v4  ;;  %v3241_v10 = vpop.f32.mrb[40].mxu1 }
 0x629   : > { %v2105_v38 = vadd.f32 %v3241_v10, %v4541_v40  ;;  %v2096_v41 = vpop.f32.mrb[41].mxu1 }
 0x62a   : > { %v2097_v18 = vadd.f32 %v4541_v40, %v2096_v41  ;;  %v3242_v42 = vpop.f32.mrb[42].mxu1  ;;  %3283 = vmatprep.mubr.bf16.mxu0 %v2169_v37 }
 0x62b   : > { %v2108_v43 = vadd.f32 %v3242_v42, %v4541_v40  ;;  %v2099_v44 = vpop.f32.mrb[43].mxu1  ;;  %3284 = vmatmul.mubr.bf16.gmra.mrb[36].mxu0 %v2170_v33  ;;  %v2153_v45 = vmax.f32 %v2105_v38, 0.0 }
 0x62c   : > { %v2100_v21 = vadd.f32 %v4541_v40, %v2099_v44  ;;  %v2151_v29 = vmax.f32 %v2097_v18, 0.0 }
 0x62d   : > { %v2154_v46 = vmax.f32 %v2108_v43, 0.0 }
 0x62e   : > { %v2152_v47 = vmax.f32 %v2100_v21, 0.0 }
 0x62f   : > { %v2172_v48 = vpack.c.bf16 %v2154_v46, %v2153_v45 }
 0x630   : > { %v2171_v50 = vpack.c.bf16 %v2152_v47, %v2151_v29  ;;  %v3245_v52 = vpop.f32.mrb[44].mxu1 }
 0x631   : > { %v2121_v22 = vadd.f32 %v3245_v52, %v4541_v40  ;;  %v2112_v53 = vpop.f32.mrb[45].mxu1 }
 0x632   : > { %v2113_v39 = vadd.f32 %v4541_v40, %v2112_v53  ;;  %v3246_v54 = vpop.f32.mrb[46].mxu1  ;;  %3287 = vmatprep.mubr.bf16.mxu0 %v2171_v50 }
 0x633   : > { %v2124_v49 = vadd.f32 %v3246_v54, %v4541_v40  ;;  %v2115_v55 = vpop.f32.mrb[47].mxu1  ;;  %3288 = vmatmul.mubr.bf16.gmra.mrb[40].mxu0 %v2172_v48  ;;  %v2157_v23 = vmax.f32 %v2121_v22, 0.0 }
 0x634   : > { %v2116_v35 = vadd.f32 %v4541_v40, %v2115_v55  ;;  %v2155_v57 = vmax.f32 %v2113_v39, 0.0 }
 0x635   : > { %v2158_v56 = vmax.f32 %v2124_v49, 0.0 }
 0x636   : > { %v2156_v59 = vmax.f32 %v2116_v35, 0.0 }
 0x637   : > { %v2174_v60 = vpack.c.bf16 %v2158_v56, %v2157_v23 }
 0x638   : > { %v2173_v61 = vpack.c.bf16 %v2156_v59, %v2155_v57 }
 0x63a   : > { %3291 = vmatprep.mubr.bf16.mxu0 %v2173_v61 }
 0x63b   : > { %3292 = vmatmul.mubr.bf16.gmra.mrb[44].mxu0 %v2174_v60 }
 0x6d6   : > { %v3265_v34 = vpop.f32.mrb[16].mxu0 }
 0x6d7   : > { %v2289_v62 = vadd.f32 %v3265_v34, %v4578_v27  ;;  %v2280_v63 = vpop.f32.mrb[17].mxu0 }
 0x6d8   : > { %v2281_v0 = vadd.f32 %v4578_v27, %v2280_v63  ;;  %v3266_v40 = vpop.f32.mrb[18].mxu0 }
 0x6d9   : > { %v2897_v1 = vmul.f32 -1.442695, %v2289_v62  ;;  %v2292_v2 = vadd.f32 %v3266_v40, %v4578_v27  ;;  %v2283_v3 = vpop.f32.mrb[19].mxu0 }
 0x6da   : > { %v2895_v5 = vmul.f32 -1.442695, %v2281_v0  ;;  %v2284_v6 = vadd.f32 %v4578_v27, %v2283_v3 }
 0x6db   : > { %3567 = vpow2.f32 %v2897_v1  ;;  %v2898_v36 = vmul.f32 -1.442695, %v2292_v2 }
 0x6dc   : > { %3569 = vpow2.f32 %v2895_v5  ;;  %v2896_v7 = vmul.f32 -1.442695, %v2284_v6 }
 0x6dd   : > { %3571 = vpow2.f32 %v2898_v36 }
 0x6de   : > { %3573 = vpow2.f32 %v2896_v7  ;;  %v3269_v8 = vpop.f32.mrb[20].mxu0 }
 0x6df   : > { %v2305_v9 = vadd.f32 %v3269_v8, %v4578_v27  ;;  %v2296_v11 = vpop.f32.mrb[21].mxu0 }
 0x6e0   : > { %v2297_v12 = vadd.f32 %v4578_v27, %v2296_v11  ;;  %v3270_v13 = vpop.f32.mrb[22].mxu0 }
 0x6e1   : > { %v2901_v14 = vmul.f32 -1.442695, %v2305_v9  ;;  %v2308_v15 = vadd.f32 %v3270_v13, %v4578_v27  ;;  %v2299_v16 = vpop.f32.mrb[23].mxu0 }
 0x6e2   : > { %v2899_v17 = vmul.f32 -1.442695, %v2297_v12  ;;  %v2300_v51 = vadd.f32 %v4578_v27, %v2299_v16 }
 0x6e3   : > { %3575 = vpow2.f32 %v2901_v14  ;;  %v2902_v19 = vmul.f32 -1.442695, %v2308_v15 }
 0x6e4   : > { %3577 = vpow2.f32 %v2899_v17  ;;  %v2900_v20 = vmul.f32 -1.442695, %v2300_v51 }
 0x6e5   : > { %v3568_v24 = vpop.eup %3567  ;;  %3579 = vpow2.f32 %v2902_v19 }
 0x6e6   : > { %v3570_v58 = vpop.eup %3569  ;;  %v2505_v25 = vadd.f32 1.0, %v3568_v24  ;;  %3581 = vpow2.f32 %v2900_v20  ;;  %v3273_v26 = vpop.f32.mrb[24].mxu0 }
 0x6e7   : > { %v3572_v28 = vpop.eup %3571  ;;  %v2503_v30 = vadd.f32 1.0, %v3570_v58  ;;  %v2321_v31 = vadd.f32 %v3273_v26, %v4578_v27  ;;  %v2312_v4 = vpop.f32.mrb[25].mxu0 }
 0x6e8   : > { %v3574_v32 = vpop.eup %3573  ;;  %3583 = vrcp.f32 %v2505_v25  ;;  %v2506_v33 = vadd.f32 1.0, %v3572_v28  ;;  %v2313_v37 = vadd.f32 %v4578_v27, %v2312_v4  ;;  %v3274_v10 = vpop.f32.mrb[26].mxu0 }
 0x6e9   : > { %3585 = vrcp.f32 %v2503_v30  ;;  %v2504_v38 = vadd.f32 1.0, %v3574_v32  ;;  %v2905_v41 = vmul.f32 -1.442695, %v2321_v31  ;;  %v2324_v18 = vadd.f32 %v3274_v10, %v4578_v27  ;;  %v2315_v42 = vpop.f32.mrb[27].mxu0 }
 0x6ea   : > { %3587 = vrcp.f32 %v2506_v33  ;;  %v2903_v43 = vmul.f32 -1.442695, %v2313_v37  ;;  %v2316_v44 = vadd.f32 %v4578_v27, %v2315_v42 }
 0x6eb   : > { %3589 = vrcp.f32 %v2504_v38  ;;  %v2906_v21 = vmul.f32 -1.442695, %v2324_v18 }
 0x6ec   : > { %3591 = vpow2.f32 %v2905_v41  ;;  %v2904_v45 = vmul.f32 -1.442695, %v2316_v44 }
 0x6ed   : > { %v3576_v46 = vpop.eup %3575  ;;  %3593 = vpow2.f32 %v2903_v43 }
 0x6ee   : > { %v3578_v29 = vpop.eup %3577  ;;  %v2509_v47 = vadd.f32 1.0, %v3576_v46  ;;  %3595 = vpow2.f32 %v2906_v21  ;;  %v3277_v48 = vpop.f32.mrb[28].mxu0 }
 0x6ef   : > { %v3580_v50 = vpop.eup %3579  ;;  %v2507_v52 = vadd.f32 1.0, %v3578_v29  ;;  %3597 = vpow2.f32 %v2904_v45  ;;  %v2337_v22 = vadd.f32 %v3277_v48, %v4578_v27  ;;  %v2328_v53 = vpop.f32.mrb[29].mxu0 }
 0x6f0   : > { %v3582_v39 = vpop.eup %3581  ;;  %3599 = vrcp.f32 %v2509_v47  ;;  %v2510_v54 = vadd.f32 1.0, %v3580_v50  ;;  %v2329_v49 = vadd.f32 %v4578_v27, %v2328_v53  ;;  %v3278_v55 = vpop.f32.mrb[30].mxu0 }
 0x6f1   : > { %3601 = vrcp.f32 %v2507_v52  ;;  %v2508_v35 = vadd.f32 1.0, %v3582_v39  ;;  %v2909_v23 = vmul.f32 -1.442695, %v2337_v22  ;;  %v2340_v56 = vadd.f32 %v3278_v55, %v4578_v27  ;;  %v2331_v57 = vpop.f32.mrb[31].mxu0 }
 0x6f2   : > { %v3584_v59 = vpop.eup %3583  ;;  %3603 = vrcp.f32 %v2510_v54  ;;  %v2907_v60 = vmul.f32 -1.442695, %v2329_v49  ;;  %v2332_v61 = vadd.f32 %v4578_v27, %v2331_v57 }
 0x6f3   : > { %v3586_v34 = vpop.eup %3585  ;;  %2601 = vst [vmem:[%s4374_s30 + $0x10] sm:$0xff] %v3584_v59  ;;  %3605 = vrcp.f32 %v2508_v35  ;;  %v2910_v62 = vmul.f32 -1.442695, %v2340_v56 }
 0x6f4   : > { %v3588_v63 = vpop.eup %3587  ;;  %2599 = vst [vmem:[%s4374_s30] sm:$0xff] %v3586_v34  ;;  %3607 = vpow2.f32 %v2909_v23  ;;  %v2908_v0 = vmul.f32 -1.442695, %v2332_v61 }
 0x6f5   : > { %v3590_v40 = vpop.eup %3589  ;;  %2602 = vst [vmem:[%s4374_s30 + $0x18] sm:$0xff] %v3588_v63  ;;  %3609 = vpow2.f32 %v2907_v60 }
 0x6f6   : > { %v3592_v1 = vpop.eup %3591  ;;  %2600 = vst [vmem:[%s4374_s30 + $0x8] sm:$0xff] %v3590_v40  ;;  %3611 = vpow2.f32 %v2910_v62  ;;  %v3281_v2 = vpop.f32.mrb[32].mxu0 }
 0x6f7   : > { %v3594_v3 = vpop.eup %3593  ;;  %v2513_v5 = vadd.f32 1.0, %v3592_v1  ;;  %3613 = vpow2.f32 %v2908_v0  ;;  %v2353_v6 = vadd.f32 %v3281_v2, %v4578_v27  ;;  %v2344_v36 = vpop.f32.mrb[33].mxu0 }
 0x6f8   : > { %v3596_v7 = vpop.eup %3595  ;;  %v2511_v8 = vadd.f32 1.0, %v3594_v3  ;;  %v2345_v9 = vadd.f32 %v4578_v27, %v2344_v36  ;;  %v3282_v11 = vpop.f32.mrb[34].mxu0 }
 0x6f9   : > { %v3598_v12 = vpop.eup %3597  ;;  %3615 = vrcp.f32 %v2513_v5  ;;  %v2514_v13 = vadd.f32 1.0, %v3596_v7  ;;  %v2913_v14 = vmul.f32 -1.442695, %v2353_v6  ;;  %v2356_v15 = vadd.f32 %v3282_v11, %v4578_v27  ;;  %v2347_v16 = vpop.f32.mrb[35].mxu0 }
 0x6fa   : > { %v3600_v17 = vpop.eup %3599  ;;  %3617 = vrcp.f32 %v2511_v8  ;;  %v2512_v51 = vadd.f32 1.0, %v3598_v12  ;;  %v2911_v19 = vmul.f32 -1.442695, %v2345_v9  ;;  %v2348_v20 = vadd.f32 %v4578_v27, %v2347_v16 }
 0x6fb   : > { %v3602_v24 = vpop.eup %3601  ;;  %2605 = vst [vmem:[%s4374_s30 + $0x30] sm:$0xff] %v3600_v17  ;;  %3619 = vrcp.f32 %v2514_v13  ;;  %v2914_v58 = vmul.f32 -1.442695, %v2356_v15 }
 0x6fc   : > { %v3604_v25 = vpop.eup %3603  ;;  %2603 = vst [vmem:[%s4374_s30 + $0x20] sm:$0xff] %v3602_v24  ;;  %3621 = vrcp.f32 %v2512_v51  ;;  %v2912_v26 = vmul.f32 -1.442695, %v2348_v20 }
 0x6fd   : > { %v3606_v28 = vpop.eup %3605  ;;  %2606 = vst [vmem:[%s4374_s30 + $0x38] sm:$0xff] %v3604_v25  ;;  %3623 = vpow2.f32 %v2913_v14 }
 0x6fe   : > { %v3608_v30 = vpop.eup %3607  ;;  %2604 = vst [vmem:[%s4374_s30 + $0x28] sm:$0xff] %v3606_v28  ;;  %3625 = vpow2.f32 %v2911_v19  ;;  %v3285_v31 = vpop.f32.mrb[36].mxu0 }
 0x6ff   : > { %v3610_v4 = vpop.eup %3609  ;;  %v2517_v32 = vadd.f32 1.0, %v3608_v30  ;;  %3627 = vpow2.f32 %v2914_v58  ;;  %v2369_v33 = vadd.f32 %v3285_v31, %v4578_v27  ;;  %v2360_v37 = vpop.f32.mrb[37].mxu0 }
 0x700   : > { %v3612_v10 = vpop.eup %3611  ;;  %v2515_v38 = vadd.f32 1.0, %v3610_v4  ;;  %3629 = vpow2.f32 %v2912_v26  ;;  %v2361_v41 = vadd.f32 %v4578_v27, %v2360_v37  ;;  %v3286_v18 = vpop.f32.mrb[38].mxu0 }
 0x701   : > { %v3614_v42 = vpop.eup %3613  ;;  %3631 = vrcp.f32 %v2517_v32  ;;  %v2518_v43 = vadd.f32 1.0, %v3612_v10  ;;  %v2917_v44 = vmul.f32 -1.442695, %v2369_v33  ;;  %v2372_v21 = vadd.f32 %v3286_v18, %v4578_v27  ;;  %v2363_v45 = vpop.f32.mrb[39].mxu0 }
 0x702   : > { %3633 = vrcp.f32 %v2515_v38  ;;  %v2516_v46 = vadd.f32 1.0, %v3614_v42  ;;  %v2915_v29 = vmul.f32 -1.442695, %v2361_v41  ;;  %v2364_v47 = vadd.f32 %v4578_v27, %v2363_v45 }
 0x703   : > { %v3616_v48 = vpop.eup %3615  ;;  %3635 = vrcp.f32 %v2518_v43  ;;  %v2918_v50 = vmul.f32 -1.442695, %v2372_v21 }
 0x704   : > { %v3618_v52 = vpop.eup %3617  ;;  %2609 = vst [vmem:[%s4374_s30 + $0x50] sm:$0xff] %v3616_v48  ;;  %3637 = vrcp.f32 %v2516_v46  ;;  %v2916_v22 = vmul.f32 -1.442695, %v2364_v47 }
 0x705   : > { %v3620_v53 = vpop.eup %3619  ;;  %2607 = vst [vmem:[%s4374_s30 + $0x40] sm:$0xff] %v3618_v52  ;;  %3639 = vpow2.f32 %v2917_v44 }
 0x706   : > { %v3622_v39 = vpop.eup %3621  ;;  %2610 = vst [vmem:[%s4374_s30 + $0x58] sm:$0xff] %v3620_v53  ;;  %3641 = vpow2.f32 %v2915_v29  ;;  %v3289_v54 = vpop.f32.mrb[40].mxu0 }
 0x707   : > { %v3624_v49 = vpop.eup %3623  ;;  %2608 = vst [vmem:[%s4374_s30 + $0x48] sm:$0xff] %v3622_v39  ;;  %3643 = vpow2.f32 %v2918_v50  ;;  %v2385_v55 = vadd.f32 %v3289_v54, %v4578_v27  ;;  %v2376_v35 = vpop.f32.mrb[41].mxu0 }
 0x708   : > { %v3626_v23 = vpop.eup %3625  ;;  %v2521_v56 = vadd.f32 1.0, %v3624_v49  ;;  %3645 = vpow2.f32 %v2916_v22  ;;  %v2377_v57 = vadd.f32 %v4578_v27, %v2376_v35  ;;  %v3290_v59 = vpop.f32.mrb[42].mxu0 }
 0x709   : > { %v3628_v60 = vpop.eup %3627  ;;  %v2519_v61 = vadd.f32 1.0, %v3626_v23  ;;  %v2388_v34 = vadd.f32 %v3290_v59, %v4578_v27  ;;  %v2379_v62 = vpop.f32.mrb[43].mxu0  ;;  %v2921_v40 = vmul.f32 -1.442695, %v2385_v55 }
 0x70a   : > { %v3630_v63 = vpop.eup %3629  ;;  %3647 = vrcp.f32 %v2521_v56  ;;  %v2522_v0 = vadd.f32 1.0, %v3628_v60  ;;  %v2380_v1 = vadd.f32 %v4578_v27, %v2379_v62  ;;  %v2919_v5 = vmul.f32 -1.442695, %v2377_v57 }
 0x70b   : > { %v3632_v2 = vpop.eup %3631  ;;  %3649 = vrcp.f32 %v2519_v61  ;;  %v2520_v3 = vadd.f32 1.0, %v3630_v63  ;;  %v2922_v36 = vmul.f32 -1.442695, %v2388_v34 }
 0x70c   : > { %v3634_v6 = vpop.eup %3633  ;;  %2613 = vst [vmem:[%s4374_s30 + $0x70] sm:$0xff] %v3632_v2  ;;  %3651 = vrcp.f32 %v2522_v0  ;;  %v2920_v8 = vmul.f32 -1.442695, %v2380_v1 }
 0x70d   : > { %v3636_v7 = vpop.eup %3635  ;;  %2611 = vst [vmem:[%s4374_s30 + $0x60] sm:$0xff] %v3634_v6  ;;  %3653 = vrcp.f32 %v2520_v3 }
 0x70e   : > { %v3638_v9 = vpop.eup %3637  ;;  %2614 = vst [vmem:[%s4374_s30 + $0x78] sm:$0xff] %v3636_v7  ;;  %3655 = vpow2.f32 %v2921_v40  ;;  %v3293_v11 = vpop.f32.mrb[44].mxu0 }
 0x70f   : > { %v3640_v12 = vpop.eup %3639  ;;  %2612 = vst [vmem:[%s4374_s30 + $0x68] sm:$0xff] %v3638_v9  ;;  %3657 = vpow2.f32 %v2919_v5  ;;  %v2401_v13 = vadd.f32 %v3293_v11, %v4578_v27  ;;  %v2392_v14 = vpop.f32.mrb[45].mxu0 }
 0x710   : > { %v3642_v15 = vpop.eup %3641  ;;  %v2525_v16 = vadd.f32 1.0, %v3640_v12  ;;  %3659 = vpow2.f32 %v2922_v36  ;;  %v2393_v17 = vadd.f32 %v4578_v27, %v2392_v14  ;;  %v3294_v51 = vpop.f32.mrb[46].mxu0 }
 0x711   : > { %v3644_v19 = vpop.eup %3643  ;;  %v2523_v20 = vadd.f32 1.0, %v3642_v15  ;;  %3661 = vpow2.f32 %v2920_v8  ;;  %v2404_v24 = vadd.f32 %v3294_v51, %v4578_v27  ;;  %v2395_v58 = vpop.f32.mrb[47].mxu0  ;;  %v2925_v28 = vmul.f32 -1.442695, %v2401_v13 }
 0x712   : > { %v3646_v25 = vpop.eup %3645  ;;  %3663 = vrcp.f32 %v2525_v16  ;;  %v2526_v26 = vadd.f32 1.0, %v3644_v19  ;;  %v2396_v30 = vadd.f32 %v4578_v27, %v2395_v58  ;;  %v2923_v4 = vmul.f32 -1.442695, %v2393_v17 }
 0x713   : > { %3665 = vrcp.f32 %v2523_v20  ;;  %v2524_v31 = vadd.f32 1.0, %v3646_v25  ;;  %v2926_v33 = vmul.f32 -1.442695, %v2404_v24 }
 0x714   : > { %v3648_v32 = vpop.eup %3647  ;;  %3667 = vrcp.f32 %v2526_v26  ;;  %v2924_v10 = vmul.f32 -1.442695, %v2396_v30 }
 0x715   : > { %v3650_v37 = vpop.eup %3649  ;;  %2617 = vst [vmem:[%s4374_s30 + $0x90] sm:$0xff] %v3648_v32  ;;  %3669 = vrcp.f32 %v2524_v31 }
 0x716   : > { %v3652_v38 = vpop.eup %3651  ;;  %2615 = vst [vmem:[%s4374_s30 + $0x80] sm:$0xff] %v3650_v37  ;;  %3671 = vpow2.f32 %v2925_v28 }
 0x717   : > { %v3654_v41 = vpop.eup %3653  ;;  %2618 = vst [vmem:[%s4374_s30 + $0x98] sm:$0xff] %v3652_v38  ;;  %3673 = vpow2.f32 %v2923_v4 }
 0x718   : > { %v3656_v18 = vpop.eup %3655  ;;  %2616 = vst [vmem:[%s4374_s30 + $0x88] sm:$0xff] %v3654_v41  ;;  %3675 = vpow2.f32 %v2926_v33 }
 0x719   : > { %v3658_v27 = vpop.eup %3657  ;;  %v2529_v42 = vadd.f32 1.0, %v3656_v18  ;;  %3677 = vpow2.f32 %v2924_v10 }
 0x71a   : > { %v3660_v43 = vpop.eup %3659  ;;  %v2527_v44 = vadd.f32 1.0, %v3658_v27 }
 0x71b   : > { %v3662_v21 = vpop.eup %3661  ;;  %3679 = vrcp.f32 %v2529_v42  ;;  %v2530_v45 = vadd.f32 1.0, %v3660_v43 }
 0x71c   : > { %v3664_v46 = vpop.eup %3663  ;;  %3681 = vrcp.f32 %v2527_v44  ;;  %v2528_v29 = vadd.f32 1.0, %v3662_v21 }
 0x71d   : > { %v3666_v47 = vpop.eup %3665  ;;  %2621 = vst [vmem:[%s4374_s30 + $0xb0] sm:$0xff] %v3664_v46  ;;  %3683 = vrcp.f32 %v2530_v45 }
 0x71e   : > { %v3668_v48 = vpop.eup %3667  ;;  %2619 = vst [vmem:[%s4374_s30 + $0xa0] sm:$0xff] %v3666_v47  ;;  %3685 = vrcp.f32 %v2528_v29 }
 0x71f   : > { %v3670_v50 = vpop.eup %3669  ;;  %2622 = vst [vmem:[%s4374_s30 + $0xb8] sm:$0xff] %v3668_v48 }
 0x720   : > { %v3672_v52 = vpop.eup %3671  ;;  %2620 = vst [vmem:[%s4374_s30 + $0xa8] sm:$0xff] %v3670_v50 }
 0x721   : > { %v3674_v22 = vpop.eup %3673  ;;  %v2533_v53 = vadd.f32 1.0, %v3672_v52 }
 0x722   : > { %v3676_v39 = vpop.eup %3675  ;;  %v2531_v54 = vadd.f32 1.0, %v3674_v22 }
 0x723   : > { %v3678_v49 = vpop.eup %3677  ;;  %3687 = vrcp.f32 %v2533_v53  ;;  %v2534_v55 = vadd.f32 1.0, %v3676_v39 }
 0x724   : > { %3689 = vrcp.f32 %v2531_v54  ;;  %v2532_v35 = vadd.f32 1.0, %v3678_v49 }
 0x725   : > { %v3680_v23 = vpop.eup %3679  ;;  %3691 = vrcp.f32 %v2534_v55 }
 0x726   : > { %v3682_v56 = vpop.eup %3681  ;;  %2625 = vst [vmem:[%s4374_s30 + $0xd0] sm:$0xff] %v3680_v23  ;;  %3693 = vrcp.f32 %v2532_v35 }
 0x727   : > { %v3684_v57 = vpop.eup %3683  ;;  %2623 = vst [vmem:[%s4374_s30 + $0xc0] sm:$0xff] %v3682_v56 }
 0x728   : > { %v3686_v59 = vpop.eup %3685  ;;  %2626 = vst [vmem:[%s4374_s30 + $0xd8] sm:$0xff] %v3684_v57 }
 0x729   : > { %2624 = vst [vmem:[%s4374_s30 + $0xc8] sm:$0xff] %v3686_v59 }
 0x72d   : > { %v3688_v60 = vpop.eup %3687 }
 0x72e   : > { %v3690_v61 = vpop.eup %3689  ;;  %2629 = vst [vmem:[%s4374_s30 + $0xf0] sm:$0xff] %v3688_v60 }
 0x72f   : > { %v3692_v34 = vpop.eup %3691  ;;  %2627 = vst [vmem:[%s4374_s30 + $0xe0] sm:$0xff] %v3690_v61 }
 0x730   : > { %v3694_v62 = vpop.eup %3693  ;;  %2630 = vst [vmem:[%s4374_s30 + $0xf8] sm:$0xff] %v3692_v34 }
 0x731   : > { %2628 = vst [vmem:[%s4374_s30 + $0xe8] sm:$0xff] %v3694_v62 }
 0x732 PF: > { %s2928_s10 = sadd.s32 4294967294, %s4085_s14  ;;  %s2648_s0 = sshll.u32 %s4374_s30, 4  ;;  %s4648_s0 = int_to_ptr.vmem [resolvable:$true] %s2648_s0 }
 0x733   : > { %s4767_s10 = smov (!%p2822_p13, %s2928_s10), 0  ;;  %s4756_s18 = sld [smem:[#allocation31_spill]] }
 0x734   : > { %s2934_s1 = sshll.u32 %s4767_s10, 12  ;;  %s2632_s13 = scalar_lea.sflag [#allocation7], %s4352_s22 }
 0x735   : > { %s3893_s8 = scalar_lea.vmem %s4648_s0, 4096  ;;  %p4757_p10 = scmp.ne.s32.totalorder %s4733_s19, 0 }
 0x736   : > { %p3894_p1 = scmp.ne.s32.totalorder %s4648_s0, %s3893_s8  ;;  %s3991_s14 = smov [#allocation17]  }
 0x737   : > { %s3897_s24 = sshll.u32 %s3991_s14, 4  ;;  %s3898_s24 = int_to_ptr.vmem [resolvable:$false] %s3897_s24 }
 0x738   : > { %p3895_p11 = pnand %p3894_p1, %p4757_p10  ;;  %s3899_s30 = scalar_lea.vmem %s3898_s24, 8192 }
 0x739   : > { %s4653_s15 = scalar_lea.hbm %s4756_s18, %s2934_s1  ;;  %p3900_p6 = scmp.lt.s32.totalorder %s4648_s0, %s3898_s24 }
 0x73a   : > { %p3896_p4 = pneg %p3895_p11  ;;  %p3901_p2 = scmp.lt.s32.totalorder %s3899_s30, %s3893_s8 }
 0x73c   : > { %p3902_p7 = por %p3901_p2, %p3900_p6 }
 0x73e   : > { %p3903_p5 = pnand %p3902_p7, %p3896_p4 }
 0x740   : > { %3906 = shalt.err (!%p3903_p5)
}
 0x741   : > { %s3907_s20 = scalar_lea.hbm %s4653_s15, 4096  ;;  %s3911_s10 = scalar_lea.hbm %s4756_s18, 4096 }
 0x742   : > { %p3908_p9 = scmp.ne.s32.totalorder %s4653_s15, %s3907_s20  ;;  %p3912_p0 = scmp.lt.u32.totalorder %s4653_s15, %s4756_s18 }
 0x743   : > { %p3913_p3 = scmp.lt.u32.totalorder %s3911_s10, %s3907_s20  ;;  %p3915_p1 = scmp.lt.u32.totalorder %s3907_s20, %s4653_s15 }
 0x744   : > { %p3909_p8 = pnand %p3908_p9, %p4757_p10 }
 0x745   : > { %p3914_p12 = por %p3913_p3, %p3912_p0 }
 0x746   : > { %p3910_p13 = pneg %p3909_p8 }
 0x747   : > { %p3916_p11 = por %p3915_p1, %p3914_p12 }
 0x749   : > { %p3917_p4 = pnand %p3916_p11, %p3910_p13 }
 0x74b   : > { %3920 = shalt.err (!%p3917_p4)
}
 0x74c   : > { %s3992_s12 = smov 128   ;;  %s3993_s8 = smov 8  }
 0x74d   : > { %3385 = dma.vmem_to_hbm [thread:$0]  (%p4757_p10), %s4648_s0, 4096, %s4653_s15, %s2632_s13, %s3992_s12, %s3992_s12, %s3993_s8  }
 0x74e PF: > { %s2663_s14 = sand.u32 1, %s3967_s25   ;;  %p4758_p6 = scmp.ge.s32.totalorder %s3979_s28, 2 }
 0x74f   : > { %p4759_p2 = scmp.ne.s32.totalorder %s4734_s17, 0  ;;  %s2664_s24 = scalar_lea.sflag [#allocation7], %s2663_s14 }
 0x751   : > { %p3411_p7 = pnand %p4759_p2, %p4758_p6 }
 0x753   : > { %3962 = dma.done.wait (!%p3411_p7), %s2664_s24, 4096  }
 0x754   : > { %3964 = vsyncadd (!%p3411_p7), %s2664_s24, 4294963200  ;;  %p27_p5 = scmp.ge.s32.totalorder %s4258_s16, 5   ;;  %s4760_s25 = smov %s3971_s26 }
 0x755   : > { %s4761_s26 = smov %s3975_s27  ;;  %s4762_s27 = smov %s4283_s29 }
 0x756   : > { %s4763_s28 = smov %s4258_s16  ;;  %29 = sbr.rel (!%p27_p5) target bundleno = 15 (0xf), region = 164 }
 0x75d   :  { %2669 = vsyncpa [#allocation6], 1 }
 0x75e   :  { %2671 = vsyncpa [#allocation6 + $0x1], 1 }
 0x75f   :  { %2672 = vsyncpa [#allocation9], 1 }
 0x760   :  { %2673 = vsyncpa [#allocation13], 1 }
 0x761   :  { %2674 = vsyncpa [#allocation16], 1 }
 0x762   :  { %2675 = vsyncpa [#allocation7], 1 }
 0x763   :  { %2677 = vsyncpa [#allocation7 + $0x1], 1 }

</bundles_post_ra>
